<compile_context>
chip_gen: v7x
topology: tpu7x:2x2x1
jax: 0.10.0
libtpu: 0.0.40
codegen_flags: <defaults>
</compile_context>

<pallas_src>
import jax
import jax.numpy as jnp
from jax.experimental import pallas as pl
from jax.experimental.pallas import tpu as pltpu


def _round_up(n, m):
    return ((n + m - 1) // m) * m


# --------------------------------------------------------------------------
# Kernel
# --------------------------------------------------------------------------
def _nerf_mlp_kernel(
    in_ref,                                   # (tm, 128) bf16 packed [x | d | noise]
    w1, b1, w2, b2, w3, b3, w4, b4, w5, b5,   # fc1..fc5
    w6v, w6x, b6, w7, b7,                     # fc6 (skip) + fc7
    wh, whd, bh,                              # fused fc8->feature->add_fc1
    whv, whs, whh, bhead,                     # fused 4-wide head (sigma | rgb)
    out_ref,                                  # (tm, 4) f32  [sigma, r, g, b]
):
    s = in_ref[...]                           # bf16 (tm, 128)

    def mm(a, w):
        return jnp.dot(a, w[...], preferred_element_type=jnp.float32)

    def relu_bf16(t):
        # ReLU in f32 (v5e has no bf16 VPU), then narrow for the next MXU op.
        return jnp.maximum(t, 0.0).astype(jnp.bfloat16)

    v = relu_bf16(mm(s, w1) + b1[...])
    v = relu_bf16(mm(v, w2) + b2[...])
    v = relu_bf16(mm(v, w3) + b3[...])
    v = relu_bf16(mm(v, w4) + b4[...])
    v = relu_bf16(mm(v, w5) + b5[...])
    # skip: cat([v, x]) @ W6  ==  v @ W6_v + slab @ W6_x(zero-padded K)
    v = relu_bf16(mm(v, w6v) + mm(s, w6x) + b6[...])
    v7 = relu_bf16(mm(v, w7) + b7[...])

    # h = relu(cat([feature(fc8(v7)), d]) @ W_af1)  with fc8/feature folded in
    h = relu_bf16(mm(v7, wh) + mm(s, whd) + bh[...])

    # Fused 4-wide head: lane 0 = sigma pre-act (noise picked from the slab by
    # whs), lanes 1..3 = rgb pre-act.  Then relu on lane 0, sigmoid elsewhere.
    pre = mm(v7, whv) + mm(s, whs) + mm(h, whh) + bhead[...]
    lane = jax.lax.broadcasted_iota(jnp.int32, pre.shape, 1)
    out = jnp.where(lane == 0, jnp.maximum(pre, 0.0), jax.nn.sigmoid(pre))
    out_ref[...] = out.astype(out_ref.dtype)


# --------------------------------------------------------------------------
# Parameter packing: fold activation-free layers, pad K-dims to the packed
# slab layout, cast matrices to bf16 (biases stay f32).
# --------------------------------------------------------------------------
def pack_params(p):
    f32, bf16 = jnp.float32, jnp.bfloat16

    w1p = jnp.zeros((128, 256), f32).at[0:63, :].set(p["w1"])
    w6xp = jnp.zeros((128, 256), f32).at[0:63, :].set(p["w6x"])
    waf1dp = jnp.zeros((128, 128), f32).at[64:91, :].set(p["waf1d"])

    # fc8 and feature_layer have no activation -> compose into the heads.
    w_sig = p["w8"] @ p["wsig"]                                    # (256, 1)
    b_sig = p["b8"] @ p["wsig"] + p["bsig"]                        # (1, 1)
    w_h = p["w8"] @ p["wfeat"] @ p["waf1v"]                        # (256, 128)
    b_h = (p["b8"] @ p["wfeat"] + p["bfeat"]) @ p["waf1v"] + p["baf1"]

    # Fused 4-wide head: lane 0 = sigma, lanes 1..3 = rgb.
    w_head_v = jnp.zeros((256, 4), f32).at[:, 0:1].set(w_sig)
    w_head_s = jnp.zeros((128, 4), f32).at[96, 0].set(1.0)         # noise pick
    w_head_h = jnp.zeros((128, 4), f32).at[:, 1:4].set(p["waf2"])
    b_head = jnp.concatenate([b_sig, p["baf2"]], axis=1)           # (1, 4)

    mats = [
        w1p, p["b1"], p["w2"], p["b2"], p["w3"], p["b3"],
        p["w4"], p["b4"], p["w5"], p["b5"],
        p["w6v"], w6xp, p["b6"], p["w7"], p["b7"],
        w_h, waf1dp, b_h,
        w_head_v, w_head_s, w_head_h, b_head,
    ]
    packed = []
    for m in mats:
        m = jnp.asarray(m, f32)
        packed.append(m if m.shape[0] == 1 else m.astype(bf16))   # biases f32
    return packed


# --------------------------------------------------------------------------
# Wrapper
# --------------------------------------------------------------------------
def nerf_forward(x, d, params, *, is_noise, noise_key=None, tm=1024):
    """x: (B, S, 63), d: (B, S, 27) -> (sigma (B*S, 1), rgb (B*S, 3))"""
    B, S, _ = x.shape
    N = B * S
    x2 = x.reshape(N, 63).astype(jnp.float32)
    d2 = d.reshape(N, 27).astype(jnp.float32)

    if is_noise:
        noise = jax.random.normal(noise_key, (N, 1), dtype=jnp.float32)
    else:
        noise = jnp.zeros((N, 1), dtype=jnp.float32)

    # Row tile: big for per-step overhead amortization, adapted down for tiny N.
    tm = _round_up(max(tm, 256), 256)
    tm_eff = min(tm, _round_up(N, 256))
    Np = _round_up(N, tm_eff)

    def pad_rows(a):
        return jnp.pad(a, ((0, Np - N), (0, 0)))

    zeros = lambda w: jnp.zeros((Np, w), jnp.float32)
    # lanes: [ x:0..62 | 0 | d:64..90 | 0*5 | noise:96 | 0*31 ]  -> 128 lanes
    slab = jnp.concatenate(
        [pad_rows(x2), zeros(1), pad_rows(d2), zeros(5), pad_rows(noise), zeros(31)],
        axis=1,
    ).astype(jnp.bfloat16)                                   # (Np, 128)

    packed = pack_params(params)

    in_specs = [pl.BlockSpec((tm_eff, 128), lambda i: (i, 0))] + [
        pl.BlockSpec(w.shape, lambda i: (0, 0)) for w in packed
    ]

    out = pl.pallas_call(
        _nerf_mlp_kernel,
        out_shape=jax.ShapeDtypeStruct((Np, 4), jnp.float32),
        grid_spec=pltpu.PrefetchScalarGridSpec(
            num_scalar_prefetch=0,
            grid=(Np // tm_eff,),
            in_specs=in_specs,
            out_specs=pl.BlockSpec((tm_eff, 4), lambda i: (i, 0)),
        ),
        compiler_params=pltpu.CompilerParams(
            dimension_semantics=("parallel",),
            vmem_limit_bytes=64 * 1024 * 1024,
        ),
    )(slab, *packed)

    sigma = out[:N, 0:1]
    rgb = out[:N, 1:4]
    return sigma, rgb


# --------------------------------------------------------------------------
# Deterministic parameter init (mimics nn.Linear default: U(-1/sqrt(fan_in), +))
# Weights stored as (in, out); torch stores (out, in) and applies x @ W.T.
# --------------------------------------------------------------------------
def init_params(key):
    def linear(key, fan_in, fan_out):
        kw, kb = jax.random.split(key)
        bound = 1.0 / jnp.sqrt(fan_in)
        w = jax.random.uniform(kw, (fan_in, fan_out), jnp.float32, -bound, bound)
        b = jax.random.uniform(kb, (1, fan_out), jnp.float32, -bound, bound)
        return w, b

    keys = jax.random.split(key, 12)
    p = {}
    p["w1"], p["b1"] = linear(keys[0], 63, 256)
    p["w2"], p["b2"] = linear(keys[1], 256, 256)
    p["w3"], p["b3"] = linear(keys[2], 256, 256)
    p["w4"], p["b4"] = linear(keys[3], 256, 256)
    p["w5"], p["b5"] = linear(keys[4], 256, 256)
    w6, p["b6"] = linear(keys[5], 256 + 63, 256)
    p["w6v"], p["w6x"] = w6[:256], w6[256:]          # split skip-concat weight
    p["w7"], p["b7"] = linear(keys[6], 256, 256)
    p["w8"], p["b8"] = linear(keys[7], 256, 256)
    p["wsig"], p["bsig"] = linear(keys[8], 256, 1)
    p["wfeat"], p["bfeat"] = linear(keys[9], 256, 256)
    waf1, p["baf1"] = linear(keys[10], 256 + 27, 128)
    p["waf1v"], p["waf1d"] = waf1[:256], waf1[256:]  # split skip-concat weight
    p["waf2"], p["baf2"] = linear(keys[11], 128, 3)
    return p


# --------------------------------------------------------------------------
# Pure-JAX f32 reference of the ORIGINAL (unfolded) module, for correctness.
# --------------------------------------------------------------------------
def reference_forward(x, d, params, noise):
    B, S, _ = x.shape
    x = x.reshape(B * S, 63)
    d = d.reshape(B * S, 27)
    relu = jax.nn.relu
    v = relu(x @ params["w1"] + params["b1"])
    v = relu(v @ params["w2"] + params["b2"])
    v = relu(v @ params["w3"] + params["b3"])
    v = relu(v @ params["w4"] + params["b4"])
    v = relu(v @ params["w5"] + params["b5"])
    v = relu(v @ params["w6v"] + x @ params["w6x"] + params["b6"])
    v = relu(v @ params["w7"] + params["b7"])
    v = v @ params["w8"] + params["b8"]
    sigma = relu(v @ params["wsig"] + params["bsig"] + noise)
    feat = v @ params["wfeat"] + params["bfeat"]
    h = relu(feat @ params["waf1v"] + d @ params["waf1d"] + params["baf1"])
    rgb = jax.nn.sigmoid(h @ params["waf2"] + params["baf2"])
    return sigma, rgb


if __name__ == "__main__":
    key = jax.random.PRNGKey(0)
    k_par, k_x, k_d, k_noise = jax.random.split(key, 4)

    B, S = 2, 128  # batch_size, sample_num -> N = 256 rows
    x = jax.random.normal(k_x, (B, S, 63), dtype=jnp.float32)
    d = jax.random.normal(k_d, (B, S, 27), dtype=jnp.float32)

    params = init_params(k_par)

    sigma, rgb = nerf_forward(x, d, params, is_noise=True, noise_key=k_noise)
    jax.block_until_ready((sigma, rgb))

    # correctness check against plain-JAX f32 reference (same deterministic
    # noise); bf16 matmul operands + layer folding -> loosened tolerance
    noise_ref = jax.random.normal(k_noise, (B * S, 1), dtype=jnp.float32)
    sigma_ref, rgb_ref = reference_forward(x, d, params, noise_ref)
    assert sigma.shape == (B * S, 1) and rgb.shape == (B * S, 3)
    assert jnp.allclose(sigma, sigma_ref, atol=5e-2, rtol=5e-2), (
        float(jnp.max(jnp.abs(sigma - sigma_ref))))
    assert jnp.allclose(rgb, rgb_ref, atol=5e-2, rtol=5e-2), (
        float(jnp.max(jnp.abs(rgb - rgb_ref))))

    print("KERNEL_OK")
</pallas_src>

<mosaic_0001>
module attributes {stable_mosaic.version = 11 : i64} {
  func.func @_nerf_mlp_kernel(%arg0: i32, %arg1: memref<256x128xbf16, #tpu.memory_space<vmem>>, %arg2: memref<128x256xbf16, #tpu.memory_space<vmem>>, %arg3: memref<1x256xf32, #tpu.memory_space<vmem>>, %arg4: memref<256x256xbf16, #tpu.memory_space<vmem>>, %arg5: memref<1x256xf32, #tpu.memory_space<vmem>>, %arg6: memref<256x256xbf16, #tpu.memory_space<vmem>>, %arg7: memref<1x256xf32, #tpu.memory_space<vmem>>, %arg8: memref<256x256xbf16, #tpu.memory_space<vmem>>, %arg9: memref<1x256xf32, #tpu.memory_space<vmem>>, %arg10: memref<256x256xbf16, #tpu.memory_space<vmem>>, %arg11: memref<1x256xf32, #tpu.memory_space<vmem>>, %arg12: memref<256x256xbf16, #tpu.memory_space<vmem>>, %arg13: memref<128x256xbf16, #tpu.memory_space<vmem>>, %arg14: memref<1x256xf32, #tpu.memory_space<vmem>>, %arg15: memref<256x256xbf16, #tpu.memory_space<vmem>>, %arg16: memref<1x256xf32, #tpu.memory_space<vmem>>, %arg17: memref<256x128xbf16, #tpu.memory_space<vmem>>, %arg18: memref<128x128xbf16, #tpu.memory_space<vmem>>, %arg19: memref<1x128xf32, #tpu.memory_space<vmem>>, %arg20: memref<256x4xbf16, #tpu.memory_space<vmem>>, %arg21: memref<128x4xbf16, #tpu.memory_space<vmem>>, %arg22: memref<128x4xbf16, #tpu.memory_space<vmem>>, %arg23: memref<1x4xf32, #tpu.memory_space<vmem>>, %arg24: memref<256x4xf32, #tpu.memory_space<vmem>>) attributes {dimension_semantics = [#tpu.dimension_semantics<parallel>], iteration_bounds = array<i64: 1>, scalar_prefetch = 0 : i64, scratch_operands = 0 : i64, tpu.core_type = #tpu.core_type<tc>, window_params = [{transform_indices = @transform_0, window_bounds = array<i64: 256, 128>}, {pipeline_mode = #tpu.pipeline_mode<synchronous>, transform_indices = @transform_1, window_bounds = array<i64: 128, 256>}, {pipeline_mode = #tpu.pipeline_mode<synchronous>, transform_indices = @transform_2, window_bounds = array<i64: 1, 256>}, {pipeline_mode = #tpu.pipeline_mode<synchronous>, transform_indices = @transform_3, window_bounds = array<i64: 256, 256>}, {pipeline_mode = #tpu.pipeline_mode<synchronous>, transform_indices = @transform_4, window_bounds = array<i64: 1, 256>}, {pipeline_mode = #tpu.pipeline_mode<synchronous>, transform_indices = @transform_5, window_bounds = array<i64: 256, 256>}, {pipeline_mode = #tpu.pipeline_mode<synchronous>, transform_indices = @transform_6, window_bounds = array<i64: 1, 256>}, {pipeline_mode = #tpu.pipeline_mode<synchronous>, transform_indices = @transform_7, window_bounds = array<i64: 256, 256>}, {pipeline_mode = #tpu.pipeline_mode<synchronous>, transform_indices = @transform_8, window_bounds = array<i64: 1, 256>}, {pipeline_mode = #tpu.pipeline_mode<synchronous>, transform_indices = @transform_9, window_bounds = array<i64: 256, 256>}, {pipeline_mode = #tpu.pipeline_mode<synchronous>, transform_indices = @transform_10, window_bounds = array<i64: 1, 256>}, {pipeline_mode = #tpu.pipeline_mode<synchronous>, transform_indices = @transform_11, window_bounds = array<i64: 256, 256>}, {pipeline_mode = #tpu.pipeline_mode<synchronous>, transform_indices = @transform_12, window_bounds = array<i64: 128, 256>}, {pipeline_mode = #tpu.pipeline_mode<synchronous>, transform_indices = @transform_13, window_bounds = array<i64: 1, 256>}, {pipeline_mode = #tpu.pipeline_mode<synchronous>, transform_indices = @transform_14, window_bounds = array<i64: 256, 256>}, {pipeline_mode = #tpu.pipeline_mode<synchronous>, transform_indices = @transform_15, window_bounds = array<i64: 1, 256>}, {pipeline_mode = #tpu.pipeline_mode<synchronous>, transform_indices = @transform_16, window_bounds = array<i64: 256, 128>}, {pipeline_mode = #tpu.pipeline_mode<synchronous>, transform_indices = @transform_17, window_bounds = array<i64: 128, 128>}, {pipeline_mode = #tpu.pipeline_mode<synchronous>, transform_indices = @transform_18, window_bounds = array<i64: 1, 128>}, {pipeline_mode = #tpu.pipeline_mode<synchronous>, transform_indices = @transform_19, window_bounds = array<i64: 256, 4>}, {pipeline_mode = #tpu.pipeline_mode<synchronous>, transform_indices = @transform_20, window_bounds = array<i64: 128, 4>}, {pipeline_mode = #tpu.pipeline_mode<synchronous>, transform_indices = @transform_21, window_bounds = array<i64: 128, 4>}, {pipeline_mode = #tpu.pipeline_mode<synchronous>, transform_indices = @transform_22, window_bounds = array<i64: 1, 4>}, {transform_indices = @transform_23, window_bounds = array<i64: 256, 4>}]} {
    %c0 = arith.constant 0 : index
    %c0_0 = arith.constant 0 : index
    %0 = vector.load %arg1[%c0, %c0_0] : memref<256x128xbf16, #tpu.memory_space<vmem>>, vector<256x128xbf16>
    %c0_1 = arith.constant 0 : index
    %c0_2 = arith.constant 0 : index
    %1 = vector.load %arg2[%c0_1, %c0_2] : memref<128x256xbf16, #tpu.memory_space<vmem>>, vector<128x256xbf16>
    %cst = arith.constant dense<0.000000e+00> : vector<256x256xf32>
    %2 = tpu.matmul %0, %1, %cst {dimension_numbers = #tpu.dot_dimension_numbers<[1], [0], [0], [1], [0, 0, 1, 1], [], []>} : vector<256x128xbf16>, vector<128x256xbf16>, vector<256x256xf32> -> vector<256x256xf32>
    %c0_3 = arith.constant 0 : index
    %c0_4 = arith.constant 0 : index
    %3 = vector.load %arg3[%c0_3, %c0_4] : memref<1x256xf32, #tpu.memory_space<vmem>>, vector<1x256xf32>
    %4 = vector.broadcast %3 : vector<1x256xf32> to vector<256x256xf32>
    %5 = arith.addf %2, %4 : vector<256x256xf32>
    %cst_5 = arith.constant 0.000000e+00 : f32
    %6 = vector.broadcast %cst_5 : f32 to vector<256x256xf32>
    %7 = arith.maximumf %5, %6 : vector<256x256xf32>
    %8 = arith.truncf %7 : vector<256x256xf32> to vector<256x256xbf16>
    %c0_6 = arith.constant 0 : index
    %c0_7 = arith.constant 0 : index
    %9 = vector.load %arg4[%c0_6, %c0_7] : memref<256x256xbf16, #tpu.memory_space<vmem>>, vector<256x256xbf16>
    %cst_8 = arith.constant dense<0.000000e+00> : vector<256x256xf32>
    %10 = tpu.matmul %8, %9, %cst_8 {dimension_numbers = #tpu.dot_dimension_numbers<[1], [0], [0], [1], [0, 0, 1, 1], [], []>} : vector<256x256xbf16>, vector<256x256xbf16>, vector<256x256xf32> -> vector<256x256xf32>
    %c0_9 = arith.constant 0 : index
    %c0_10 = arith.constant 0 : index
    %11 = vector.load %arg5[%c0_9, %c0_10] : memref<1x256xf32, #tpu.memory_space<vmem>>, vector<1x256xf32>
    %12 = vector.broadcast %11 : vector<1x256xf32> to vector<256x256xf32>
    %13 = arith.addf %10, %12 : vector<256x256xf32>
    %cst_11 = arith.constant 0.000000e+00 : f32
    %14 = vector.broadcast %cst_11 : f32 to vector<256x256xf32>
    %15 = arith.maximumf %13, %14 : vector<256x256xf32>
    %16 = arith.truncf %15 : vector<256x256xf32> to vector<256x256xbf16>
    %c0_12 = arith.constant 0 : index
    %c0_13 = arith.constant 0 : index
    %17 = vector.load %arg6[%c0_12, %c0_13] : memref<256x256xbf16, #tpu.memory_space<vmem>>, vector<256x256xbf16>
    %cst_14 = arith.constant dense<0.000000e+00> : vector<256x256xf32>
    %18 = tpu.matmul %16, %17, %cst_14 {dimension_numbers = #tpu.dot_dimension_numbers<[1], [0], [0], [1], [0, 0, 1, 1], [], []>} : vector<256x256xbf16>, vector<256x256xbf16>, vector<256x256xf32> -> vector<256x256xf32>
    %c0_15 = arith.constant 0 : index
    %c0_16 = arith.constant 0 : index
    %19 = vector.load %arg7[%c0_15, %c0_16] : memref<1x256xf32, #tpu.memory_space<vmem>>, vector<1x256xf32>
    %20 = vector.broadcast %19 : vector<1x256xf32> to vector<256x256xf32>
    %21 = arith.addf %18, %20 : vector<256x256xf32>
    %cst_17 = arith.constant 0.000000e+00 : f32
    %22 = vector.broadcast %cst_17 : f32 to vector<256x256xf32>
    %23 = arith.maximumf %21, %22 : vector<256x256xf32>
    %24 = arith.truncf %23 : vector<256x256xf32> to vector<256x256xbf16>
    %c0_18 = arith.constant 0 : index
    %c0_19 = arith.constant 0 : index
    %25 = vector.load %arg8[%c0_18, %c0_19] : memref<256x256xbf16, #tpu.memory_space<vmem>>, vector<256x256xbf16>
    %cst_20 = arith.constant dense<0.000000e+00> : vector<256x256xf32>
    %26 = tpu.matmul %24, %25, %cst_20 {dimension_numbers = #tpu.dot_dimension_numbers<[1], [0], [0], [1], [0, 0, 1, 1], [], []>} : vector<256x256xbf16>, vector<256x256xbf16>, vector<256x256xf32> -> vector<256x256xf32>
    %c0_21 = arith.constant 0 : index
    %c0_22 = arith.constant 0 : index
    %27 = vector.load %arg9[%c0_21, %c0_22] : memref<1x256xf32, #tpu.memory_space<vmem>>, vector<1x256xf32>
    %28 = vector.broadcast %27 : vector<1x256xf32> to vector<256x256xf32>
    %29 = arith.addf %26, %28 : vector<256x256xf32>
    %cst_23 = arith.constant 0.000000e+00 : f32
    %30 = vector.broadcast %cst_23 : f32 to vector<256x256xf32>
    %31 = arith.maximumf %29, %30 : vector<256x256xf32>
    %32 = arith.truncf %31 : vector<256x256xf32> to vector<256x256xbf16>
    %c0_24 = arith.constant 0 : index
    %c0_25 = arith.constant 0 : index
    %33 = vector.load %arg10[%c0_24, %c0_25] : memref<256x256xbf16, #tpu.memory_space<vmem>>, vector<256x256xbf16>
    %cst_26 = arith.constant dense<0.000000e+00> : vector<256x256xf32>
    %34 = tpu.matmul %32, %33, %cst_26 {dimension_numbers = #tpu.dot_dimension_numbers<[1], [0], [0], [1], [0, 0, 1, 1], [], []>} : vector<256x256xbf16>, vector<256x256xbf16>, vector<256x256xf32> -> vector<256x256xf32>
    %c0_27 = arith.constant 0 : index
    %c0_28 = arith.constant 0 : index
    %35 = vector.load %arg11[%c0_27, %c0_28] : memref<1x256xf32, #tpu.memory_space<vmem>>, vector<1x256xf32>
    %36 = vector.broadcast %35 : vector<1x256xf32> to vector<256x256xf32>
    %37 = arith.addf %34, %36 : vector<256x256xf32>
    %cst_29 = arith.constant 0.000000e+00 : f32
    %38 = vector.broadcast %cst_29 : f32 to vector<256x256xf32>
    %39 = arith.maximumf %37, %38 : vector<256x256xf32>
    %40 = arith.truncf %39 : vector<256x256xf32> to vector<256x256xbf16>
    %c0_30 = arith.constant 0 : index
    %c0_31 = arith.constant 0 : index
    %41 = vector.load %arg12[%c0_30, %c0_31] : memref<256x256xbf16, #tpu.memory_space<vmem>>, vector<256x256xbf16>
    %cst_32 = arith.constant dense<0.000000e+00> : vector<256x256xf32>
    %42 = tpu.matmul %40, %41, %cst_32 {dimension_numbers = #tpu.dot_dimension_numbers<[1], [0], [0], [1], [0, 0, 1, 1], [], []>} : vector<256x256xbf16>, vector<256x256xbf16>, vector<256x256xf32> -> vector<256x256xf32>
    %c0_33 = arith.constant 0 : index
    %c0_34 = arith.constant 0 : index
    %43 = vector.load %arg13[%c0_33, %c0_34] : memref<128x256xbf16, #tpu.memory_space<vmem>>, vector<128x256xbf16>
    %cst_35 = arith.constant dense<0.000000e+00> : vector<256x256xf32>
    %44 = tpu.matmul %0, %43, %cst_35 {dimension_numbers = #tpu.dot_dimension_numbers<[1], [0], [0], [1], [0, 0, 1, 1], [], []>} : vector<256x128xbf16>, vector<128x256xbf16>, vector<256x256xf32> -> vector<256x256xf32>
    %45 = arith.addf %42, %44 : vector<256x256xf32>
    %c0_36 = arith.constant 0 : index
    %c0_37 = arith.constant 0 : index
    %46 = vector.load %arg14[%c0_36, %c0_37] : memref<1x256xf32, #tpu.memory_space<vmem>>, vector<1x256xf32>
    %47 = vector.broadcast %46 : vector<1x256xf32> to vector<256x256xf32>
    %48 = arith.addf %45, %47 : vector<256x256xf32>
    %cst_38 = arith.constant 0.000000e+00 : f32
    %49 = vector.broadcast %cst_38 : f32 to vector<256x256xf32>
    %50 = arith.maximumf %48, %49 : vector<256x256xf32>
    %51 = arith.truncf %50 : vector<256x256xf32> to vector<256x256xbf16>
    %c0_39 = arith.constant 0 : index
    %c0_40 = arith.constant 0 : index
    %52 = vector.load %arg15[%c0_39, %c0_40] : memref<256x256xbf16, #tpu.memory_space<vmem>>, vector<256x256xbf16>
    %cst_41 = arith.constant dense<0.000000e+00> : vector<256x256xf32>
    %53 = tpu.matmul %51, %52, %cst_41 {dimension_numbers = #tpu.dot_dimension_numbers<[1], [0], [0], [1], [0, 0, 1, 1], [], []>} : vector<256x256xbf16>, vector<256x256xbf16>, vector<256x256xf32> -> vector<256x256xf32>
    %c0_42 = arith.constant 0 : index
    %c0_43 = arith.constant 0 : index
    %54 = vector.load %arg16[%c0_42, %c0_43] : memref<1x256xf32, #tpu.memory_space<vmem>>, vector<1x256xf32>
    %55 = vector.broadcast %54 : vector<1x256xf32> to vector<256x256xf32>
    %56 = arith.addf %53, %55 : vector<256x256xf32>
    %cst_44 = arith.constant 0.000000e+00 : f32
    %57 = vector.broadcast %cst_44 : f32 to vector<256x256xf32>
    %58 = arith.maximumf %56, %57 : vector<256x256xf32>
    %59 = arith.truncf %58 : vector<256x256xf32> to vector<256x256xbf16>
    %c0_45 = arith.constant 0 : index
    %c0_46 = arith.constant 0 : index
    %60 = vector.load %arg17[%c0_45, %c0_46] : memref<256x128xbf16, #tpu.memory_space<vmem>>, vector<256x128xbf16>
    %cst_47 = arith.constant dense<0.000000e+00> : vector<256x128xf32>
    %61 = tpu.matmul %59, %60, %cst_47 {dimension_numbers = #tpu.dot_dimension_numbers<[1], [0], [0], [1], [0, 0, 1, 1], [], []>} : vector<256x256xbf16>, vector<256x128xbf16>, vector<256x128xf32> -> vector<256x128xf32>
    %c0_48 = arith.constant 0 : index
    %c0_49 = arith.constant 0 : index
    %62 = vector.load %arg18[%c0_48, %c0_49] : memref<128x128xbf16, #tpu.memory_space<vmem>>, vector<128x128xbf16>
    %cst_50 = arith.constant dense<0.000000e+00> : vector<256x128xf32>
    %63 = tpu.matmul %0, %62, %cst_50 {dimension_numbers = #tpu.dot_dimension_numbers<[1], [0], [0], [1], [0, 0, 1, 1], [], []>} : vector<256x128xbf16>, vector<128x128xbf16>, vector<256x128xf32> -> vector<256x128xf32>
    %64 = arith.addf %61, %63 : vector<256x128xf32>
    %c0_51 = arith.constant 0 : index
    %c0_52 = arith.constant 0 : index
    %65 = vector.load %arg19[%c0_51, %c0_52] : memref<1x128xf32, #tpu.memory_space<vmem>>, vector<1x128xf32>
    %66 = vector.broadcast %65 : vector<1x128xf32> to vector<256x128xf32>
    %67 = arith.addf %64, %66 : vector<256x128xf32>
    %cst_53 = arith.constant 0.000000e+00 : f32
    %68 = vector.broadcast %cst_53 : f32 to vector<256x128xf32>
    %69 = arith.maximumf %67, %68 : vector<256x128xf32>
    %70 = arith.truncf %69 : vector<256x128xf32> to vector<256x128xbf16>
    %c0_54 = arith.constant 0 : index
    %c0_55 = arith.constant 0 : index
    %71 = vector.load %arg20[%c0_54, %c0_55] : memref<256x4xbf16, #tpu.memory_space<vmem>>, vector<256x4xbf16>
    %cst_56 = arith.constant dense<0.000000e+00> : vector<256x4xf32>
    %72 = tpu.matmul %59, %71, %cst_56 {dimension_numbers = #tpu.dot_dimension_numbers<[1], [0], [0], [1], [0, 0, 1, 1], [], []>} : vector<256x256xbf16>, vector<256x4xbf16>, vector<256x4xf32> -> vector<256x4xf32>
    %c0_57 = arith.constant 0 : index
    %c0_58 = arith.constant 0 : index
    %73 = vector.load %arg21[%c0_57, %c0_58] : memref<128x4xbf16, #tpu.memory_space<vmem>>, vector<128x4xbf16>
    %cst_59 = arith.constant dense<0.000000e+00> : vector<256x4xf32>
    %74 = tpu.matmul %0, %73, %cst_59 {dimension_numbers = #tpu.dot_dimension_numbers<[1], [0], [0], [1], [0, 0, 1, 1], [], []>} : vector<256x128xbf16>, vector<128x4xbf16>, vector<256x4xf32> -> vector<256x4xf32>
    %75 = arith.addf %72, %74 : vector<256x4xf32>
    %c0_60 = arith.constant 0 : index
    %c0_61 = arith.constant 0 : index
    %76 = vector.load %arg22[%c0_60, %c0_61] : memref<128x4xbf16, #tpu.memory_space<vmem>>, vector<128x4xbf16>
    %cst_62 = arith.constant dense<0.000000e+00> : vector<256x4xf32>
    %77 = tpu.matmul %70, %76, %cst_62 {dimension_numbers = #tpu.dot_dimension_numbers<[1], [0], [0], [1], [0, 0, 1, 1], [], []>} : vector<256x128xbf16>, vector<128x4xbf16>, vector<256x4xf32> -> vector<256x4xf32>
    %78 = arith.addf %75, %77 : vector<256x4xf32>
    %c0_63 = arith.constant 0 : index
    %c0_64 = arith.constant 0 : index
    %79 = vector.load %arg23[%c0_63, %c0_64] : memref<1x4xf32, #tpu.memory_space<vmem>>, vector<1x4xf32>
    %80 = vector.broadcast %79 : vector<1x4xf32> to vector<256x4xf32>
    %81 = arith.addf %78, %80 : vector<256x4xf32>
    %82 = tpu.iota {dimensions = array<i32: 1>} : vector<256x4xi32>
    %c0_i32 = arith.constant 0 : i32
    %83 = vector.broadcast %c0_i32 : i32 to vector<256x4xi32>
    %84 = arith.cmpi eq, %82, %83 : vector<256x4xi32>
    %cst_65 = arith.constant 0.000000e+00 : f32
    %85 = vector.broadcast %cst_65 : f32 to vector<256x4xf32>
    %86 = arith.maximumf %81, %85 : vector<256x4xf32>
    %87 = arith.negf %81 : vector<256x4xf32>
    %88 = math.exp %87 : vector<256x4xf32>
    %cst_66 = arith.constant 1.000000e+00 : f32
    %89 = vector.broadcast %cst_66 : f32 to vector<256x4xf32>
    %90 = arith.addf %89, %88 : vector<256x4xf32>
    %91 = arith.divf %89, %90 : vector<256x4xf32>
    %92 = arith.select %84, %86, %91 : vector<256x4xi1>, vector<256x4xf32>
    %c0_67 = arith.constant 0 : index
    %c0_68 = arith.constant 0 : index
    %93 = vector.load %arg24[%c0_67, %c0_68] : memref<256x4xf32, #tpu.memory_space<vmem>>, vector<256x4xf32>
    tpu.vector_store %arg24[%c0_67, %c0_68], %92 {strides = array<i32>} : memref<256x4xf32, #tpu.memory_space<vmem>>, vector<256x4xf32>,
    return
  }
  func.func @transform_0(%arg0: i32) -> (i32, i32) {
    %c0_i32 = arith.constant 0 : i32
    %c0_i32_0 = arith.constant 0 : i32
    return %arg0, %c0_i32 : i32, i32
  }
  func.func @transform_1(%arg0: i32) -> (i32, i32) {
    %c0_i32 = arith.constant 0 : i32
    %c0_i32_0 = arith.constant 0 : i32
    %c0_i32_1 = arith.constant 0 : i32
    return %c0_i32, %c0_i32_0 : i32, i32
  }
  func.func @transform_2(%arg0: i32) -> (i32, i32) {
    %c0_i32 = arith.constant 0 : i32
    %c0_i32_0 = arith.constant 0 : i32
    %c0_i32_1 = arith.constant 0 : i32
    return %c0_i32, %c0_i32_0 : i32, i32
  }
  func.func @transform_3(%arg0: i32) -> (i32, i32) {
    %c0_i32 = arith.constant 0 : i32
    %c0_i32_0 = arith.constant 0 : i32
    %c0_i32_1 = arith.constant 0 : i32
    return %c0_i32, %c0_i32_0 : i32, i32
  }
  func.func @transform_4(%arg0: i32) -> (i32, i32) {
    %c0_i32 = arith.constant 0 : i32
    %c0_i32_0 = arith.constant 0 : i32
    %c0_i32_1 = arith.constant 0 : i32
    return %c0_i32, %c0_i32_0 : i32, i32
  }
  func.func @transform_5(%arg0: i32) -> (i32, i32) {
    %c0_i32 = arith.constant 0 : i32
    %c0_i32_0 = arith.constant 0 : i32
    %c0_i32_1 = arith.constant 0 : i32
    return %c0_i32, %c0_i32_0 : i32, i32
  }
  func.func @transform_6(%arg0: i32) -> (i32, i32) {
    %c0_i32 = arith.constant 0 : i32
    %c0_i32_0 = arith.constant 0 : i32
    %c0_i32_1 = arith.constant 0 : i32
    return %c0_i32, %c0_i32_0 : i32, i32
  }
  func.func @transform_7(%arg0: i32) -> (i32, i32) {
    %c0_i32 = arith.constant 0 : i32
    %c0_i32_0 = arith.constant 0 : i32
    %c0_i32_1 = arith.constant 0 : i32
    return %c0_i32, %c0_i32_0 : i32, i32
  }
  func.func @transform_8(%arg0: i32) -> (i32, i32) {
    %c0_i32 = arith.constant 0 : i32
    %c0_i32_0 = arith.constant 0 : i32
    %c0_i32_1 = arith.constant 0 : i32
    return %c0_i32, %c0_i32_0 : i32, i32
  }
  func.func @transform_9(%arg0: i32) -> (i32, i32) {
    %c0_i32 = arith.constant 0 : i32
    %c0_i32_0 = arith.constant 0 : i32
    %c0_i32_1 = arith.constant 0 : i32
    return %c0_i32, %c0_i32_0 : i32, i32
  }
  func.func @transform_10(%arg0: i32) -> (i32, i32) {
    %c0_i32 = arith.constant 0 : i32
    %c0_i32_0 = arith.constant 0 : i32
    %c0_i32_1 = arith.constant 0 : i32
    return %c0_i32, %c0_i32_0 : i32, i32
  }
  func.func @transform_11(%arg0: i32) -> (i32, i32) {
    %c0_i32 = arith.constant 0 : i32
    %c0_i32_0 = arith.constant 0 : i32
    %c0_i32_1 = arith.constant 0 : i32
    return %c0_i32, %c0_i32_0 : i32, i32
  }
  func.func @transform_12(%arg0: i32) -> (i32, i32) {
    %c0_i32 = arith.constant 0 : i32
    %c0_i32_0 = arith.constant 0 : i32
    %c0_i32_1 = arith.constant 0 : i32
    return %c0_i32, %c0_i32_0 : i32, i32
  }
  func.func @transform_13(%arg0: i32) -> (i32, i32) {
    %c0_i32 = arith.constant 0 : i32
    %c0_i32_0 = arith.constant 0 : i32
    %c0_i32_1 = arith.constant 0 : i32
    return %c0_i32, %c0_i32_0 : i32, i32
  }
  func.func @transform_14(%arg0: i32) -> (i32, i32) {
    %c0_i32 = arith.constant 0 : i32
    %c0_i32_0 = arith.constant 0 : i32
    %c0_i32_1 = arith.constant 0 : i32
    return %c0_i32, %c0_i32_0 : i32, i32
  }
  func.func @transform_15(%arg0: i32) -> (i32, i32) {
    %c0_i32 = arith.constant 0 : i32
    %c0_i32_0 = arith.constant 0 : i32
    %c0_i32_1 = arith.constant 0 : i32
    return %c0_i32, %c0_i32_0 : i32, i32
  }
  func.func @transform_16(%arg0: i32) -> (i32, i32) {
    %c0_i32 = arith.constant 0 : i32
    %c0_i32_0 = arith.constant 0 : i32
    %c0_i32_1 = arith.constant 0 : i32
    return %c0_i32, %c0_i32_0 : i32, i32
  }
  func.func @transform_17(%arg0: i32) -> (i32, i32) {
    %c0_i32 = arith.constant 0 : i32
    %c0_i32_0 = arith.constant 0 : i32
    %c0_i32_1 = arith.constant 0 : i32
    return %c0_i32, %c0_i32_0 : i32, i32
  }
  func.func @transform_18(%arg0: i32) -> (i32, i32) {
    %c0_i32 = arith.constant 0 : i32
    %c0_i32_0 = arith.constant 0 : i32
    %c0_i32_1 = arith.constant 0 : i32
    return %c0_i32, %c0_i32_0 : i32, i32
  }
  func.func @transform_19(%arg0: i32) -> (i32, i32) {
    %c0_i32 = arith.constant 0 : i32
    %c0_i32_0 = arith.constant 0 : i32
    %c0_i32_1 = arith.constant 0 : i32
    return %c0_i32, %c0_i32_0 : i32, i32
  }
  func.func @transform_20(%arg0: i32) -> (i32, i32) {
    %c0_i32 = arith.constant 0 : i32
    %c0_i32_0 = arith.constant 0 : i32
    %c0_i32_1 = arith.constant 0 : i32
    return %c0_i32, %c0_i32_0 : i32, i32
  }
  func.func @transform_21(%arg0: i32) -> (i32, i32) {
    %c0_i32 = arith.constant 0 : i32
    %c0_i32_0 = arith.constant 0 : i32
    %c0_i32_1 = arith.constant 0 : i32
    return %c0_i32, %c0_i32_0 : i32, i32
  }
  func.func @transform_22(%arg0: i32) -> (i32, i32) {
    %c0_i32 = arith.constant 0 : i32
    %c0_i32_0 = arith.constant 0 : i32
    %c0_i32_1 = arith.constant 0 : i32
    return %c0_i32, %c0_i32_0 : i32, i32
  }
  func.func @transform_23(%arg0: i32) -> (i32, i32) {
    %c0_i32 = arith.constant 0 : i32
    %c0_i32_0 = arith.constant 0 : i32
    return %arg0, %c0_i32 : i32, i32
  }
}

</mosaic_0001>

<bundles_post_ra>
// kernel: tpu_custom_call.1
= control target key start
LH: loop header
LB: loop body
LE: loop exit
PB: predicated region body
PF: predicated region fallthrough
CT: control target
= control target key end

     0   :  { %s9685_s0 = inlined_call_operand.hbm [shape: bf16[256,128], index: 0, kind: input, shape index: {}]   ;;  %s9686_s1 = inlined_call_operand.hbm [shape: bf16[128,256], index: 1, kind: input, shape index: {}]   ;;  %s9687_s2 = inlined_call_operand.hbm [shape: f32[1,256], index: 2, kind: input, shape index: {}]   ;;  %s9688_s3 = inlined_call_operand.hbm [shape: bf16[256,256], index: 3, kind: input, shape index: {}]   ;;  %s9689_s4 = inlined_call_operand.hbm [shape: f32[1,256], index: 4, kind: input, shape index: {}]   ;;  %s9690_s5 = inlined_call_operand.hbm [shape: bf16[256,256], index: 5, kind: input, shape index: {}]   ;;  %s9691_s6 = inlined_call_operand.hbm [shape: f32[1,256], index: 6, kind: input, shape index: {}]   ;;  %s9692_s7 = inlined_call_operand.hbm [shape: bf16[256,256], index: 7, kind: input, shape index: {}]   ;;  %s9693_s8 = inlined_call_operand.hbm [shape: f32[1,256], index: 8, kind: input, shape index: {}]   ;;  %s9694_s9 = inlined_call_operand.hbm [shape: bf16[256,256], index: 9, kind: input, shape index: {}]   ;;  %s9695_s10 = inlined_call_operand.hbm [shape: f32[1,256], index: 10, kind: input, shape index: {}]   ;;  %s9696_s11 = inlined_call_operand.hbm [shape: bf16[256,256], index: 11, kind: input, shape index: {}]   ;;  %s9697_s12 = inlined_call_operand.hbm [shape: bf16[128,256], index: 12, kind: input, shape index: {}]   ;;  %s9698_s13 = inlined_call_operand.hbm [shape: f32[1,256], index: 13, kind: input, shape index: {}]   ;;  %s9699_s14 = inlined_call_operand.hbm [shape: bf16[256,256], index: 14, kind: input, shape index: {}]   ;;  %s9700_s15 = inlined_call_operand.hbm [shape: f32[1,256], index: 15, kind: input, shape index: {}]   ;;  %s9701_s16 = inlined_call_operand.hbm [shape: bf16[256,128], index: 16, kind: input, shape index: {}]   ;;  %s9702_s17 = inlined_call_operand.hbm [shape: bf16[128,128], index: 17, kind: input, shape index: {}]   ;;  %s9703_s18 = inlined_call_operand.hbm [shape: f32[1,128], index: 18, kind: input, shape index: {}]   ;;  %s9704_s19 = inlined_call_operand.hbm [shape: bf16[256,4], index: 19, kind: input, shape index: {}]   ;;  %s9705_s20 = inlined_call_operand.hbm [shape: bf16[128,4], index: 20, kind: input, shape index: {}]   ;;  %s9706_s21 = inlined_call_operand.hbm [shape: bf16[128,4], index: 21, kind: input, shape index: {}]   ;;  %s9707_s22 = inlined_call_operand.hbm [shape: f32[1,4], index: 22, kind: input, shape index: {}]   ;;  %s9708_s23 = inlined_call_operand.hbm [shape: f32[256,4], index: 23, kind: output, shape index: {}]  }
   0x1   :  { %9720 = sst [smem:[#allocation52_spill]] %s9685_s0 }
   0x2   :  { %9721 = sst [smem:[#allocation53_spill]] %s9686_s1 }
   0x3   :  { %9722 = sst [smem:[#allocation54_spill]] %s9687_s2 }
   0x4   :  { %9723 = sst [smem:[#allocation55_spill]] %s9688_s3 }
   0x5   :  { %9724 = sst [smem:[#allocation56_spill]] %s9689_s4 }
   0x6   :  { %9725 = sst [smem:[#allocation57_spill]] %s9690_s5 }
   0x7   :  { %9726 = sst [smem:[#allocation58_spill]] %s9691_s6 }
   0x8   :  { %9727 = sst [smem:[#allocation59_spill]] %s9692_s7 }
   0x9   :  { %9728 = sst [smem:[#allocation60_spill]] %s9705_s20 }
   0xa   :  { %9729 = sst [smem:[#allocation61_spill]] %s9707_s22 }
   0xb   :  { %9730 = sst [smem:[#allocation62_spill]] %s9708_s23 }
   0xc   :  { %28 = vsyncpa [#allocation3], 0 }
   0xd   :  { %29 = vsyncpa [#allocation6], 0 }
   0xe   :  { %30 = vsyncpa [#allocation9], 0 }
   0xf   :  { %31 = vsyncpa [#allocation12], 0 }
  0x10   :  { %32 = vsyncpa [#allocation15], 0 }
  0x11   :  { %33 = vsyncpa [#allocation18], 0 }
  0x12   :  { %34 = vsyncpa [#allocation21], 0 }
  0x13   :  { %35 = vsyncpa [#allocation24], 0 }
  0x14   :  { %36 = vsyncpa [#allocation27], 0 }
  0x15   :  { %37 = vsyncpa [#allocation30], 0 }
  0x16   :  { %38 = vsyncpa [#allocation33], 0 }
  0x17   :  { %39 = vsyncpa [#allocation36], 0 }
  0x18   :  { %40 = vsyncpa [#allocation4], 0  ;;  %s8017_s4 = smov [#allocation5]   ;;  %s9731_s5 = sld [smem:[#allocation53_spill]] }
  0x19   :  { %s58_s30 = sshll.u32 %s8017_s4, 4  ;;  %s59_s30 = int_to_ptr.vmem [resolvable:$true] %s58_s30 }
  0x1e   :  { %s7463_s1 = scalar_lea.hbm %s9731_s5, 2048 }
  0x1f   :  { %p7464_p0 = scmp.ne.s32.totalorder %s9731_s5, %s7463_s1  ;;  %p7467_p1 = scmp.lt.u32.totalorder %s7463_s1, %s9731_s5 }
  0x21   :  { %p7469_p2 = pnand %p7467_p1, %p7464_p0 }
  0x23   :  { %7472 = shalt.err (!%p7469_p2)
}
  0x24   :  { %s7473_s7 = scalar_lea.vmem %s59_s30, 2048  ;;  %p7478_p4 = scmp.lt.s32.totalorder %s59_s30, %s59_s30 }
  0x25   :  { %p7474_p3 = scmp.ne.s32.totalorder %s59_s30, %s7473_s7  ;;  %p7479_p5 = scmp.lt.s32.totalorder %s7473_s7, %s7473_s7 }
  0x27   :  { %p7480_p6 = por %p7479_p5, %p7478_p4 }
  0x29   :  { %p7481_p7 = pnand %p7480_p6, %p7474_p3 }
  0x2b   :  { %7484 = shalt.err (!%p7481_p7)
}
  0x2c   :  { %s8018_s28 = smov 128   ;;  %s8019_s29 = smov 8  }
  0x2d   :  { %64 = dma.hbm_to_vmem [thread:$0]  %s9731_s5, 2048, %s59_s30, [#allocation6], %s8018_s28, %s8018_s28, %s8019_s29  }
  0x2e   :  { %s8020_s4 = smov [#allocation8]   ;;  %s8021_s25 = smov [#allocation11]  }
  0x2f   :  { %s80_s24 = sshll.u32 %s8020_s4, 4  ;;  %s102_s1 = sshll.u32 %s8021_s25, 4  ;;  %s81_s24 = int_to_ptr.vmem [resolvable:$true] %s80_s24  ;;  %s103_s1 = int_to_ptr.vmem [resolvable:$true] %s102_s1 }
  0x30   :  { %s9732_s6 = sld [smem:[#allocation55_spill]] }
  0x36   :  { %s7485_s27 = scalar_lea.hbm %s9732_s6, 4096 }
  0x37   :  { %p7486_p8 = scmp.ne.s32.totalorder %s9732_s6, %s7485_s27  ;;  %p7489_p9 = scmp.lt.u32.totalorder %s7485_s27, %s9732_s6 }
  0x39   :  { %p7491_p10 = pnand %p7489_p9, %p7486_p8 }
  0x3b   :  { %7494 = shalt.err (!%p7491_p10)
}
  0x3c   :  { %s7495_s30 = scalar_lea.vmem %s81_s24, 4096  ;;  %p7500_p12 = scmp.lt.s32.totalorder %s81_s24, %s81_s24 }
  0x3d   :  { %p7496_p11 = scmp.ne.s32.totalorder %s81_s24, %s7495_s30  ;;  %p7501_p13 = scmp.lt.s32.totalorder %s7495_s30, %s7495_s30 }
  0x3f   :  { %p7502_p0 = por %p7501_p13, %p7500_p12 }
  0x41   :  { %p7503_p1 = pnand %p7502_p0, %p7496_p11 }
  0x43   :  { %7506 = shalt.err (!%p7503_p1)
}
  0x44   :  { %86 = dma.hbm_to_vmem [thread:$0]  %s9732_s6, 4096, %s81_s24, [#allocation9], %s8018_s28, %s8018_s28, %s8019_s29  }
  0x45   :  { %s9733_s22 = sld [smem:[#allocation57_spill]] }
  0x4b   :  { %s7507_s0 = scalar_lea.hbm %s9733_s22, 4096 }
  0x4c   :  { %p7508_p2 = scmp.ne.s32.totalorder %s9733_s22, %s7507_s0  ;;  %p7511_p3 = scmp.lt.u32.totalorder %s7507_s0, %s9733_s22 }
  0x4e   :  { %p7513_p4 = pnand %p7511_p3, %p7508_p2 }
  0x50   :  { %7516 = shalt.err (!%p7513_p4)
}
  0x51   :  { %s7517_s27 = scalar_lea.vmem %s103_s1, 4096  ;;  %p7522_p6 = scmp.lt.s32.totalorder %s103_s1, %s103_s1 }
  0x52   :  { %p7518_p5 = scmp.ne.s32.totalorder %s103_s1, %s7517_s27  ;;  %p7523_p7 = scmp.lt.s32.totalorder %s7517_s27, %s7517_s27 }
  0x54   :  { %p7524_p8 = por %p7523_p7, %p7522_p6 }
  0x56   :  { %p7525_p9 = pnand %p7524_p8, %p7518_p5 }
  0x58   :  { %7528 = shalt.err (!%p7525_p9)
}
  0x59   :  { %108 = dma.hbm_to_vmem [thread:$0]  %s9733_s22, 4096, %s103_s1, [#allocation12], %s8018_s28, %s8018_s28, %s8019_s29  }
  0x5a   :  { %s8022_s7 = smov [#allocation14]   ;;  %s8023_s5 = smov [#allocation17]  }
  0x5b   :  { %s124_s30 = sshll.u32 %s8022_s7, 4  ;;  %s146_s3 = sshll.u32 %s8023_s5, 4  ;;  %s125_s30 = int_to_ptr.vmem [resolvable:$true] %s124_s30  ;;  %s147_s3 = int_to_ptr.vmem [resolvable:$true] %s146_s3 }
  0x5c   :  { %s9734_s0 = sld [smem:[#allocation59_spill]] }
  0x62   :  { %s7529_s4 = scalar_lea.hbm %s9734_s0, 4096 }
  0x63   :  { %p7530_p10 = scmp.ne.s32.totalorder %s9734_s0, %s7529_s4  ;;  %p7533_p11 = scmp.lt.u32.totalorder %s7529_s4, %s9734_s0 }
  0x65   :  { %p7535_p12 = pnand %p7533_p11, %p7530_p10 }
  0x67   :  { %7538 = shalt.err (!%p7535_p12)
}
  0x68   :  { %s7539_s1 = scalar_lea.vmem %s125_s30, 4096  ;;  %p7544_p0 = scmp.lt.s32.totalorder %s125_s30, %s125_s30 }
  0x69   :  { %p7540_p13 = scmp.ne.s32.totalorder %s125_s30, %s7539_s1  ;;  %p7545_p1 = scmp.lt.s32.totalorder %s7539_s1, %s7539_s1 }
  0x6b   :  { %p7546_p2 = por %p7545_p1, %p7544_p0 }
  0x6d   :  { %p7547_p3 = pnand %p7546_p2, %p7540_p13 }
  0x6f   :  { %7550 = shalt.err (!%p7547_p3)
}
  0x70   :  { %130 = dma.hbm_to_vmem [thread:$0]  %s9734_s0, 4096, %s125_s30, [#allocation15], %s8018_s28, %s8018_s28, %s8019_s29  }
  0x71   :  { %s7551_s5 = scalar_lea.hbm %s9694_s9, 4096 }
  0x72   :  { %p7552_p4 = scmp.ne.s32.totalorder %s9694_s9, %s7551_s5  ;;  %p7555_p5 = scmp.lt.u32.totalorder %s7551_s5, %s9694_s9 }
  0x74   :  { %p7557_p6 = pnand %p7555_p5, %p7552_p4 }
  0x76   :  { %7560 = shalt.err (!%p7557_p6)
}
  0x77   :  { %s7561_s26 = scalar_lea.vmem %s147_s3, 4096  ;;  %p7566_p8 = scmp.lt.s32.totalorder %s147_s3, %s147_s3 }
  0x78   :  { %p7562_p7 = scmp.ne.s32.totalorder %s147_s3, %s7561_s26  ;;  %p7567_p9 = scmp.lt.s32.totalorder %s7561_s26, %s7561_s26 }
  0x7a   :  { %p7568_p10 = por %p7567_p9, %p7566_p8 }
  0x7c   :  { %p7569_p11 = pnand %p7568_p10, %p7562_p7 }
  0x7e   :  { %7572 = shalt.err (!%p7569_p11)
}
  0x7f   :  { %152 = dma.hbm_to_vmem [thread:$0]  %s9694_s9, 4096, %s147_s3, [#allocation18], %s8018_s28, %s8018_s28, %s8019_s29  }
  0x80   :  { %s8024_s2 = smov [#allocation20]   ;;  %s8025_s1 = smov [#allocation23]  }
  0x81   :  { %s168_s27 = sshll.u32 %s8024_s2, 4  ;;  %s193_s22 = sshll.u32 %s8025_s1, 4  ;;  %s169_s27 = int_to_ptr.vmem [resolvable:$true] %s168_s27  ;;  %s194_s22 = int_to_ptr.vmem [resolvable:$true] %s193_s22 }
  0x82   :  { %s7573_s7 = scalar_lea.hbm %s9696_s11, 4096 }
  0x83   :  { %p7574_p12 = scmp.ne.s32.totalorder %s9696_s11, %s7573_s7  ;;  %p7577_p13 = scmp.lt.u32.totalorder %s7573_s7, %s9696_s11 }
  0x85   :  { %p7579_p0 = pnand %p7577_p13, %p7574_p12 }
  0x87   :  { %7582 = shalt.err (!%p7579_p0)
}
  0x88   :  { %s7583_s9 = scalar_lea.vmem %s169_s27, 4096  ;;  %p7588_p2 = scmp.lt.s32.totalorder %s169_s27, %s169_s27 }
  0x89   :  { %p7584_p1 = scmp.ne.s32.totalorder %s169_s27, %s7583_s9  ;;  %p7589_p3 = scmp.lt.s32.totalorder %s7583_s9, %s7583_s9 }
  0x8b   :  { %p7590_p4 = por %p7589_p3, %p7588_p2 }
  0x8d   :  { %p7591_p5 = pnand %p7590_p4, %p7584_p1 }
  0x8f   :  { %7594 = shalt.err (!%p7591_p5)
}
  0x90   :  { %174 = dma.hbm_to_vmem [thread:$0]  %s9696_s11, 4096, %s169_s27, [#allocation21], %s8018_s28, %s8018_s28, %s8019_s29  }
  0x91   :  { %s7595_s0 = scalar_lea.hbm %s9698_s13, 32 }
  0x92   :  { %p7596_p6 = scmp.ne.s32.totalorder %s9698_s13, %s7595_s0  ;;  %p7599_p7 = scmp.lt.u32.totalorder %s7595_s0, %s9698_s13 }
  0x94   :  { %p7601_p8 = pnand %p7599_p7, %p7596_p6 }
  0x96   :  { %7604 = shalt.err (!%p7601_p8)
}
  0x97   :  { %s7605_s7 = scalar_lea.vmem %s194_s22, 32  ;;  %p7610_p10 = scmp.lt.s32.totalorder %s194_s22, %s194_s22 }
  0x98   :  { %p7606_p9 = scmp.ne.s32.totalorder %s194_s22, %s7605_s7  ;;  %p7611_p11 = scmp.lt.s32.totalorder %s7605_s7, %s7605_s7 }
  0x9a   :  { %p7612_p12 = por %p7611_p11, %p7610_p10 }
  0x9c   :  { %p7613_p13 = pnand %p7612_p12, %p7606_p9 }
  0x9e   :  { %7616 = shalt.err (!%p7613_p13)
}
  0x9f   :  { %196 = dma.hbm_to_vmem [thread:$0]  %s9698_s13, 32, %s194_s22, [#allocation24]  }
  0xa0   :  { %s8026_s5 = smov [#allocation26]   ;;  %s7617_s9 = scalar_lea.hbm %s9700_s15, 32 }
  0xa1   :  { %s215_s23 = sshll.u32 %s8026_s5, 4  ;;  %p7618_p0 = scmp.ne.s32.totalorder %s9700_s15, %s7617_s9  ;;  %s216_s23 = int_to_ptr.vmem [resolvable:$true] %s215_s23 }
  0xa2   :  { %p7621_p1 = scmp.lt.u32.totalorder %s7617_s9, %s9700_s15 }
  0xa4   :  { %p7623_p2 = pnand %p7621_p1, %p7618_p0 }
  0xa6   :  { %7626 = shalt.err (!%p7623_p2)
}
  0xa7   :  { %s7627_s0 = scalar_lea.vmem %s216_s23, 32  ;;  %p7632_p4 = scmp.lt.s32.totalorder %s216_s23, %s216_s23 }
  0xa8   :  { %p7628_p3 = scmp.ne.s32.totalorder %s216_s23, %s7627_s0  ;;  %p7633_p5 = scmp.lt.s32.totalorder %s7627_s0, %s7627_s0 }
  0xaa   :  { %p7634_p6 = por %p7633_p5, %p7632_p4 }
  0xac   :  { %p7635_p7 = pnand %p7634_p6, %p7628_p3 }
  0xae   :  { %7638 = shalt.err (!%p7635_p7)
}
  0xaf   :  { %218 = dma.hbm_to_vmem [thread:$0]  %s9700_s15, 32, %s216_s23, [#allocation27]  }
  0xb0   :  { %s8027_s2 = smov [#allocation29]   ;;  %s8028_s24 = smov [#allocation32]  }
  0xb1   :  { %s236_s1 = sshll.u32 %s8027_s2, 4  ;;  %s258_s6 = sshll.u32 %s8028_s24, 4  ;;  %s237_s1 = int_to_ptr.vmem [resolvable:$true] %s236_s1  ;;  %s8280_s6 = int_to_ptr.vmem [resolvable:$true] %s258_s6 }
  0xb2   :  { %s7639_s27 = scalar_lea.hbm %s9702_s17, 1024 }
  0xb3   :  { %p7640_p8 = scmp.ne.s32.totalorder %s9702_s17, %s7639_s27  ;;  %p7643_p9 = scmp.lt.u32.totalorder %s7639_s27, %s9702_s17 }
  0xb5   :  { %p7645_p10 = pnand %p7643_p9, %p7640_p8 }
  0xb7   :  { %7648 = shalt.err (!%p7645_p10)
}
  0xb8   :  { %s7649_s15 = scalar_lea.vmem %s237_s1, 1024  ;;  %p7654_p12 = scmp.lt.s32.totalorder %s237_s1, %s237_s1 }
  0xb9   :  { %p7650_p11 = scmp.ne.s32.totalorder %s237_s1, %s7649_s15  ;;  %p7655_p13 = scmp.lt.s32.totalorder %s7649_s15, %s7649_s15 }
  0xbb   :  { %p7656_p0 = por %p7655_p13, %p7654_p12 }
  0xbd   :  { %p7657_p1 = pnand %p7656_p0, %p7650_p11 }
  0xbf   :  { %7660 = shalt.err (!%p7657_p1)
}
  0xc0   :  { %s8029_s23 = smov 64   ;;  %s8030_s3 = smov 4  }
  0xc1   :  { %242 = dma.hbm_to_vmem [thread:$0]  %s9702_s17, 1024, %s237_s1, [#allocation30], %s8029_s23, %s8029_s23, %s8030_s3  }
  0xc2   :  { %s7661_s13 = scalar_lea.hbm %s9704_s19, 2048 }
  0xc3   :  { %p7662_p2 = scmp.ne.s32.totalorder %s9704_s19, %s7661_s13  ;;  %p7665_p3 = scmp.lt.u32.totalorder %s7661_s13, %s9704_s19 }
  0xc5   :  { %p7667_p4 = pnand %p7665_p3, %p7662_p2 }
  0xc7   :  { %7670 = shalt.err (!%p7667_p4)
}
  0xc8   :  { %s7671_s11 = scalar_lea.vmem %s8280_s6, 2048  ;;  %p7676_p6 = scmp.lt.s32.totalorder %s8280_s6, %s8280_s6 }
  0xc9   :  { %p7672_p5 = scmp.ne.s32.totalorder %s8280_s6, %s7671_s11  ;;  %p7677_p7 = scmp.lt.s32.totalorder %s7671_s11, %s7671_s11 }
  0xcb   :  { %p7678_p8 = por %p7677_p7, %p7676_p6 }
  0xcd   :  { %p7679_p9 = pnand %p7678_p8, %p7672_p5 }
  0xcf   :  { %7682 = shalt.err (!%p7679_p9)
}
  0xd0   :  { %264 = dma.hbm_to_vmem [thread:$0]  %s9704_s19, 2048, %s8280_s6, [#allocation33], %s8029_s23, %s8029_s23, %s8030_s3  }
  0xd1   :  { %s8031_s27 = smov [#allocation35]   ;;  %s8032_s20 = smov [#allocation2]  }
  0xd2   :  { %s282_s5 = sshll.u32 %s8031_s27, 4  ;;  %s46_s4 = sshll.u32 %s8032_s20, 4  ;;  %s283_s5 = int_to_ptr.vmem [resolvable:$true] %s282_s5  ;;  %s8317_s4 = int_to_ptr.vmem [resolvable:$true] %s46_s4 }
  0xd3   :  { %s7683_s25 = scalar_lea.hbm %s9706_s21, 1024 }
  0xd4   :  { %p7684_p10 = scmp.ne.s32.totalorder %s9706_s21, %s7683_s25  ;;  %p7687_p11 = scmp.lt.u32.totalorder %s7683_s25, %s9706_s21 }
  0xd6   :  { %p7689_p12 = pnand %p7687_p11, %p7684_p10 }
  0xd8   :  { %7692 = shalt.err (!%p7689_p12)
}
  0xd9   :  { %s7693_s19 = scalar_lea.vmem %s283_s5, 1024  ;;  %p7698_p0 = scmp.lt.s32.totalorder %s283_s5, %s283_s5 }
  0xda   :  { %p7694_p13 = scmp.ne.s32.totalorder %s283_s5, %s7693_s19  ;;  %p7699_p1 = scmp.lt.s32.totalorder %s7693_s19, %s7693_s19 }
  0xdc   :  { %p7700_p2 = por %p7699_p1, %p7698_p0 }
  0xde   :  { %p7701_p3 = pnand %p7700_p2, %p7694_p13 }
  0xe0   :  { %7704 = shalt.err (!%p7701_p3)
}
  0xe1   :  { %288 = dma.hbm_to_vmem [thread:$0]  %s9706_s21, 1024, %s283_s5, [#allocation36], %s8029_s23, %s8029_s23, %s8030_s3  }
  0xe2   :  { %s9735_s7 = sld [smem:[#allocation52_spill]] }
  0xe8   :  { %s7705_s11 = scalar_lea.hbm %s9735_s7, 2048 }
  0xe9   :  { %p7706_p4 = scmp.ne.s32.totalorder %s9735_s7, %s7705_s11  ;;  %p7709_p5 = scmp.lt.u32.totalorder %s7705_s11, %s9735_s7 }
  0xeb   :  { %p7711_p6 = pnand %p7709_p5, %p7706_p4 }
  0xed   :  { %7714 = shalt.err (!%p7711_p6)
}
  0xee   :  { %s7715_s9 = scalar_lea.vmem %s8317_s4, 2048  ;;  %p7720_p8 = scmp.lt.s32.totalorder %s8317_s4, %s8317_s4 }
  0xef   :  { %p7716_p7 = scmp.ne.s32.totalorder %s8317_s4, %s7715_s9  ;;  %p7721_p9 = scmp.lt.s32.totalorder %s7715_s9, %s7715_s9 }
  0xf1   :  { %p7722_p10 = por %p7721_p9, %p7720_p8 }
  0xf3   :  { %p7723_p11 = pnand %p7722_p10, %p7716_p7 }
  0xf5   :  { %7726 = shalt.err (!%p7723_p11)
}
  0xf6   :  { %52 = dma.hbm_to_vmem [thread:$0]  %s9735_s7, 2048, %s8317_s4, [#allocation3], %s8029_s23, %s8029_s23, %s8030_s3  }
  0xf7   :  { %s8033_s15 = smov [#allocation7]   ;;  %s8034_s26 = smov [#allocation10]  }
  0xf8   :  { %s71_s25 = sshll.u32 %s8033_s15, 4  ;;  %s93_s30 = sshll.u32 %s8034_s26, 4  ;;  %s72_s25 = int_to_ptr.vmem [resolvable:$true] %s71_s25  ;;  %s94_s30 = int_to_ptr.vmem [resolvable:$true] %s93_s30 }
  0xf9   :  { %s9736_s19 = sld [smem:[#allocation54_spill]] }
  0xff   :  { %s7727_s6 = scalar_lea.hbm %s9736_s19, 32 }
 0x100   :  { %p7728_p12 = scmp.ne.s32.totalorder %s9736_s19, %s7727_s6  ;;  %p7731_p13 = scmp.lt.u32.totalorder %s7727_s6, %s9736_s19 }
 0x102   :  { %p7733_p0 = pnand %p7731_p13, %p7728_p12 }
 0x104   :  { %7736 = shalt.err (!%p7733_p0)
}
 0x105   :  { %s7737_s4 = scalar_lea.vmem %s72_s25, 32  ;;  %p7742_p2 = scmp.lt.s32.totalorder %s72_s25, %s72_s25 }
 0x106   :  { %p7738_p1 = scmp.ne.s32.totalorder %s72_s25, %s7737_s4  ;;  %p7743_p3 = scmp.lt.s32.totalorder %s7737_s4, %s7737_s4 }
 0x108   :  { %p7744_p4 = por %p7743_p3, %p7742_p2 }
 0x10a   :  { %p7745_p5 = pnand %p7744_p4, %p7738_p1 }
 0x10c   :  { %7748 = shalt.err (!%p7745_p5)
}
 0x10d   :  { %74 = dma.hbm_to_vmem [thread:$0]  %s9736_s19, 32, %s72_s25, [#allocation6]  }
 0x10e   :  { %s9737_s20 = sld [smem:[#allocation56_spill]] }
 0x114   :  { %s7749_s9 = scalar_lea.hbm %s9737_s20, 32 }
 0x115   :  { %p7750_p6 = scmp.ne.s32.totalorder %s9737_s20, %s7749_s9  ;;  %p7753_p7 = scmp.lt.u32.totalorder %s7749_s9, %s9737_s20 }
 0x117   :  { %p7755_p8 = pnand %p7753_p7, %p7750_p6 }
 0x119   :  { %7758 = shalt.err (!%p7755_p8)
}
 0x11a   :  { %s7759_s0 = scalar_lea.vmem %s94_s30, 32  ;;  %p7764_p10 = scmp.lt.s32.totalorder %s94_s30, %s94_s30 }
 0x11b   :  { %p7760_p9 = scmp.ne.s32.totalorder %s94_s30, %s7759_s0  ;;  %p7765_p11 = scmp.lt.s32.totalorder %s7759_s0, %s7759_s0 }
 0x11d   :  { %p7766_p12 = por %p7765_p11, %p7764_p10 }
 0x11f   :  { %p7767_p13 = pnand %p7766_p12, %p7760_p9 }
 0x121   :  { %7770 = shalt.err (!%p7767_p13)
}
 0x122   :  { %96 = dma.hbm_to_vmem [thread:$0]  %s9737_s20, 32, %s94_s30, [#allocation9]  }
 0x123   :  { %s8035_s19 = smov [#allocation13]   ;;  %s8036_s22 = smov [#allocation16]  }
 0x124   :  { %s115_s6 = sshll.u32 %s8035_s19, 4  ;;  %s137_s2 = sshll.u32 %s8036_s22, 4  ;;  %s116_s6 = int_to_ptr.vmem [resolvable:$true] %s115_s6  ;;  %s138_s2 = int_to_ptr.vmem [resolvable:$true] %s137_s2 }
 0x125   :  { %s9738_s4 = sld [smem:[#allocation58_spill]] }
 0x12b   :  { %s7771_s7 = scalar_lea.hbm %s9738_s4, 32 }
 0x12c   :  { %p7772_p0 = scmp.ne.s32.totalorder %s9738_s4, %s7771_s7  ;;  %p7775_p1 = scmp.lt.u32.totalorder %s7771_s7, %s9738_s4 }
 0x12e   :  { %p7777_p2 = pnand %p7775_p1, %p7772_p0 }
 0x130   :  { %7780 = shalt.err (!%p7777_p2)
}
 0x131   :  { %s7781_s30 = scalar_lea.vmem %s116_s6, 32  ;;  %p7786_p4 = scmp.lt.s32.totalorder %s116_s6, %s116_s6 }
 0x132   :  { %p7782_p3 = scmp.ne.s32.totalorder %s116_s6, %s7781_s30  ;;  %p7787_p5 = scmp.lt.s32.totalorder %s7781_s30, %s7781_s30 }
 0x134   :  { %p7788_p6 = por %p7787_p5, %p7786_p4 }
 0x136   :  { %p7789_p7 = pnand %p7788_p6, %p7782_p3 }
 0x138   :  { %7792 = shalt.err (!%p7789_p7)
}
 0x139   :  { %118 = dma.hbm_to_vmem [thread:$0]  %s9738_s4, 32, %s116_s6, [#allocation12]  }
 0x13a   :  { %s7793_s26 = scalar_lea.hbm %s9693_s8, 32 }
 0x13b   :  { %p7794_p8 = scmp.ne.s32.totalorder %s9693_s8, %s7793_s26  ;;  %p7797_p9 = scmp.lt.u32.totalorder %s7793_s26, %s9693_s8 }
 0x13d   :  { %p7799_p10 = pnand %p7797_p9, %p7794_p8 }
 0x13f   :  { %7802 = shalt.err (!%p7799_p10)
}
 0x140   :  { %s7803_s22 = scalar_lea.vmem %s138_s2, 32  ;;  %p7808_p12 = scmp.lt.s32.totalorder %s138_s2, %s138_s2 }
 0x141   :  { %p7804_p11 = scmp.ne.s32.totalorder %s138_s2, %s7803_s22  ;;  %p7809_p13 = scmp.lt.s32.totalorder %s7803_s22, %s7803_s22 }
 0x143   :  { %p7810_p0 = por %p7809_p13, %p7808_p12 }
 0x145   :  { %p7811_p1 = pnand %p7810_p0, %p7804_p11 }
 0x147   :  { %7814 = shalt.err (!%p7811_p1)
}
 0x148   :  { %140 = dma.hbm_to_vmem [thread:$0]  %s9693_s8, 32, %s138_s2, [#allocation15]  }
 0x149   :  { %s8037_s11 = smov [#allocation19]   ;;  %s8038_s7 = smov [#allocation22]  }
 0x14a   :  { %s159_s4 = sshll.u32 %s8037_s11, 4  ;;  %s180_s17 = sshll.u32 %s8038_s7, 4  ;;  %s160_s4 = int_to_ptr.vmem [resolvable:$true] %s159_s4  ;;  %s8402_s17 = int_to_ptr.vmem [resolvable:$true] %s180_s17 }
 0x14b   :  { %s7815_s9 = scalar_lea.hbm %s9695_s10, 32 }
 0x14c   :  { %p7816_p2 = scmp.ne.s32.totalorder %s9695_s10, %s7815_s9  ;;  %p7819_p3 = scmp.lt.u32.totalorder %s7815_s9, %s9695_s10 }
 0x14e   :  { %p7821_p4 = pnand %p7819_p3, %p7816_p2 }
 0x150   :  { %7824 = shalt.err (!%p7821_p4)
}
 0x151   :  { %s7825_s8 = scalar_lea.vmem %s160_s4, 32  ;;  %p7830_p6 = scmp.lt.s32.totalorder %s160_s4, %s160_s4 }
 0x152   :  { %p7826_p5 = scmp.ne.s32.totalorder %s160_s4, %s7825_s8  ;;  %p7831_p7 = scmp.lt.s32.totalorder %s7825_s8, %s7825_s8 }
 0x154   :  { %p7832_p8 = por %p7831_p7, %p7830_p6 }
 0x156   :  { %p7833_p9 = pnand %p7832_p8, %p7826_p5 }
 0x158   :  { %7836 = shalt.err (!%p7833_p9)
}
 0x159   :  { %162 = dma.hbm_to_vmem [thread:$0]  %s9695_s10, 32, %s160_s4, [#allocation18]  }
 0x15a   :  { %s7837_s25 = scalar_lea.hbm %s9697_s12, 2048 }
 0x15b   :  { %p7838_p10 = scmp.ne.s32.totalorder %s9697_s12, %s7837_s25  ;;  %p7841_p11 = scmp.lt.u32.totalorder %s7837_s25, %s9697_s12 }
 0x15d   :  { %p7843_p12 = pnand %p7841_p11, %p7838_p10 }
 0x15f   :  { %7846 = shalt.err (!%p7843_p12)
}
 0x160   :  { %s7847_s24 = scalar_lea.vmem %s8402_s17, 2048  ;;  %p7852_p0 = scmp.lt.s32.totalorder %s8402_s17, %s8402_s17 }
 0x161   :  { %p7848_p13 = scmp.ne.s32.totalorder %s8402_s17, %s7847_s24  ;;  %p7853_p1 = scmp.lt.s32.totalorder %s7847_s24, %s7847_s24 }
 0x163   :  { %p7854_p2 = por %p7853_p1, %p7852_p0 }
 0x165   :  { %p7855_p3 = pnand %p7854_p2, %p7848_p13 }
 0x167   :  { %7858 = shalt.err (!%p7855_p3)
}
 0x168   :  { %186 = dma.hbm_to_vmem [thread:$0]  %s9697_s12, 2048, %s8402_s17, [#allocation21], %s8018_s28, %s8018_s28, %s8019_s29  }
 0x169   :  { %s8039_s4 = smov [#allocation25]   ;;  %s8040_s1 = smov [#allocation28]  }
 0x16a   :  { %s202_s7 = sshll.u32 %s8039_s4, 4  ;;  %s224_s27 = sshll.u32 %s8040_s1, 4  ;;  %s203_s7 = int_to_ptr.vmem [resolvable:$true] %s202_s7  ;;  %s8436_s27 = int_to_ptr.vmem [resolvable:$true] %s224_s27 }
 0x16b   :  { %s7859_s20 = scalar_lea.hbm %s9699_s14, 4096 }
 0x16c   :  { %p7860_p4 = scmp.ne.s32.totalorder %s9699_s14, %s7859_s20  ;;  %p7863_p5 = scmp.lt.u32.totalorder %s7859_s20, %s9699_s14 }
 0x16e   :  { %p7865_p6 = pnand %p7863_p5, %p7860_p4 }
 0x170   :  { %7868 = shalt.err (!%p7865_p6)
}
 0x171   :  { %s7869_s12 = scalar_lea.vmem %s203_s7, 4096  ;;  %p7874_p8 = scmp.lt.s32.totalorder %s203_s7, %s203_s7 }
 0x172   :  { %p7870_p7 = scmp.ne.s32.totalorder %s203_s7, %s7869_s12  ;;  %p7875_p9 = scmp.lt.s32.totalorder %s7869_s12, %s7869_s12 }
 0x174   :  { %p7876_p10 = por %p7875_p9, %p7874_p8 }
 0x176   :  { %p7877_p11 = pnand %p7876_p10, %p7870_p7 }
 0x178   :  { %7880 = shalt.err (!%p7877_p11)
}
 0x179   :  { %208 = dma.hbm_to_vmem [thread:$0]  %s9699_s14, 4096, %s203_s7, [#allocation24], %s8018_s28, %s8018_s28, %s8019_s29  }
 0x17a   :  { %s7881_s25 = scalar_lea.hbm %s9701_s16, 2048 }
 0x17b   :  { %p7882_p12 = scmp.ne.s32.totalorder %s9701_s16, %s7881_s25  ;;  %p7885_p13 = scmp.lt.u32.totalorder %s7881_s25, %s9701_s16 }
 0x17d   :  { %p7887_p0 = pnand %p7885_p13, %p7882_p12 }
 0x17f   :  { %7890 = shalt.err (!%p7887_p0)
}
 0x180   :  { %s7891_s24 = scalar_lea.vmem %s8436_s27, 2048  ;;  %p7896_p2 = scmp.lt.s32.totalorder %s8436_s27, %s8436_s27 }
 0x181   :  { %p7892_p1 = scmp.ne.s32.totalorder %s8436_s27, %s7891_s24  ;;  %p7897_p3 = scmp.lt.s32.totalorder %s7891_s24, %s7891_s24 }
 0x183   :  { %p7898_p4 = por %p7897_p3, %p7896_p2 }
 0x185   :  { %p7899_p5 = pnand %p7898_p4, %p7892_p1 }
 0x187   :  { %7902 = shalt.err (!%p7899_p5)
}
 0x188   :  { %230 = dma.hbm_to_vmem [thread:$0]  %s9701_s16, 2048, %s8436_s27, [#allocation27], %s8029_s23, %s8029_s23, %s8030_s3  }
 0x189   :  { %s8041_s11 = smov [#allocation31]   ;;  %s8042_s7 = smov [#allocation34]  }
 0x18a   :  { %s249_s4 = sshll.u32 %s8041_s11, 4  ;;  %s270_s1 = sshll.u32 %s8042_s7, 4  ;;  %s250_s4 = int_to_ptr.vmem [resolvable:$true] %s249_s4  ;;  %s8473_s1 = int_to_ptr.vmem [resolvable:$true] %s270_s1 }
 0x18b   :  { %s7903_s20 = scalar_lea.hbm %s9703_s18, 16 }
 0x18c   :  { %p7904_p6 = scmp.ne.s32.totalorder %s9703_s18, %s7903_s20  ;;  %p7907_p7 = scmp.lt.u32.totalorder %s7903_s20, %s9703_s18 }
 0x18e   :  { %p7909_p8 = pnand %p7907_p7, %p7904_p6 }
 0x190   :  { %7912 = shalt.err (!%p7909_p8)
}
 0x191   :  { %s7913_s16 = scalar_lea.vmem %s250_s4, 16  ;;  %s7917_s27 = scalar_lea.vmem %s250_s4, 32 }
 0x192   :  { %p7914_p9 = scmp.ne.s32.totalorder %s250_s4, %s7913_s16  ;;  %p7918_p10 = scmp.lt.s32.totalorder %s250_s4, %s250_s4 }
 0x193   :  { %p7919_p11 = scmp.lt.s32.totalorder %s7917_s27, %s7913_s16 }
 0x195   :  { %p7920_p12 = por %p7919_p11, %p7918_p10 }
 0x197   :  { %p7921_p13 = pnand %p7920_p12, %p7914_p9 }
 0x199   :  { %7924 = shalt.err (!%p7921_p13)
}
 0x19a   :  { %252 = dma.hbm_to_vmem [thread:$0]  %s9703_s18, 16, %s250_s4, [#allocation30]  }
 0x19b   :  { %s9739_s0 = sld [smem:[#allocation60_spill]] }
 0x1a1   :  { %s7925_s25 = scalar_lea.hbm %s9739_s0, 1024 }
 0x1a2   :  { %p7926_p0 = scmp.ne.s32.totalorder %s9739_s0, %s7925_s25  ;;  %p7929_p1 = scmp.lt.u32.totalorder %s7925_s25, %s9739_s0 }
 0x1a4   :  { %p7931_p2 = pnand %p7929_p1, %p7926_p0 }
 0x1a6   :  { %7934 = shalt.err (!%p7931_p2)
}
 0x1a7   :  { %s7935_s24 = scalar_lea.vmem %s8473_s1, 1024  ;;  %p7940_p4 = scmp.lt.s32.totalorder %s8473_s1, %s8473_s1 }
 0x1a8   :  { %p7936_p3 = scmp.ne.s32.totalorder %s8473_s1, %s7935_s24  ;;  %p7941_p5 = scmp.lt.s32.totalorder %s7935_s24, %s7935_s24 }
 0x1aa   :  { %p7942_p6 = por %p7941_p5, %p7940_p4 }
 0x1ac   :  { %p7943_p7 = pnand %p7942_p6, %p7936_p3 }
 0x1ae   :  { %7946 = shalt.err (!%p7943_p7)
}
 0x1af   :  { %276 = dma.hbm_to_vmem [thread:$0]  %s9739_s0, 1024, %s8473_s1, [#allocation33], %s8029_s23, %s8029_s23, %s8030_s3  }
 0x1b0   :  { %s8043_s10 = smov [#allocation37]   ;;  %s9740_s9 = sld [smem:[#allocation61_spill]] }
 0x1b1   :  { %s295_s11 = sshll.u32 %s8043_s10, 4  ;;  %s296_s11 = int_to_ptr.vmem [resolvable:$true] %s295_s11 }
 0x1b6   :  { %s7947_s30 = scalar_lea.hbm %s9740_s9, 16 }
 0x1b7   :  { %p7948_p8 = scmp.ne.s32.totalorder %s9740_s9, %s7947_s30  ;;  %p7951_p9 = scmp.lt.u32.totalorder %s7947_s30, %s9740_s9 }
 0x1b9   :  { %p7953_p10 = pnand %p7951_p9, %p7948_p8 }
 0x1bb   :  { %7956 = shalt.err (!%p7953_p10)
}
 0x1bc   :  { %s7957_s2 = scalar_lea.vmem %s296_s11, 16  ;;  %s7961_s23 = scalar_lea.vmem %s296_s11, 32 }
 0x1bd   :  { %p7958_p11 = scmp.ne.s32.totalorder %s296_s11, %s7957_s2  ;;  %p7962_p12 = scmp.lt.s32.totalorder %s296_s11, %s296_s11 }
 0x1be   :  { %p7963_p13 = scmp.lt.s32.totalorder %s7961_s23, %s7957_s2 }
 0x1c0   :  { %p7964_p0 = por %p7963_p13, %p7962_p12 }
 0x1c2   :  { %p7965_p1 = pnand %p7964_p0, %p7958_p11 }
 0x1c4   :  { %7968 = shalt.err (!%p7965_p1)
}
 0x1c5   :  { %298 = dma.hbm_to_vmem [thread:$0]  %s9740_s9, 16, %s296_s11, [#allocation36]  }
 0x1c6   :  { %7991 = dma.done.wait [#allocation3], 2048  }
 0x1c7   :  { %7992 = vsyncadd [#allocation3], 4294965248 }
 0x1c8   :  { %7993 = dma.done.wait [#allocation6], 2080  }
 0x1c9   :  { %7994 = vsyncadd [#allocation6], 4294965216 }
 0x1ca   :  { %7995 = dma.done.wait [#allocation9], 4128  }
 0x1cb   :  { %7996 = vsyncadd [#allocation9], 4294963168 }
 0x1cc   :  { %7997 = dma.done.wait [#allocation12], 4128  }
 0x1cd   :  { %7998 = vsyncadd [#allocation12], 4294963168 }
 0x1ce   :  { %7999 = dma.done.wait [#allocation15], 4128  }
 0x1cf   :  { %8000 = vsyncadd [#allocation15], 4294963168 }
 0x1d0   :  { %8001 = dma.done.wait [#allocation18], 4128  }
 0x1d1   :  { %8002 = vsyncadd [#allocation18], 4294963168 }
 0x1d2   :  { %8003 = dma.done.wait [#allocation21], 6144  }
 0x1d3   :  { %8004 = vsyncadd [#allocation21], 4294961152 }
 0x1d4   :  { %8005 = dma.done.wait [#allocation24], 4128  }
 0x1d5   :  { %8006 = vsyncadd [#allocation24], 4294963168 }
 0x1d6   :  { %8007 = dma.done.wait [#allocation27], 2080  }
 0x1d7   :  { %8008 = vsyncadd [#allocation27], 4294965216 }
 0x1d8   :  { %8009 = dma.done.wait [#allocation30], 1040  }
 0x1d9   :  { %8010 = vsyncadd [#allocation30], 4294966256 }
 0x1da   :  { %8011 = dma.done.wait [#allocation33], 3072  }
 0x1db   :  { %8012 = vsyncadd [#allocation33], 4294964224 }
 0x1dc   :  { %8013 = dma.done.wait [#allocation36], 1040  }
 0x1dd   :  { %8014 = vsyncadd [#allocation36], 4294966256  ;;  %v8044_v0 = vmov 0   ;;  %v6895_v1 = vld [vmem:[#allocation5 + $0x4] ss:$8 sps:$4 sm:$0xff]   ;;  %v6921_v30 = vld [vmem:[#allocation2 + $0x10] sm:$0xff]  }
 0x1de   :  { %637 = vmatprep.mubr.bf16.mxu0 %v8044_v0  ;;  %v6897_v2 = vld [vmem:[#allocation5] ss:$8 sps:$4 sm:$0xff]   ;;  %605 = vmatprep.subr.bf16.mxu0 %v6895_v1  ;;  %v6898_v3 = vld [vmem:[#allocation5 + $0x14] ss:$8 sps:$4 sm:$0xff]   ;;  %v6900_v4 = vld [vmem:[#allocation5 + $0x10] ss:$8 sps:$4 sm:$0xff]  }
 0x1df   :  { %606 = vmatpush1.bf16.msra.mxu0 %v6897_v2  ;;  %v6901_v5 = vld [vmem:[#allocation5 + $0x24] ss:$8 sps:$4 sm:$0xff]   ;;  %v6903_v6 = vld [vmem:[#allocation5 + $0x20] ss:$8 sps:$4 sm:$0xff]   ;;  %v6904_v7 = vld [vmem:[#allocation5 + $0x34] ss:$8 sps:$4 sm:$0xff]  }
 0x1e0   :  { %607 = vmatprep.subr.bf16.mxu0 %v6898_v3  ;;  %v6906_v8 = vld [vmem:[#allocation5 + $0x30] ss:$8 sps:$4 sm:$0xff]   ;;  %v6907_v9 = vld [vmem:[#allocation5 + $0x44] ss:$8 sps:$4 sm:$0xff]   ;;  %v6909_v10 = vld [vmem:[#allocation5 + $0x40] ss:$8 sps:$4 sm:$0xff]  }
 0x1e1   :  { %v6910_v11 = vld [vmem:[#allocation5 + $0x54] ss:$8 sps:$4 sm:$0xff]   ;;  %v6912_v12 = vld [vmem:[#allocation5 + $0x50] ss:$8 sps:$4 sm:$0xff]   ;;  %v6913_v13 = vld [vmem:[#allocation5 + $0x64] ss:$8 sps:$4 sm:$0xff]  }
 0x1e2   :  { %v6915_v14 = vld [vmem:[#allocation5 + $0x60] ss:$8 sps:$4 sm:$0xff]   ;;  %v6916_v15 = vld [vmem:[#allocation5 + $0x74] ss:$8 sps:$4 sm:$0xff]   ;;  %v6918_v16 = vld [vmem:[#allocation5 + $0x70] ss:$8 sps:$4 sm:$0xff]  }
 0x1e3   :  { %608 = vmatpush1.bf16.msra.mxu0 %v6900_v4  ;;  %v6935_v17 = vld [vmem:[#allocation8 + $0x4] ss:$8 sps:$4 sm:$0xff]   ;;  %v6937_v18 = vld [vmem:[#allocation8] ss:$8 sps:$4 sm:$0xff]   ;;  %v6938_v19 = vld [vmem:[#allocation8 + $0x14] ss:$8 sps:$4 sm:$0xff]   ;;  %v419_v4 = vlaneseq }
 0x1e4   :  { %609 = vmatprep.subr.bf16.mxu0 %v6901_v5  ;;  %1098 = vmatprep.subr.bf16.mxu1 %v6935_v17  ;;  %v6919_v20 = vld [vmem:[#allocation2] sm:$0xff]   ;;  %v6940_v21 = vld [vmem:[#allocation8 + $0x10] ss:$8 sps:$4 sm:$0xff]   ;;  %v6920_v25 = vld [vmem:[#allocation2 + $0x8] sm:$0xff]   ;;  %vm5875_vm1 = vcmask 31744   ;;  %s8045_s16 = smov [#allocation38]  }
 0x1e5   :  { %1099 = vmatpush1.bf16.msra.mxu1 %v6937_v18  ;;  %v6941_v22 = vld [vmem:[#allocation8 + $0x24] ss:$8 sps:$4 sm:$0xff]   ;;  %v6943_v23 = vld [vmem:[#allocation8 + $0x20] ss:$8 sps:$4 sm:$0xff]   ;;  %v6944_v24 = vld [vmem:[#allocation8 + $0x34] ss:$8 sps:$4 sm:$0xff]  }
 0x1e6   :  { %1100 = vmatprep.subr.bf16.mxu1 %v6938_v19  ;;  %v6946_v26 = vld [vmem:[#allocation8 + $0x30] ss:$8 sps:$4 sm:$0xff]   ;;  %v6947_v27 = vld [vmem:[#allocation8 + $0x44] ss:$8 sps:$4 sm:$0xff]   ;;  %v6949_v28 = vld [vmem:[#allocation8 + $0x40] ss:$8 sps:$4 sm:$0xff]  }
 0x1e7   :  { %610 = vmatpush1.bf16.msra.mxu0 %v6903_v6  ;;  %v6950_v29 = vld [vmem:[#allocation8 + $0x54] ss:$8 sps:$4 sm:$0xff]   ;;  %v6952_v31 = vld [vmem:[#allocation8 + $0x50] ss:$8 sps:$4 sm:$0xff]   ;;  %v6953_v32 = vld [vmem:[#allocation8 + $0x64] ss:$8 sps:$4 sm:$0xff]  }
 0x1e8   :  { %611 = vmatprep.subr.bf16.mxu0 %v6904_v7  ;;  %v6955_v33 = vld [vmem:[#allocation8 + $0x60] ss:$8 sps:$4 sm:$0xff]   ;;  %v6956_v34 = vld [vmem:[#allocation8 + $0x74] ss:$8 sps:$4 sm:$0xff]   ;;  %v6958_v36 = vld [vmem:[#allocation8 + $0x70] ss:$8 sps:$4 sm:$0xff]  }
 0x1e9   :  { %1101 = vmatpush1.bf16.msra.mxu1 %v6940_v21  ;;  %v6922_v35 = vld [vmem:[#allocation2 + $0x18] sm:$0xff]   ;;  %v6959_v37 = vld [vmem:[#allocation8 + $0x84] ss:$8 sps:$4 sm:$0xff]   ;;  %v6961_v38 = vld [vmem:[#allocation8 + $0x80] ss:$8 sps:$4 sm:$0xff]   ;;  %v420_v7 = vshrl.u32 %v419_v4, 7 }
 0x1ea   :  { %1102 = vmatprep.subr.bf16.mxu1 %v6941_v22  ;;  %v6962_v39 = vld [vmem:[#allocation8 + $0x94] ss:$8 sps:$4 sm:$0xff]   ;;  %v6964_v41 = vld [vmem:[#allocation8 + $0x90] ss:$8 sps:$4 sm:$0xff]   ;;  %v6965_v42 = vld [vmem:[#allocation8 + $0xa4] ss:$8 sps:$4 sm:$0xff]  }
 0x1eb   :  { %612 = vmatpush1.bf16.msra.mxu0 %v6906_v8  ;;  %v6923_v40 = vld [vmem:[#allocation2 + $0x20] sm:$0xff]   ;;  %v6924_v45 = vld [vmem:[#allocation2 + $0x28] sm:$0xff]   ;;  %v6970_v46 = vld [vmem:[#allocation8 + $0xb0] ss:$8 sps:$4 sm:$0xff]   ;;  %v8536_v8 = vsub.s32 0, %v420_v7  ;;  %s5913_s27 = sshll.u32 %s8045_s16, 4  ;;  %s5914_s27 = int_to_ptr.vmem [resolvable:$true] %s5913_s27 }
 0x1ec   :  { %613 = vmatprep.subr.bf16.mxu0 %v6907_v9  ;;  %v6967_v43 = vld [vmem:[#allocation8 + $0xa0] ss:$8 sps:$4 sm:$0xff]   ;;  %v6968_v44 = vld [vmem:[#allocation8 + $0xb4] ss:$8 sps:$4 sm:$0xff]   ;;  %v6971_v47 = vld [vmem:[#allocation8 + $0xc4] ss:$8 sps:$4 sm:$0xff]   ;;  %p7974_p3 = scmp.lt.s32.totalorder %s5914_s27, %s5914_s27 }
 0x1ed   :  { %1103 = vmatpush1.bf16.msra.mxu1 %v6943_v23  ;;  %v6973_v48 = vld [vmem:[#allocation8 + $0xc0] ss:$8 sps:$4 sm:$0xff]   ;;  %v6974_v49 = vld [vmem:[#allocation8 + $0xd4] ss:$8 sps:$4 sm:$0xff]   ;;  %v6976_v55 = vld [vmem:[#allocation8 + $0xd0] ss:$8 sps:$4 sm:$0xff]  }
 0x1ee   :  { %1104 = vmatprep.subr.bf16.mxu1 %v6944_v24  ;;  %v6925_v50 = vld [vmem:[#allocation2 + $0x30] sm:$0xff]   ;;  %v6926_v51 = vld [vmem:[#allocation2 + $0x38] sm:$0xff]   ;;  %v6927_v52 = vld [vmem:[#allocation2 + $0x40] sm:$0xff]   ;;  %s7969_s12 = scalar_lea.vmem %s5914_s27, 4096 }
 0x1ef   :  { %614 = vmatpush1.bf16.msra.mxu0 %v6909_v10  ;;  %v6928_v53 = vld [vmem:[#allocation2 + $0x48] sm:$0xff]   ;;  %v6929_v54 = vld [vmem:[#allocation2 + $0x50] sm:$0xff]   ;;  %v6930_v56 = vld [vmem:[#allocation2 + $0x58] sm:$0xff]   ;;  %v8538_v10 = vsub.s32 1, %v420_v7  ;;  %p7970_p2 = scmp.ne.s32.totalorder %s5914_s27, %s7969_s12  ;;  %p7975_p4 = scmp.lt.s32.totalorder %s7969_s12, %s7969_s12 }
 0x1f0   :  { %615 = vmatprep.subr.bf16.mxu0 %v6910_v11  ;;  %v6977_v57 = vld [vmem:[#allocation8 + $0xe4] ss:$8 sps:$4 sm:$0xff]   ;;  %v6979_v58 = vld [vmem:[#allocation8 + $0xe0] ss:$8 sps:$4 sm:$0xff]   ;;  %v6980_v59 = vld [vmem:[#allocation8 + $0xf4] ss:$8 sps:$4 sm:$0xff]  }
 0x1f1   :  { %1105 = vmatpush1.bf16.msra.mxu1 %v6946_v26  ;;  %v6982_v60 = vld [vmem:[#allocation8 + $0xf0] ss:$8 sps:$4 sm:$0xff]   ;;  %v6931_v61 = vld [vmem:[#allocation2 + $0x60] sm:$0xff]   ;;  %v6932_v62 = vld [vmem:[#allocation2 + $0x68] sm:$0xff]   ;;  %p7976_p5 = por %p7975_p4, %p7974_p3 }
 0x1f2   :  { %1106 = vmatprep.subr.bf16.mxu1 %v6947_v27  ;;  %v6933_v63 = vld [vmem:[#allocation2 + $0x70] sm:$0xff]   ;;  %v6934_v1 = vld [vmem:[#allocation2 + $0x78] sm:$0xff]   ;;  %v6983_v2 = vld [vmem:[#allocation11] ss:$8 sps:$4 sm:$0xff]  }
 0x1f3   :  { %616 = vmatpush1.bf16.msra.mxu0 %v6912_v12  ;;  %v6985_v3 = vld [vmem:[#allocation11 + $0x4] ss:$8 sps:$4 sm:$0xff]   ;;  %v6986_v5 = vld [vmem:[#allocation11 + $0x10] ss:$8 sps:$4 sm:$0xff]   ;;  %v6988_v6 = vld [vmem:[#allocation11 + $0x14] ss:$8 sps:$4 sm:$0xff]   ;;  %p7977_p6 = pnand %p7976_p5, %p7970_p2 }
 0x1f4   :  { %617 = vmatprep.subr.bf16.mxu0 %v6913_v13  ;;  %v417_v9 = vld [vmem:[#allocation7] sm:$0x3]  ;;  %v6989_v11 = vld [vmem:[#allocation11 + $0x20] ss:$8 sps:$4 sm:$0xff]   ;;  %v6991_v12 = vld [vmem:[#allocation11 + $0x24] ss:$8 sps:$4 sm:$0xff]  }
 0x1f5   :  { %1107 = vmatpush1.bf16.msra.mxu1 %v6949_v28  ;;  %v8541_v13 = vrot.slane %v417_v9, %v8536_v8  ;;  %v6995_v24 = vld [vmem:[#allocation11 + $0x40] ss:$8 sps:$4 sm:$0xff]   ;;  %v7000_v27 = vld [vmem:[#allocation11 + $0x54] ss:$8 sps:$4 sm:$0xff]  }
 0x1f6   :  { %1108 = vmatprep.subr.bf16.mxu1 %v6950_v29 }
 0x1f7   :  { %618 = vmatpush1.bf16.msra.mxu0 %v6915_v14  ;;  %v8544_v14 = vrot.slane %v417_v9, %v8538_v10  ;;  %v7015_v9 = vld [vmem:[#allocation11 + $0xa4] ss:$8 sps:$4 sm:$0xff]  }
 0x1f8   :  { %619 = vmatprep.subr.bf16.mxu0 %v6916_v15  ;;  %v6992_v15 = vld [vmem:[#allocation11 + $0x30] ss:$8 sps:$4 sm:$0xff]  }
 0x1f9   :  { %1109 = vmatpush1.bf16.msra.mxu1 %v6952_v31 }
 0x1fa   :  { %1110 = vmatprep.subr.bf16.mxu1 %v6953_v32  ;;  %v6998_v32 = vld [vmem:[#allocation11 + $0x50] ss:$8 sps:$4 sm:$0xff]  }
 0x1fb   :  { %620 = vmatpush1.bf16.msra.mxu0 %v6918_v16  ;;  %v6994_v16 = vld [vmem:[#allocation11 + $0x34] ss:$8 sps:$4 sm:$0xff]  }
 0x1fc   :  { %1591 = vmatprep.subr.bf16.mxu0 %v6985_v3 }
 0x1fd   :  { %1111 = vmatpush1.bf16.msra.mxu1 %v6955_v33 }
 0x1fe   :  { %638 = vmatmul.mubr.bf16.vlgmr.msra.gmra.mrb[0].mxu0 %v6919_v20  ;;  %1112 = vmatprep.subr.bf16.mxu1 %v6956_v34  ;;  %v7003_v34 = vld [vmem:[#allocation11 + $0x64] ss:$8 sps:$4 sm:$0xff]  }
 0x1ff   :  { %647 = vmatprep.mubr.bf16.mxu0 %v8044_v0  ;;  %1592 = vmatpush1.bf16.msra.mxu0 %v6983_v2 }
 0x200   :  { %1593 = vmatprep.subr.bf16.mxu0 %v6988_v6  ;;  %v7010_v6 = vld [vmem:[#allocation11 + $0x90] ss:$8 sps:$4 sm:$0xff]  }
 0x201   :  { %1113 = vmatpush1.bf16.msra.mxu1 %v6958_v36 }
 0x202   :  { %1114 = vmatprep.subr.bf16.mxu1 %v6959_v37 }
 0x203   :  { %1594 = vmatpush1.bf16.msra.mxu0 %v6986_v5 }
 0x204   :  { %1595 = vmatprep.subr.bf16.mxu0 %v6991_v12 }
 0x205   :  { %1115 = vmatpush1.bf16.msra.mxu1 %v6961_v38 }
 0x206   :  { %648 = vmatmul.mubr.bf16.gmra.mrb[4].mxu0 %v6920_v25  ;;  %1116 = vmatprep.subr.bf16.mxu1 %v6962_v39  ;;  %v6997_v25 = vld [vmem:[#allocation11 + $0x44] ss:$8 sps:$4 sm:$0xff]  }
 0x207   :  { %657 = vmatprep.mubr.bf16.mxu0 %v8044_v0  ;;  %1596 = vmatpush1.bf16.msra.mxu0 %v6989_v11 }
 0x208   :  { %1597 = vmatprep.subr.bf16.mxu0 %v6994_v16 }
 0x209   :  { %1117 = vmatpush1.bf16.msra.mxu1 %v6964_v41  ;;  %v7001_v41 = vld [vmem:[#allocation11 + $0x60] ss:$8 sps:$4 sm:$0xff]  }
 0x20a   :  { %1118 = vmatprep.subr.bf16.mxu1 %v6965_v42 }
 0x20b   :  { %1598 = vmatpush1.bf16.msra.mxu0 %v6992_v15 }
 0x20c   :  { %1599 = vmatprep.subr.bf16.mxu0 %v6997_v25 }
 0x20d   :  { %1119 = vmatpush1.bf16.msra.mxu1 %v6967_v43 }
 0x20e   :  { %658 = vmatmul.mubr.bf16.gmra.mrb[8].mxu0 %v6921_v30  ;;  %1120 = vmatprep.subr.bf16.mxu1 %v6968_v44  ;;  %v7006_v44 = vld [vmem:[#allocation11 + $0x74] ss:$8 sps:$4 sm:$0xff]  }
 0x20f   :  { %667 = vmatprep.mubr.bf16.mxu0 %v8044_v0  ;;  %1600 = vmatpush1.bf16.msra.mxu0 %v6995_v24 }
 0x210   :  { %1601 = vmatprep.subr.bf16.mxu0 %v7000_v27 }
 0x211   :  { %1121 = vmatpush1.bf16.msra.mxu1 %v6970_v46 }
 0x212   :  { %1122 = vmatprep.subr.bf16.mxu1 %v6971_v47 }
 0x213   :  { %1602 = vmatpush1.bf16.msra.mxu0 %v6998_v32 }
 0x214   :  { %1603 = vmatprep.subr.bf16.mxu0 %v7003_v34 }
 0x215   :  { %1123 = vmatpush1.bf16.msra.mxu1 %v6973_v48 }
 0x216   :  { %668 = vmatmul.mubr.bf16.gmra.mrb[12].mxu0 %v6922_v35  ;;  %1124 = vmatprep.subr.bf16.mxu1 %v6974_v49 }
 0x217   :  { %677 = vmatprep.mubr.bf16.mxu0 %v8044_v0  ;;  %1604 = vmatpush1.bf16.msra.mxu0 %v7001_v41 }
 0x218   :  { %1605 = vmatprep.subr.bf16.mxu0 %v7006_v44 }
 0x219   :  { %1125 = vmatpush1.bf16.msra.mxu1 %v6976_v55 }
 0x21a   :  { %1126 = vmatprep.subr.bf16.mxu1 %v6977_v57 }
 0x21d   :  { %1127 = vmatpush1.bf16.msra.mxu1 %v6979_v58 }
 0x21e   :  { %678 = vmatmul.mubr.bf16.gmra.mrb[16].mxu0 %v6923_v40  ;;  %1128 = vmatprep.subr.bf16.mxu1 %v6980_v59  ;;  %v7007_v59 = vld [vmem:[#allocation11 + $0x80] ss:$8 sps:$4 sm:$0xff]  }
 0x21f   :  { %687 = vmatprep.mubr.bf16.mxu0 %v8044_v0 }
 0x221   :  { %1129 = vmatpush1.bf16.msra.mxu1 %v6982_v60 }
 0x226   :  { %688 = vmatmul.mubr.bf16.gmra.mrb[20].mxu0 %v6924_v45 }
 0x227   :  { %697 = vmatprep.mubr.bf16.mxu0 %v8044_v0 }
 0x22e   :  { %698 = vmatmul.mubr.bf16.gmra.mrb[24].mxu0 %v6925_v50  ;;  %v7004_v50 = vld [vmem:[#allocation11 + $0x70] ss:$8 sps:$4 sm:$0xff]  }
 0x22f   :  { %707 = vmatprep.mubr.bf16.mxu0 %v8044_v0  ;;  %1606 = vmatpush1.bf16.msra.mxu0 %v7004_v50 }
 0x236   :  { %708 = vmatmul.mubr.bf16.gmra.mrb[28].mxu0 %v6926_v51 }
 0x237   :  { %717 = vmatprep.mubr.bf16.mxu0 %v8044_v0 }
 0x23e   :  { %718 = vmatmul.mubr.bf16.gmra.mrb[32].mxu0 %v6927_v52  ;;  %v7009_v52 = vld [vmem:[#allocation11 + $0x84] ss:$8 sps:$4 sm:$0xff]  }
 0x23f   :  { %727 = vmatprep.mubr.bf16.mxu0 %v8044_v0  ;;  %1607 = vmatprep.subr.bf16.mxu0 %v7009_v52 }
 0x240   :  { %1608 = vmatpush1.bf16.msra.mxu0 %v7007_v59 }
 0x246   :  { %728 = vmatmul.mubr.bf16.gmra.mrb[36].mxu0 %v6928_v53 }
 0x247   :  { %737 = vmatprep.mubr.bf16.mxu0 %v8044_v0 }
 0x24e   :  { %738 = vmatmul.mubr.bf16.gmra.mrb[40].mxu0 %v6929_v54 }
 0x24f   :  { %747 = vmatprep.mubr.bf16.mxu0 %v8044_v0 }
 0x256   :  { %748 = vmatmul.mubr.bf16.gmra.mrb[44].mxu0 %v6930_v56 }
 0x257   :  { %757 = vmatprep.mubr.bf16.mxu0 %v8044_v0 }
 0x25e   :  { %758 = vmatmul.mubr.bf16.gmra.mrb[48].mxu0 %v6931_v61 }
 0x25f   :  { %767 = vmatprep.mubr.bf16.mxu0 %v8044_v0 }
 0x266   :  { %768 = vmatmul.mubr.bf16.gmra.mrb[52].mxu0 %v6932_v62  ;;  %v7012_v62 = vld [vmem:[#allocation11 + $0x94] ss:$8 sps:$4 sm:$0xff]  }
 0x267   :  { %777 = vmatprep.mubr.bf16.mxu0 %v8044_v0  ;;  %1609 = vmatprep.subr.bf16.mxu0 %v7012_v62 }
 0x268   :  { %1610 = vmatpush1.bf16.msra.mxu0 %v7010_v6 }
 0x269   :  { %1611 = vmatprep.subr.bf16.mxu0 %v7015_v9 }
 0x26e   :  { %778 = vmatmul.mubr.bf16.gmra.mrb[56].mxu0 %v6933_v63 }
 0x26f   :  { %787 = vmatprep.mubr.bf16.mxu0 %v8044_v0 }
 0x276   :  { %788 = vmatmul.mubr.bf16.gmra.mrb[60].mxu0 %v6934_v1 }
 0x2d1   :  { %v639_v17 = vpop.f32.mrb[0].mxu0 }
 0x2d2   :  { %v640_v18 = vadd.f32 %v639_v17, %v8541_v13  ;;  %v641_v19 = vpop.f32.mrb[1].mxu0 }
 0x2d3   :  { %v643_v20 = vpop.f32.mrb[2].mxu0  ;;  %v642_v21 = vadd.f32 %v641_v19, %v8544_v14  ;;  %v7013_v19 = vld [vmem:[#allocation11 + $0xa0] ss:$8 sps:$4 sm:$0xff]  }
 0x2d4   :  { %v644_v22 = vadd.f32 %v643_v20, %v8541_v13  ;;  %v645_v23 = vpop.f32.mrb[3].mxu0  ;;  %v798_v28 = vmax.f32 %v640_v18, 0.0  ;;  %1612 = vmatpush1.bf16.msra.mxu0 %v7013_v19 }
 0x2d5   :  { %v646_v26 = vadd.f32 %v645_v23, %v8544_v14  ;;  %v799_v30 = vmax.f32 %v642_v21, 0.0 }
 0x2d6   :  { %v800_v29 = vmax.f32 %v644_v22, 0.0  ;;  %v7018_v22 = vld [vmem:[#allocation11 + $0xb4] ss:$8 sps:$4 sm:$0xff]  }
 0x2d7   :  { %v801_v31 = vmax.f32 %v646_v26, 0.0  ;;  %1613 = vmatprep.subr.bf16.mxu0 %v7018_v22 }
 0x2d8   :  { %v862_v33 = vpack.c.bf16 %v800_v29, %v798_v28  ;;  %v7016_v28 = vld [vmem:[#allocation11 + $0xb0] ss:$8 sps:$4 sm:$0xff]  }
 0x2d9   :  { %v649_v35 = vpop.f32.mrb[4].mxu0  ;;  %v863_v36 = vpack.c.bf16 %v801_v31, %v799_v30  ;;  %v7021_v30 = vld [vmem:[#allocation11 + $0xc4] ss:$8 sps:$4 sm:$0xff]   ;;  %1614 = vmatpush1.bf16.msra.mxu0 %v7016_v28 }
 0x2da   :  { %v650_v37 = vadd.f32 %v649_v35, %v8541_v13  ;;  %v651_v38 = vpop.f32.mrb[5].mxu0  ;;  %1615 = vmatprep.subr.bf16.mxu0 %v7021_v30 }
 0x2db   :  { %v652_v39 = vadd.f32 %v651_v38, %v8544_v14  ;;  %v653_v40 = vpop.f32.mrb[6].mxu0  ;;  %1130 = vmatprep.mubr.bf16.mxu1 %v863_v36 }
 0x2dc   :  { %v654_v42 = vadd.f32 %v653_v40, %v8541_v13  ;;  %v655_v43 = vpop.f32.mrb[7].mxu0  ;;  %1131 = vmatmul.mubr.bf16.vlgmr.msra.gmra.mrb[0].mxu1 %v862_v33  ;;  %v802_v46 = vmax.f32 %v650_v37, 0.0  ;;  %v7019_v37 = vld [vmem:[#allocation11 + $0xc0] ss:$8 sps:$4 sm:$0xff]   ;;  %v7024_v40 = vld [vmem:[#allocation11 + $0xd4] ss:$8 sps:$4 sm:$0xff]  }
 0x2dd   :  { %v656_v45 = vadd.f32 %v655_v43, %v8544_v14  ;;  %v803_v48 = vmax.f32 %v652_v39, 0.0  ;;  %1616 = vmatpush1.bf16.msra.mxu0 %v7019_v37 }
 0x2de   :  { %v804_v47 = vmax.f32 %v654_v42, 0.0  ;;  %1617 = vmatprep.subr.bf16.mxu0 %v7024_v40 }
 0x2df   :  { %v805_v49 = vmax.f32 %v656_v45, 0.0 }
 0x2e0   :  { %v864_v51 = vpack.c.bf16 %v804_v47, %v802_v46  ;;  %v7022_v46 = vld [vmem:[#allocation11 + $0xd0] ss:$8 sps:$4 sm:$0xff]  }
 0x2e1   :  { %v659_v53 = vpop.f32.mrb[8].mxu0  ;;  %v865_v54 = vpack.c.bf16 %v805_v49, %v803_v48  ;;  %v7027_v48 = vld [vmem:[#allocation11 + $0xe4] ss:$8 sps:$4 sm:$0xff]   ;;  %1618 = vmatpush1.bf16.msra.mxu0 %v7022_v46 }
 0x2e2   :  { %v660_v55 = vadd.f32 %v659_v53, %v8541_v13  ;;  %v661_v56 = vpop.f32.mrb[9].mxu0  ;;  %1619 = vmatprep.subr.bf16.mxu0 %v7027_v48 }
 0x2e3   :  { %v662_v57 = vadd.f32 %v661_v56, %v8544_v14  ;;  %v663_v58 = vpop.f32.mrb[10].mxu0  ;;  %1140 = vmatprep.mubr.bf16.mxu1 %v865_v54 }
 0x2e4   :  { %v664_v60 = vadd.f32 %v663_v58, %v8541_v13  ;;  %v665_v61 = vpop.f32.mrb[11].mxu0  ;;  %1141 = vmatmul.mubr.bf16.gmra.mrb[4].mxu1 %v864_v51  ;;  %v806_v1 = vmax.f32 %v660_v55, 0.0  ;;  %v7025_v55 = vld [vmem:[#allocation11 + $0xe0] ss:$8 sps:$4 sm:$0xff]  }
 0x2e5   :  { %v666_v63 = vadd.f32 %v665_v61, %v8544_v14  ;;  %v807_v3 = vmax.f32 %v662_v57, 0.0  ;;  %1620 = vmatpush1.bf16.msra.mxu0 %v7025_v55 }
 0x2e6   :  { %v808_v2 = vmax.f32 %v664_v60, 0.0 }
 0x2e7   :  { %v809_v5 = vmax.f32 %v666_v63, 0.0 }
 0x2e8   :  { %v866_v7 = vpack.c.bf16 %v808_v2, %v806_v1 }
 0x2e9   :  { %v669_v11 = vpop.f32.mrb[12].mxu0  ;;  %v867_v12 = vpack.c.bf16 %v809_v5, %v807_v3 }
 0x2ea   :  { %v670_v15 = vadd.f32 %v669_v11, %v8541_v13  ;;  %v671_v16 = vpop.f32.mrb[13].mxu0 }
 0x2eb   :  { %v672_v17 = vadd.f32 %v671_v16, %v8544_v14  ;;  %v673_v18 = vpop.f32.mrb[14].mxu0  ;;  %1150 = vmatprep.mubr.bf16.mxu1 %v867_v12 }
 0x2ec   :  { %v674_v20 = vadd.f32 %v673_v18, %v8541_v13  ;;  %v675_v21 = vpop.f32.mrb[15].mxu0  ;;  %1151 = vmatmul.mubr.bf16.gmra.mrb[8].mxu1 %v866_v7  ;;  %v810_v24 = vmax.f32 %v670_v15, 0.0 }
 0x2ed   :  { %v676_v23 = vadd.f32 %v675_v21, %v8544_v14  ;;  %v811_v26 = vmax.f32 %v672_v17, 0.0 }
 0x2ee   :  { %v812_v25 = vmax.f32 %v674_v20, 0.0 }
 0x2ef   :  { %v813_v27 = vmax.f32 %v676_v23, 0.0 }
 0x2f0   :  { %v868_v29 = vpack.c.bf16 %v812_v25, %v810_v24 }
 0x2f1   :  { %v679_v31 = vpop.f32.mrb[16].mxu0  ;;  %v869_v32 = vpack.c.bf16 %v813_v27, %v811_v26 }
 0x2f2   :  { %v680_v33 = vadd.f32 %v679_v31, %v8541_v13  ;;  %v681_v34 = vpop.f32.mrb[17].mxu0 }
 0x2f3   :  { %v682_v35 = vadd.f32 %v681_v34, %v8544_v14  ;;  %v683_v36 = vpop.f32.mrb[18].mxu0  ;;  %1160 = vmatprep.mubr.bf16.mxu1 %v869_v32 }
 0x2f4   :  { %v684_v38 = vadd.f32 %v683_v36, %v8541_v13  ;;  %v685_v39 = vpop.f32.mrb[19].mxu0  ;;  %1161 = vmatmul.mubr.bf16.gmra.mrb[12].mxu1 %v868_v29  ;;  %v814_v42 = vmax.f32 %v680_v33, 0.0 }
 0x2f5   :  { %v686_v41 = vadd.f32 %v685_v39, %v8544_v14  ;;  %v815_v44 = vmax.f32 %v682_v35, 0.0 }
 0x2f6   :  { %v816_v43 = vmax.f32 %v684_v38, 0.0 }
 0x2f7   :  { %v817_v45 = vmax.f32 %v686_v41, 0.0 }
 0x2f8   :  { %v870_v47 = vpack.c.bf16 %v816_v43, %v814_v42 }
 0x2f9   :  { %v689_v49 = vpop.f32.mrb[20].mxu0  ;;  %v871_v50 = vpack.c.bf16 %v817_v45, %v815_v44 }
 0x2fa   :  { %v690_v51 = vadd.f32 %v689_v49, %v8541_v13  ;;  %v691_v52 = vpop.f32.mrb[21].mxu0 }
 0x2fb   :  { %v692_v53 = vadd.f32 %v691_v52, %v8544_v14  ;;  %v693_v54 = vpop.f32.mrb[22].mxu0  ;;  %1170 = vmatprep.mubr.bf16.mxu1 %v871_v50 }
 0x2fc   :  { %v694_v56 = vadd.f32 %v693_v54, %v8541_v13  ;;  %v695_v57 = vpop.f32.mrb[23].mxu0  ;;  %1171 = vmatmul.mubr.bf16.gmra.mrb[16].mxu1 %v870_v47  ;;  %v818_v59 = vmax.f32 %v690_v51, 0.0 }
 0x2fd   :  { %v696_v58 = vadd.f32 %v695_v57, %v8544_v14  ;;  %v819_v61 = vmax.f32 %v692_v53, 0.0 }
 0x2fe   :  { %v820_v60 = vmax.f32 %v694_v56, 0.0 }
 0x2ff   :  { %v821_v62 = vmax.f32 %v696_v58, 0.0 }
 0x300   :  { %v872_v63 = vpack.c.bf16 %v820_v60, %v818_v59 }
 0x301   :  { %v699_v1 = vpop.f32.mrb[24].mxu0  ;;  %v873_v2 = vpack.c.bf16 %v821_v62, %v819_v61 }
 0x302   :  { %v700_v3 = vadd.f32 %v699_v1, %v8541_v13  ;;  %v701_v5 = vpop.f32.mrb[25].mxu0 }
 0x303   :  { %v702_v6 = vadd.f32 %v701_v5, %v8544_v14  ;;  %v703_v7 = vpop.f32.mrb[26].mxu0  ;;  %1180 = vmatprep.mubr.bf16.mxu1 %v873_v2 }
 0x304   :  { %v704_v9 = vadd.f32 %v703_v7, %v8541_v13  ;;  %v705_v11 = vpop.f32.mrb[27].mxu0  ;;  %1181 = vmatmul.mubr.bf16.gmra.mrb[20].mxu1 %v872_v63  ;;  %v822_v15 = vmax.f32 %v700_v3, 0.0 }
 0x305   :  { %v706_v12 = vadd.f32 %v705_v11, %v8544_v14  ;;  %v823_v17 = vmax.f32 %v702_v6, 0.0 }
 0x306   :  { %v824_v16 = vmax.f32 %v704_v9, 0.0 }
 0x307   :  { %v825_v18 = vmax.f32 %v706_v12, 0.0 }
 0x308   :  { %v874_v19 = vpack.c.bf16 %v824_v16, %v822_v15 }
 0x309   :  { %v709_v20 = vpop.f32.mrb[28].mxu0  ;;  %v875_v21 = vpack.c.bf16 %v825_v18, %v823_v17 }
 0x30a   :  { %v710_v22 = vadd.f32 %v709_v20, %v8541_v13  ;;  %v711_v23 = vpop.f32.mrb[29].mxu0 }
 0x30b   :  { %v712_v24 = vadd.f32 %v711_v23, %v8544_v14  ;;  %v713_v25 = vpop.f32.mrb[30].mxu0  ;;  %1190 = vmatprep.mubr.bf16.mxu1 %v875_v21 }
 0x30c   :  { %v714_v26 = vadd.f32 %v713_v25, %v8541_v13  ;;  %v715_v27 = vpop.f32.mrb[31].mxu0  ;;  %1191 = vmatmul.mubr.bf16.gmra.mrb[24].mxu1 %v874_v19  ;;  %v826_v29 = vmax.f32 %v710_v22, 0.0 }
 0x30d   :  { %v716_v28 = vadd.f32 %v715_v27, %v8544_v14  ;;  %v827_v31 = vmax.f32 %v712_v24, 0.0 }
 0x30e   :  { %v828_v30 = vmax.f32 %v714_v26, 0.0 }
 0x30f   :  { %v829_v32 = vmax.f32 %v716_v28, 0.0 }
 0x310   :  { %v876_v33 = vpack.c.bf16 %v828_v30, %v826_v29 }
 0x311   :  { %v719_v34 = vpop.f32.mrb[32].mxu0  ;;  %v877_v35 = vpack.c.bf16 %v829_v32, %v827_v31 }
 0x312   :  { %v720_v36 = vadd.f32 %v719_v34, %v8541_v13  ;;  %v721_v37 = vpop.f32.mrb[33].mxu0 }
 0x313   :  { %v722_v38 = vadd.f32 %v721_v37, %v8544_v14  ;;  %v723_v39 = vpop.f32.mrb[34].mxu0  ;;  %1200 = vmatprep.mubr.bf16.mxu1 %v877_v35 }
 0x314   :  { %v724_v40 = vadd.f32 %v723_v39, %v8541_v13  ;;  %v725_v41 = vpop.f32.mrb[35].mxu0  ;;  %1201 = vmatmul.mubr.bf16.gmra.mrb[28].mxu1 %v876_v33  ;;  %v830_v43 = vmax.f32 %v720_v36, 0.0 }
 0x315   :  { %v726_v42 = vadd.f32 %v725_v41, %v8544_v14  ;;  %v831_v45 = vmax.f32 %v722_v38, 0.0 }
 0x316   :  { %v832_v44 = vmax.f32 %v724_v40, 0.0  ;;  %v7030_v40 = vld [vmem:[#allocation11 + $0xf4] ss:$8 sps:$4 sm:$0xff]  }
 0x317   :  { %v833_v46 = vmax.f32 %v726_v42, 0.0  ;;  %v7028_v42 = vld [vmem:[#allocation11 + $0xf0] ss:$8 sps:$4 sm:$0xff]   ;;  %1621 = vmatprep.subr.bf16.mxu0 %v7030_v40 }
 0x318   :  { %v878_v47 = vpack.c.bf16 %v832_v44, %v830_v43  ;;  %1622 = vmatpush1.bf16.msra.mxu0 %v7028_v42  ;;  %v7042_v42 = vld [vmem:[#allocation14 + $0x34] ss:$8 sps:$4 sm:$0xff]  }
 0x319   :  { %v729_v48 = vpop.f32.mrb[36].mxu0  ;;  %v879_v49 = vpack.c.bf16 %v833_v46, %v831_v45 }
 0x31a   :  { %v730_v50 = vadd.f32 %v729_v48, %v8541_v13  ;;  %v731_v51 = vpop.f32.mrb[37].mxu0 }
 0x31b   :  { %v732_v52 = vadd.f32 %v731_v51, %v8544_v14  ;;  %v733_v53 = vpop.f32.mrb[38].mxu0  ;;  %1210 = vmatprep.mubr.bf16.mxu1 %v879_v49 }
 0x31c   :  { %v734_v54 = vadd.f32 %v733_v53, %v8541_v13  ;;  %v735_v55 = vpop.f32.mrb[39].mxu0  ;;  %1211 = vmatmul.mubr.bf16.gmra.mrb[32].mxu1 %v878_v47  ;;  %v834_v57 = vmax.f32 %v730_v50, 0.0 }
 0x31d   :  { %v736_v56 = vadd.f32 %v735_v55, %v8544_v14  ;;  %v835_v59 = vmax.f32 %v732_v52, 0.0 }
 0x31e   :  { %v836_v58 = vmax.f32 %v734_v54, 0.0 }
 0x31f   :  { %v837_v60 = vmax.f32 %v736_v56, 0.0 }
 0x320   :  { %v880_v61 = vpack.c.bf16 %v836_v58, %v834_v57 }
 0x321   :  { %v739_v62 = vpop.f32.mrb[40].mxu0  ;;  %v881_v63 = vpack.c.bf16 %v837_v60, %v835_v59 }
 0x322   :  { %v740_v1 = vadd.f32 %v739_v62, %v8541_v13  ;;  %v741_v2 = vpop.f32.mrb[41].mxu0 }
 0x323   :  { %v742_v3 = vadd.f32 %v741_v2, %v8544_v14  ;;  %v743_v5 = vpop.f32.mrb[42].mxu0  ;;  %1220 = vmatprep.mubr.bf16.mxu1 %v881_v63 }
 0x324   :  { %v744_v6 = vadd.f32 %v743_v5, %v8541_v13  ;;  %v745_v7 = vpop.f32.mrb[43].mxu0  ;;  %1221 = vmatmul.mubr.bf16.gmra.mrb[36].mxu1 %v880_v61  ;;  %v838_v11 = vmax.f32 %v740_v1, 0.0 }
 0x325   :  { %v746_v9 = vadd.f32 %v745_v7, %v8544_v14  ;;  %v839_v15 = vmax.f32 %v742_v3, 0.0 }
 0x326   :  { %v840_v12 = vmax.f32 %v744_v6, 0.0 }
 0x327   :  { %v841_v16 = vmax.f32 %v746_v9, 0.0 }
 0x328   :  { %v882_v17 = vpack.c.bf16 %v840_v12, %v838_v11 }
 0x329   :  { %v749_v18 = vpop.f32.mrb[44].mxu0  ;;  %v883_v19 = vpack.c.bf16 %v841_v16, %v839_v15 }
 0x32a   :  { %v750_v20 = vadd.f32 %v749_v18, %v8541_v13  ;;  %v751_v21 = vpop.f32.mrb[45].mxu0 }
 0x32b   :  { %v752_v22 = vadd.f32 %v751_v21, %v8544_v14  ;;  %v753_v23 = vpop.f32.mrb[46].mxu0  ;;  %1230 = vmatprep.mubr.bf16.mxu1 %v883_v19 }
 0x32c   :  { %v754_v24 = vadd.f32 %v753_v23, %v8541_v13  ;;  %v755_v25 = vpop.f32.mrb[47].mxu0  ;;  %1231 = vmatmul.mubr.bf16.gmra.mrb[40].mxu1 %v882_v17  ;;  %v842_v27 = vmax.f32 %v750_v20, 0.0 }
 0x32d   :  { %v756_v26 = vadd.f32 %v755_v25, %v8544_v14  ;;  %v843_v29 = vmax.f32 %v752_v22, 0.0 }
 0x32e   :  { %v844_v28 = vmax.f32 %v754_v24, 0.0 }
 0x32f   :  { %v845_v30 = vmax.f32 %v756_v26, 0.0 }
 0x330   :  { %v884_v31 = vpack.c.bf16 %v844_v28, %v842_v27 }
 0x331   :  { %v759_v32 = vpop.f32.mrb[48].mxu0  ;;  %v885_v33 = vpack.c.bf16 %v845_v30, %v843_v29 }
 0x332   :  { %v760_v34 = vadd.f32 %v759_v32, %v8541_v13  ;;  %v761_v35 = vpop.f32.mrb[49].mxu0 }
 0x333   :  { %v762_v36 = vadd.f32 %v761_v35, %v8544_v14  ;;  %v763_v37 = vpop.f32.mrb[50].mxu0  ;;  %1240 = vmatprep.mubr.bf16.mxu1 %v885_v33  ;;  %v7031_v33 = vld [vmem:[#allocation14] ss:$8 sps:$4 sm:$0xff]   ;;  %v7034_v35 = vld [vmem:[#allocation14 + $0x10] ss:$8 sps:$4 sm:$0xff]  }
 0x334   :  { %v764_v38 = vadd.f32 %v763_v37, %v8541_v13  ;;  %v765_v39 = vpop.f32.mrb[51].mxu0  ;;  %1241 = vmatmul.mubr.bf16.gmra.mrb[44].mxu1 %v884_v31  ;;  %v846_v43 = vmax.f32 %v760_v34, 0.0  ;;  %v7033_v34 = vld [vmem:[#allocation14 + $0x4] ss:$8 sps:$4 sm:$0xff]   ;;  %v7037_v37 = vld [vmem:[#allocation14 + $0x20] ss:$8 sps:$4 sm:$0xff]  }
 0x335   :  { %v766_v41 = vadd.f32 %v765_v39, %v8544_v14  ;;  %v847_v45 = vmax.f32 %v762_v36, 0.0  ;;  %2084 = vmatprep.subr.bf16.mxu1 %v7033_v34  ;;  %v7036_v36 = vld [vmem:[#allocation14 + $0x14] ss:$8 sps:$4 sm:$0xff]  }
 0x336   :  { %v848_v44 = vmax.f32 %v764_v38, 0.0  ;;  %2085 = vmatpush1.bf16.msra.mxu1 %v7031_v33  ;;  %v7039_v38 = vld [vmem:[#allocation14 + $0x24] ss:$8 sps:$4 sm:$0xff]  }
 0x337   :  { %v849_v46 = vmax.f32 %v766_v41, 0.0  ;;  %2086 = vmatprep.subr.bf16.mxu1 %v7036_v36  ;;  %v7040_v41 = vld [vmem:[#allocation14 + $0x30] ss:$8 sps:$4 sm:$0xff]  }
 0x338   :  { %v886_v47 = vpack.c.bf16 %v848_v44, %v846_v43  ;;  %v7058_v36 = vld [vmem:[#allocation14 + $0x90] ss:$8 sps:$4 sm:$0xff]  }
 0x339   :  { %v769_v48 = vpop.f32.mrb[52].mxu0  ;;  %v887_v49 = vpack.c.bf16 %v849_v46, %v847_v45 }
 0x33a   :  { %v770_v50 = vadd.f32 %v769_v48, %v8541_v13  ;;  %v771_v51 = vpop.f32.mrb[53].mxu0  ;;  %2087 = vmatpush1.bf16.msra.mxu1 %v7034_v35 }
 0x33b   :  { %v772_v52 = vadd.f32 %v771_v51, %v8544_v14  ;;  %v773_v53 = vpop.f32.mrb[54].mxu0  ;;  %1250 = vmatprep.mubr.bf16.mxu1 %v887_v49  ;;  %2088 = vmatprep.subr.bf16.mxu1 %v7039_v38  ;;  %v7043_v49 = vld [vmem:[#allocation14 + $0x40] ss:$8 sps:$4 sm:$0xff]   ;;  %v7063_v38 = vld [vmem:[#allocation14 + $0xa4] ss:$8 sps:$4 sm:$0xff]  }
 0x33c   :  { %v774_v54 = vadd.f32 %v773_v53, %v8541_v13  ;;  %v775_v55 = vpop.f32.mrb[55].mxu0  ;;  %1251 = vmatmul.mubr.bf16.gmra.mrb[48].mxu1 %v886_v47  ;;  %v850_v57 = vmax.f32 %v770_v50, 0.0  ;;  %v7045_v50 = vld [vmem:[#allocation14 + $0x44] ss:$8 sps:$4 sm:$0xff]  }
 0x33d   :  { %v776_v56 = vadd.f32 %v775_v55, %v8544_v14  ;;  %v851_v59 = vmax.f32 %v772_v52, 0.0  ;;  %v7048_v52 = vld [vmem:[#allocation14 + $0x54] ss:$8 sps:$4 sm:$0xff]  }
 0x33e   :  { %v852_v58 = vmax.f32 %v774_v54, 0.0  ;;  %2089 = vmatpush1.bf16.msra.mxu1 %v7037_v37 }
 0x33f   :  { %v853_v60 = vmax.f32 %v776_v56, 0.0  ;;  %2090 = vmatprep.subr.bf16.mxu1 %v7042_v42 }
 0x340   :  { %v888_v61 = vpack.c.bf16 %v852_v58, %v850_v57  ;;  %v7046_v58 = vld [vmem:[#allocation14 + $0x50] ss:$8 sps:$4 sm:$0xff]  }
 0x341   :  { %v779_v62 = vpop.f32.mrb[56].mxu0  ;;  %v889_v63 = vpack.c.bf16 %v853_v60, %v851_v59 }
 0x342   :  { %v780_v1 = vadd.f32 %v779_v62, %v8541_v13  ;;  %v781_v2 = vpop.f32.mrb[57].mxu0  ;;  %2091 = vmatpush1.bf16.msra.mxu1 %v7040_v41 }
 0x343   :  { %v782_v3 = vadd.f32 %v781_v2, %v8544_v14  ;;  %v783_v5 = vpop.f32.mrb[58].mxu0  ;;  %1260 = vmatprep.mubr.bf16.mxu1 %v889_v63  ;;  %2092 = vmatprep.subr.bf16.mxu1 %v7045_v50 }
 0x344   :  { %v784_v6 = vadd.f32 %v783_v5, %v8541_v13  ;;  %v785_v7 = vpop.f32.mrb[59].mxu0  ;;  %1261 = vmatmul.mubr.bf16.gmra.mrb[52].mxu1 %v888_v61  ;;  %v854_v11 = vmax.f32 %v780_v1, 0.0  ;;  %v7051_v61 = vld [vmem:[#allocation14 + $0x64] ss:$8 sps:$4 sm:$0xff]  }
 0x345   :  { %v786_v9 = vadd.f32 %v785_v7, %v8544_v14  ;;  %v855_v15 = vmax.f32 %v782_v3, 0.0 }
 0x346   :  { %v856_v12 = vmax.f32 %v784_v6, 0.0  ;;  %2093 = vmatpush1.bf16.msra.mxu1 %v7043_v49  ;;  %v7049_v6 = vld [vmem:[#allocation14 + $0x60] ss:$8 sps:$4 sm:$0xff]  }
 0x347   :  { %v857_v16 = vmax.f32 %v786_v9, 0.0  ;;  %2094 = vmatprep.subr.bf16.mxu1 %v7048_v52  ;;  %v7054_v9 = vld [vmem:[#allocation14 + $0x74] ss:$8 sps:$4 sm:$0xff]  }
 0x348   :  { %v890_v17 = vpack.c.bf16 %v856_v12, %v854_v11 }
 0x349   :  { %v789_v18 = vpop.f32.mrb[60].mxu0  ;;  %v891_v19 = vpack.c.bf16 %v857_v16, %v855_v15 }
 0x34a   :  { %v790_v20 = vadd.f32 %v789_v18, %v8541_v13  ;;  %v791_v21 = vpop.f32.mrb[61].mxu0  ;;  %2095 = vmatpush1.bf16.msra.mxu1 %v7046_v58  ;;  %v7052_v18 = vld [vmem:[#allocation14 + $0x70] ss:$8 sps:$4 sm:$0xff]  }
 0x34b   :  { %v792_v22 = vadd.f32 %v791_v21, %v8544_v14  ;;  %v793_v23 = vpop.f32.mrb[62].mxu0  ;;  %1270 = vmatprep.mubr.bf16.mxu1 %v891_v19  ;;  %2096 = vmatprep.subr.bf16.mxu1 %v7051_v61  ;;  %v7057_v21 = vld [vmem:[#allocation14 + $0x84] ss:$8 sps:$4 sm:$0xff]  }
 0x34c   :  { %v794_v24 = vadd.f32 %v793_v23, %v8541_v13  ;;  %v795_v25 = vpop.f32.mrb[63].mxu0  ;;  %1271 = vmatmul.mubr.bf16.gmra.mrb[56].mxu1 %v890_v17  ;;  %v858_v27 = vmax.f32 %v790_v20, 0.0  ;;  %v926_v13 = vld [vmem:[#allocation10] sm:$0x3] }
 0x34d   :  { %v796_v26 = vadd.f32 %v795_v25, %v8544_v14  ;;  %v859_v29 = vmax.f32 %v792_v22, 0.0  ;;  %v8611_v14 = vrot.slane %v926_v13, %v8536_v8  ;;  %v8614_v39 = vrot.slane %v926_v13, %v8538_v10 }
 0x34e   :  { %v860_v28 = vmax.f32 %v794_v24, 0.0  ;;  %2097 = vmatpush1.bf16.msra.mxu1 %v7049_v6 }
 0x34f   :  { %v861_v30 = vmax.f32 %v796_v26, 0.0  ;;  %2098 = vmatprep.subr.bf16.mxu1 %v7054_v9 }
 0x350   :  { %v892_v31 = vpack.c.bf16 %v860_v28, %v858_v27  ;;  %v7055_v28 = vld [vmem:[#allocation14 + $0x80] ss:$8 sps:$4 sm:$0xff]  }
 0x351   :  { %v893_v32 = vpack.c.bf16 %v861_v30, %v859_v29  ;;  %v7060_v30 = vld [vmem:[#allocation14 + $0x94] ss:$8 sps:$4 sm:$0xff]  }
 0x352   :  { %2099 = vmatpush1.bf16.msra.mxu1 %v7052_v18 }
 0x353   :  { %1280 = vmatprep.mubr.bf16.mxu1 %v893_v32  ;;  %2100 = vmatprep.subr.bf16.mxu1 %v7057_v21 }
 0x354   :  { %1281 = vmatmul.mubr.bf16.gmra.mrb[60].mxu1 %v892_v31 }
 0x356   :  { %2101 = vmatpush1.bf16.msra.mxu1 %v7055_v28 }
 0x357   :  { %2102 = vmatprep.subr.bf16.mxu1 %v7060_v30 }
 0x35a   :  { %2103 = vmatpush1.bf16.msra.mxu1 %v7058_v36 }
 0x35b   :  { %2104 = vmatprep.subr.bf16.mxu1 %v7063_v38 }
 0x3af   :  { %v1132_v40 = vpop.f32.mrb[0].mxu1 }
 0x3b0   :  { %v1133_v43 = vadd.f32 %v1132_v40, %v8611_v14  ;;  %v1134_v44 = vpop.f32.mrb[1].mxu1 }
 0x3b1   :  { %v1135_v45 = vadd.f32 %v1134_v44, %v8614_v39  ;;  %v1136_v46 = vpop.f32.mrb[2].mxu1 }
 0x3b2   :  { %v1137_v47 = vadd.f32 %v1136_v46, %v8611_v14  ;;  %v1138_v48 = vpop.f32.mrb[3].mxu1  ;;  %v1291_v53 = vmax.f32 %v1133_v43, 0.0  ;;  %v7061_v46 = vld [vmem:[#allocation14 + $0xa0] ss:$8 sps:$4 sm:$0xff]  }
 0x3b3   :  { %v1139_v51 = vadd.f32 %v1138_v48, %v8614_v39  ;;  %v1292_v55 = vmax.f32 %v1135_v45, 0.0  ;;  %v7066_v48 = vld [vmem:[#allocation14 + $0xb4] ss:$8 sps:$4 sm:$0xff]   ;;  %2105 = vmatpush1.bf16.msra.mxu1 %v7061_v46 }
 0x3b4   :  { %v1293_v54 = vmax.f32 %v1137_v47, 0.0  ;;  %2106 = vmatprep.subr.bf16.mxu1 %v7066_v48 }
 0x3b5   :  { %v1294_v56 = vmax.f32 %v1139_v51, 0.0 }
 0x3b6   :  { %v1355_v57 = vpack.c.bf16 %v1293_v54, %v1291_v53  ;;  %v7064_v54 = vld [vmem:[#allocation14 + $0xb0] ss:$8 sps:$4 sm:$0xff]  }
 0x3b7   :  { %v1142_v59 = vpop.f32.mrb[4].mxu1  ;;  %v1356_v60 = vpack.c.bf16 %v1294_v56, %v1292_v55  ;;  %2107 = vmatpush1.bf16.msra.mxu1 %v7064_v54 }
 0x3b8   :  { %v1143_v62 = vadd.f32 %v1142_v59, %v8611_v14  ;;  %v1144_v63 = vpop.f32.mrb[5].mxu1 }
 0x3b9   :  { %v1145_v1 = vadd.f32 %v1144_v63, %v8614_v39  ;;  %v1146_v2 = vpop.f32.mrb[6].mxu1  ;;  %1623 = vmatprep.mubr.bf16.mxu0 %v1356_v60 }
 0x3ba   :  { %v1147_v3 = vadd.f32 %v1146_v2, %v8611_v14  ;;  %v1148_v5 = vpop.f32.mrb[7].mxu1  ;;  %1624 = vmatmul.mubr.bf16.vlgmr.msra.gmra.mrb[64].mxu0 %v1355_v57  ;;  %v1295_v11 = vmax.f32 %v1143_v62, 0.0  ;;  %v7069_v57 = vld [vmem:[#allocation14 + $0xc4] ss:$8 sps:$4 sm:$0xff]  }
 0x3bb   :  { %v1149_v7 = vadd.f32 %v1148_v5, %v8614_v39  ;;  %v1296_v15 = vmax.f32 %v1145_v1, 0.0  ;;  %v7067_v1 = vld [vmem:[#allocation14 + $0xc0] ss:$8 sps:$4 sm:$0xff]   ;;  %2108 = vmatprep.subr.bf16.mxu1 %v7069_v57 }
 0x3bc   :  { %v1297_v12 = vmax.f32 %v1147_v3, 0.0  ;;  %v7072_v3 = vld [vmem:[#allocation14 + $0xd4] ss:$8 sps:$4 sm:$0xff]   ;;  %2109 = vmatpush1.bf16.msra.mxu1 %v7067_v1 }
 0x3bd   :  { %v1298_v16 = vmax.f32 %v1149_v7, 0.0  ;;  %2110 = vmatprep.subr.bf16.mxu1 %v7072_v3 }
 0x3be   :  { %v1357_v17 = vpack.c.bf16 %v1297_v12, %v1295_v11  ;;  %v7070_v12 = vld [vmem:[#allocation14 + $0xd0] ss:$8 sps:$4 sm:$0xff]  }
 0x3bf   :  { %v1152_v19 = vpop.f32.mrb[8].mxu1  ;;  %v1358_v20 = vpack.c.bf16 %v1298_v16, %v1296_v15 }
 0x3c0   :  { %v1153_v22 = vadd.f32 %v1152_v19, %v8611_v14  ;;  %v1154_v23 = vpop.f32.mrb[9].mxu1  ;;  %2111 = vmatpush1.bf16.msra.mxu1 %v7070_v12 }
 0x3c1   :  { %v1155_v24 = vadd.f32 %v1154_v23, %v8614_v39  ;;  %v1156_v25 = vpop.f32.mrb[10].mxu1  ;;  %1633 = vmatprep.mubr.bf16.mxu0 %v1358_v20 }
 0x3c2   :  { %v1157_v26 = vadd.f32 %v1156_v25, %v8611_v14  ;;  %v1158_v27 = vpop.f32.mrb[11].mxu1  ;;  %1634 = vmatmul.mubr.bf16.gmra.mrb[68].mxu0 %v1357_v17  ;;  %v1299_v31 = vmax.f32 %v1153_v22, 0.0  ;;  %v7075_v17 = vld [vmem:[#allocation14 + $0xe4] ss:$8 sps:$4 sm:$0xff]  }
 0x3c3   :  { %v1159_v29 = vadd.f32 %v1158_v27, %v8614_v39  ;;  %v1300_v33 = vmax.f32 %v1155_v24, 0.0  ;;  %v7073_v24 = vld [vmem:[#allocation14 + $0xe0] ss:$8 sps:$4 sm:$0xff]   ;;  %2112 = vmatprep.subr.bf16.mxu1 %v7075_v17 }
 0x3c4   :  { %v1301_v32 = vmax.f32 %v1157_v26, 0.0  ;;  %2113 = vmatpush1.bf16.msra.mxu1 %v7073_v24 }
 0x3c5   :  { %v1302_v34 = vmax.f32 %v1159_v29, 0.0 }
 0x3c6   :  { %v1359_v35 = vpack.c.bf16 %v1301_v32, %v1299_v31 }
 0x3c7   :  { %v1162_v13 = vpop.f32.mrb[12].mxu1  ;;  %v1360_v37 = vpack.c.bf16 %v1302_v34, %v1300_v33 }
 0x3c8   :  { %v1163_v40 = vadd.f32 %v1162_v13, %v8611_v14  ;;  %v1164_v41 = vpop.f32.mrb[13].mxu1 }
 0x3c9   :  { %v1165_v42 = vadd.f32 %v1164_v41, %v8614_v39  ;;  %v1166_v43 = vpop.f32.mrb[14].mxu1  ;;  %1643 = vmatprep.mubr.bf16.mxu0 %v1360_v37 }
 0x3ca   :  { %v1167_v44 = vadd.f32 %v1166_v43, %v8611_v14  ;;  %v1168_v45 = vpop.f32.mrb[15].mxu1  ;;  %1644 = vmatmul.mubr.bf16.gmra.mrb[72].mxu0 %v1359_v35  ;;  %v1303_v49 = vmax.f32 %v1163_v40, 0.0 }
 0x3cb   :  { %v1169_v47 = vadd.f32 %v1168_v45, %v8614_v39  ;;  %v1304_v51 = vmax.f32 %v1165_v42, 0.0 }
 0x3cc   :  { %v1305_v50 = vmax.f32 %v1167_v44, 0.0 }
 0x3cd   :  { %v1306_v52 = vmax.f32 %v1169_v47, 0.0 }
 0x3ce   :  { %v1361_v53 = vpack.c.bf16 %v1305_v50, %v1303_v49 }
 0x3cf   :  { %v1172_v55 = vpop.f32.mrb[16].mxu1  ;;  %v1362_v56 = vpack.c.bf16 %v1306_v52, %v1304_v51 }
 0x3d0   :  { %v1173_v58 = vadd.f32 %v1172_v55, %v8611_v14  ;;  %v1174_v59 = vpop.f32.mrb[17].mxu1 }
 0x3d1   :  { %v1175_v60 = vadd.f32 %v1174_v59, %v8614_v39  ;;  %v1176_v61 = vpop.f32.mrb[18].mxu1  ;;  %1653 = vmatprep.mubr.bf16.mxu0 %v1362_v56 }
 0x3d2   :  { %v1177_v62 = vadd.f32 %v1176_v61, %v8611_v14  ;;  %v1178_v63 = vpop.f32.mrb[19].mxu1  ;;  %1654 = vmatmul.mubr.bf16.gmra.mrb[76].mxu0 %v1361_v53  ;;  %v1307_v5 = vmax.f32 %v1173_v58, 0.0 }
 0x3d3   :  { %v1179_v2 = vadd.f32 %v1178_v63, %v8614_v39  ;;  %v1308_v7 = vmax.f32 %v1175_v60, 0.0 }
 0x3d4   :  { %v1309_v6 = vmax.f32 %v1177_v62, 0.0 }
 0x3d5   :  { %v1310_v9 = vmax.f32 %v1179_v2, 0.0 }
 0x3d6   :  { %v1363_v11 = vpack.c.bf16 %v1309_v6, %v1307_v5 }
 0x3d7   :  { %v1182_v15 = vpop.f32.mrb[20].mxu1  ;;  %v1364_v16 = vpack.c.bf16 %v1310_v9, %v1308_v7 }
 0x3d8   :  { %v1183_v18 = vadd.f32 %v1182_v15, %v8611_v14  ;;  %v1184_v19 = vpop.f32.mrb[21].mxu1 }
 0x3d9   :  { %v1185_v20 = vadd.f32 %v1184_v19, %v8614_v39  ;;  %v1186_v21 = vpop.f32.mrb[22].mxu1  ;;  %1663 = vmatprep.mubr.bf16.mxu0 %v1364_v16 }
 0x3da   :  { %v1187_v22 = vadd.f32 %v1186_v21, %v8611_v14  ;;  %v1188_v23 = vpop.f32.mrb[23].mxu1  ;;  %1664 = vmatmul.mubr.bf16.gmra.mrb[80].mxu0 %v1363_v11  ;;  %v1311_v26 = vmax.f32 %v1183_v18, 0.0 }
 0x3db   :  { %v1189_v25 = vadd.f32 %v1188_v23, %v8614_v39  ;;  %v1312_v28 = vmax.f32 %v1185_v20, 0.0 }
 0x3dc   :  { %v1313_v27 = vmax.f32 %v1187_v22, 0.0 }
 0x3dd   :  { %v1314_v29 = vmax.f32 %v1189_v25, 0.0 }
 0x3de   :  { %v1365_v30 = vpack.c.bf16 %v1313_v27, %v1311_v26 }
 0x3df   :  { %v1192_v31 = vpop.f32.mrb[24].mxu1  ;;  %v1366_v32 = vpack.c.bf16 %v1314_v29, %v1312_v28 }
 0x3e0   :  { %v1193_v33 = vadd.f32 %v1192_v31, %v8611_v14  ;;  %v1194_v34 = vpop.f32.mrb[25].mxu1 }
 0x3e1   :  { %v1195_v35 = vadd.f32 %v1194_v34, %v8614_v39  ;;  %v1196_v36 = vpop.f32.mrb[26].mxu1  ;;  %1673 = vmatprep.mubr.bf16.mxu0 %v1366_v32 }
 0x3e2   :  { %v1197_v13 = vadd.f32 %v1196_v36, %v8611_v14  ;;  %v1198_v37 = vpop.f32.mrb[27].mxu1  ;;  %1674 = vmatmul.mubr.bf16.gmra.mrb[84].mxu0 %v1365_v30  ;;  %v1315_v40 = vmax.f32 %v1193_v33, 0.0 }
 0x3e3   :  { %v1199_v38 = vadd.f32 %v1198_v37, %v8614_v39  ;;  %v1316_v42 = vmax.f32 %v1195_v35, 0.0 }
 0x3e4   :  { %v1317_v41 = vmax.f32 %v1197_v13, 0.0 }
 0x3e5   :  { %v1318_v43 = vmax.f32 %v1199_v38, 0.0 }
 0x3e6   :  { %v1367_v44 = vpack.c.bf16 %v1317_v41, %v1315_v40 }
 0x3e7   :  { %v1202_v45 = vpop.f32.mrb[28].mxu1  ;;  %v1368_v46 = vpack.c.bf16 %v1318_v43, %v1316_v42 }
 0x3e8   :  { %v1203_v47 = vadd.f32 %v1202_v45, %v8611_v14  ;;  %v1204_v48 = vpop.f32.mrb[29].mxu1 }
 0x3e9   :  { %v1205_v49 = vadd.f32 %v1204_v48, %v8614_v39  ;;  %v1206_v50 = vpop.f32.mrb[30].mxu1  ;;  %1683 = vmatprep.mubr.bf16.mxu0 %v1368_v46 }
 0x3ea   :  { %v1207_v51 = vadd.f32 %v1206_v50, %v8611_v14  ;;  %v1208_v52 = vpop.f32.mrb[31].mxu1  ;;  %1684 = vmatmul.mubr.bf16.gmra.mrb[88].mxu0 %v1367_v44  ;;  %v1319_v54 = vmax.f32 %v1203_v47, 0.0 }
 0x3eb   :  { %v1209_v53 = vadd.f32 %v1208_v52, %v8614_v39  ;;  %v1320_v56 = vmax.f32 %v1205_v49, 0.0 }
 0x3ec   :  { %v1321_v55 = vmax.f32 %v1207_v51, 0.0 }
 0x3ed   :  { %v1322_v57 = vmax.f32 %v1209_v53, 0.0 }
 0x3ee   :  { %v1369_v58 = vpack.c.bf16 %v1321_v55, %v1319_v54 }
 0x3ef   :  { %v1212_v59 = vpop.f32.mrb[32].mxu1  ;;  %v1370_v60 = vpack.c.bf16 %v1322_v57, %v1320_v56 }
 0x3f0   :  { %v1213_v61 = vadd.f32 %v1212_v59, %v8611_v14  ;;  %v1214_v62 = vpop.f32.mrb[33].mxu1 }
 0x3f1   :  { %v1215_v63 = vadd.f32 %v1214_v62, %v8614_v39  ;;  %v1216_v1 = vpop.f32.mrb[34].mxu1  ;;  %1693 = vmatprep.mubr.bf16.mxu0 %v1370_v60 }
 0x3f2   :  { %v1217_v2 = vadd.f32 %v1216_v1, %v8611_v14  ;;  %v1218_v3 = vpop.f32.mrb[35].mxu1  ;;  %1694 = vmatmul.mubr.bf16.gmra.mrb[92].mxu0 %v1369_v58  ;;  %v1323_v6 = vmax.f32 %v1213_v61, 0.0 }
 0x3f3   :  { %v1219_v5 = vadd.f32 %v1218_v3, %v8614_v39  ;;  %v1324_v9 = vmax.f32 %v1215_v63, 0.0 }
 0x3f4   :  { %v1325_v7 = vmax.f32 %v1217_v2, 0.0  ;;  %v7078_v2 = vld [vmem:[#allocation14 + $0xf4] ss:$8 sps:$4 sm:$0xff]  }
 0x3f5   :  { %v1326_v11 = vmax.f32 %v1219_v5, 0.0  ;;  %v7076_v5 = vld [vmem:[#allocation14 + $0xf0] ss:$8 sps:$4 sm:$0xff]   ;;  %2114 = vmatprep.subr.bf16.mxu1 %v7078_v2 }
 0x3f6   :  { %v1371_v12 = vpack.c.bf16 %v1325_v7, %v1323_v6  ;;  %2115 = vmatpush1.bf16.msra.mxu1 %v7076_v5  ;;  %v7090_v5 = vld [vmem:[#allocation17 + $0x34] ss:$8 sps:$4 sm:$0xff]  }
 0x3f7   :  { %v1222_v15 = vpop.f32.mrb[36].mxu1  ;;  %v1372_v16 = vpack.c.bf16 %v1326_v11, %v1324_v9 }
 0x3f8   :  { %v1223_v17 = vadd.f32 %v1222_v15, %v8611_v14  ;;  %v1224_v18 = vpop.f32.mrb[37].mxu1 }
 0x3f9   :  { %v1225_v19 = vadd.f32 %v1224_v18, %v8614_v39  ;;  %v1226_v20 = vpop.f32.mrb[38].mxu1  ;;  %1703 = vmatprep.mubr.bf16.mxu0 %v1372_v16 }
 0x3fa   :  { %v1227_v21 = vadd.f32 %v1226_v20, %v8611_v14  ;;  %v1228_v22 = vpop.f32.mrb[39].mxu1  ;;  %1704 = vmatmul.mubr.bf16.gmra.mrb[96].mxu0 %v1371_v12  ;;  %v1327_v24 = vmax.f32 %v1223_v17, 0.0 }
 0x3fb   :  { %v1229_v23 = vadd.f32 %v1228_v22, %v8614_v39  ;;  %v1328_v26 = vmax.f32 %v1225_v19, 0.0 }
 0x3fc   :  { %v1329_v25 = vmax.f32 %v1227_v21, 0.0 }
 0x3fd   :  { %v1330_v27 = vmax.f32 %v1229_v23, 0.0 }
 0x3fe   :  { %v1373_v28 = vpack.c.bf16 %v1329_v25, %v1327_v24 }
 0x3ff   :  { %v1232_v29 = vpop.f32.mrb[40].mxu1  ;;  %v1374_v30 = vpack.c.bf16 %v1330_v27, %v1328_v26 }
 0x400   :  { %v1233_v31 = vadd.f32 %v1232_v29, %v8611_v14  ;;  %v1234_v32 = vpop.f32.mrb[41].mxu1 }
 0x401   :  { %v1235_v33 = vadd.f32 %v1234_v32, %v8614_v39  ;;  %v1236_v34 = vpop.f32.mrb[42].mxu1  ;;  %1713 = vmatprep.mubr.bf16.mxu0 %v1374_v30 }
 0x402   :  { %v1237_v35 = vadd.f32 %v1236_v34, %v8611_v14  ;;  %v1238_v36 = vpop.f32.mrb[43].mxu1  ;;  %1714 = vmatmul.mubr.bf16.gmra.mrb[100].mxu0 %v1373_v28  ;;  %v1331_v37 = vmax.f32 %v1233_v31, 0.0 }
 0x403   :  { %v1239_v13 = vadd.f32 %v1238_v36, %v8614_v39  ;;  %v1332_v40 = vmax.f32 %v1235_v33, 0.0 }
 0x404   :  { %v1333_v38 = vmax.f32 %v1237_v35, 0.0 }
 0x405   :  { %v1334_v41 = vmax.f32 %v1239_v13, 0.0 }
 0x406   :  { %v1375_v42 = vpack.c.bf16 %v1333_v38, %v1331_v37 }
 0x407   :  { %v1376_v43 = vpack.c.bf16 %v1334_v41, %v1332_v40  ;;  %v1242_v44 = vpop.f32.mrb[44].mxu1 }
 0x408   :  { %v1243_v45 = vadd.f32 %v1242_v44, %v8611_v14  ;;  %v1244_v46 = vpop.f32.mrb[45].mxu1 }
 0x409   :  { %v1245_v47 = vadd.f32 %v1244_v46, %v8614_v39  ;;  %v1246_v48 = vpop.f32.mrb[46].mxu1  ;;  %1723 = vmatprep.mubr.bf16.mxu0 %v1376_v43 }
 0x40a   :  { %v1247_v49 = vadd.f32 %v1246_v48, %v8611_v14  ;;  %v1248_v50 = vpop.f32.mrb[47].mxu1  ;;  %1724 = vmatmul.mubr.bf16.gmra.mrb[104].mxu0 %v1375_v42  ;;  %v1335_v52 = vmax.f32 %v1243_v45, 0.0 }
 0x40b   :  { %v1249_v51 = vadd.f32 %v1248_v50, %v8614_v39  ;;  %v1336_v54 = vmax.f32 %v1245_v47, 0.0 }
 0x40c   :  { %v1337_v53 = vmax.f32 %v1247_v49, 0.0 }
 0x40d   :  { %v1338_v55 = vmax.f32 %v1249_v51, 0.0 }
 0x40e   :  { %v1377_v56 = vpack.c.bf16 %v1337_v53, %v1335_v52 }
 0x40f   :  { %v1378_v57 = vpack.c.bf16 %v1338_v55, %v1336_v54  ;;  %v1252_v58 = vpop.f32.mrb[48].mxu1 }
 0x410   :  { %v1253_v59 = vadd.f32 %v1252_v58, %v8611_v14  ;;  %v1254_v60 = vpop.f32.mrb[49].mxu1  ;;  %v7079_v58 = vld [vmem:[#allocation17] ss:$8 sps:$4 sm:$0xff]  }
 0x411   :  { %v1255_v61 = vadd.f32 %v1254_v60, %v8614_v39  ;;  %v1256_v62 = vpop.f32.mrb[50].mxu1  ;;  %1733 = vmatprep.mubr.bf16.mxu0 %v1378_v57  ;;  %v7082_v60 = vld [vmem:[#allocation17 + $0x10] ss:$8 sps:$4 sm:$0xff]  }
 0x412   :  { %v1257_v63 = vadd.f32 %v1256_v62, %v8611_v14  ;;  %v1258_v1 = vpop.f32.mrb[51].mxu1  ;;  %1734 = vmatmul.mubr.bf16.gmra.mrb[108].mxu0 %v1377_v56  ;;  %v1339_v6 = vmax.f32 %v1253_v59, 0.0  ;;  %v7081_v59 = vld [vmem:[#allocation17 + $0x4] ss:$8 sps:$4 sm:$0xff]   ;;  %v7085_v62 = vld [vmem:[#allocation17 + $0x20] ss:$8 sps:$4 sm:$0xff]  }
 0x413   :  { %v1259_v3 = vadd.f32 %v1258_v1, %v8614_v39  ;;  %v1340_v9 = vmax.f32 %v1255_v61, 0.0  ;;  %2577 = vmatprep.subr.bf16.mxu0 %v7081_v59  ;;  %v7084_v61 = vld [vmem:[#allocation17 + $0x14] ss:$8 sps:$4 sm:$0xff]  }
 0x414   :  { %v1341_v7 = vmax.f32 %v1257_v63, 0.0  ;;  %2578 = vmatpush1.bf16.msra.mxu0 %v7079_v58  ;;  %v7087_v63 = vld [vmem:[#allocation17 + $0x24] ss:$8 sps:$4 sm:$0xff]   ;;  %v7108_v59 = vld [vmem:[#allocation17 + $0x94] ss:$8 sps:$4 sm:$0xff]  }
 0x415   :  { %v1342_v11 = vmax.f32 %v1259_v3, 0.0  ;;  %2579 = vmatprep.subr.bf16.mxu0 %v7084_v61  ;;  %v7088_v3 = vld [vmem:[#allocation17 + $0x30] ss:$8 sps:$4 sm:$0xff]  }
 0x416   :  { %v1379_v12 = vpack.c.bf16 %v1341_v7, %v1339_v6 }
 0x417   :  { %v1380_v15 = vpack.c.bf16 %v1342_v11, %v1340_v9  ;;  %v1262_v16 = vpop.f32.mrb[52].mxu1 }
 0x418   :  { %v1263_v17 = vadd.f32 %v1262_v16, %v8611_v14  ;;  %v1264_v18 = vpop.f32.mrb[53].mxu1  ;;  %2580 = vmatpush1.bf16.msra.mxu0 %v7082_v60  ;;  %v7091_v16 = vld [vmem:[#allocation17 + $0x40] ss:$8 sps:$4 sm:$0xff]  }
 0x419   :  { %v1265_v19 = vadd.f32 %v1264_v18, %v8614_v39  ;;  %v1266_v20 = vpop.f32.mrb[54].mxu1  ;;  %1743 = vmatprep.mubr.bf16.mxu0 %v1380_v15  ;;  %2581 = vmatprep.subr.bf16.mxu0 %v7087_v63 }
 0x41a   :  { %v1267_v21 = vadd.f32 %v1266_v20, %v8611_v14  ;;  %v1268_v22 = vpop.f32.mrb[55].mxu1  ;;  %1744 = vmatmul.mubr.bf16.gmra.mrb[112].mxu0 %v1379_v12  ;;  %v1343_v24 = vmax.f32 %v1263_v17, 0.0  ;;  %v7093_v17 = vld [vmem:[#allocation17 + $0x44] ss:$8 sps:$4 sm:$0xff]  }
 0x41b   :  { %v1269_v23 = vadd.f32 %v1268_v22, %v8614_v39  ;;  %v1344_v26 = vmax.f32 %v1265_v19, 0.0  ;;  %v7096_v19 = vld [vmem:[#allocation17 + $0x54] ss:$8 sps:$4 sm:$0xff]  }
 0x41c   :  { %v1345_v25 = vmax.f32 %v1267_v21, 0.0  ;;  %2582 = vmatpush1.bf16.msra.mxu0 %v7085_v62 }
 0x41d   :  { %v1346_v27 = vmax.f32 %v1269_v23, 0.0  ;;  %2583 = vmatprep.subr.bf16.mxu0 %v7090_v5 }
 0x41e   :  { %v1381_v28 = vpack.c.bf16 %v1345_v25, %v1343_v24  ;;  %v7094_v25 = vld [vmem:[#allocation17 + $0x50] ss:$8 sps:$4 sm:$0xff]  }
 0x41f   :  { %v1382_v29 = vpack.c.bf16 %v1346_v27, %v1344_v26  ;;  %v1272_v30 = vpop.f32.mrb[56].mxu1 }
 0x420   :  { %v1273_v31 = vadd.f32 %v1272_v30, %v8611_v14  ;;  %v1274_v32 = vpop.f32.mrb[57].mxu1  ;;  %2584 = vmatpush1.bf16.msra.mxu0 %v7088_v3 }
 0x421   :  { %v1275_v33 = vadd.f32 %v1274_v32, %v8614_v39  ;;  %v1276_v34 = vpop.f32.mrb[58].mxu1  ;;  %1753 = vmatprep.mubr.bf16.mxu0 %v1382_v29  ;;  %2585 = vmatprep.subr.bf16.mxu0 %v7093_v17  ;;  %v7109_v17 = vld [vmem:[#allocation17 + $0xa0] ss:$8 sps:$4 sm:$0xff]  }
 0x422   :  { %v1277_v35 = vadd.f32 %v1276_v34, %v8611_v14  ;;  %v1278_v36 = vpop.f32.mrb[59].mxu1  ;;  %1754 = vmatmul.mubr.bf16.gmra.mrb[116].mxu0 %v1381_v28  ;;  %v1347_v37 = vmax.f32 %v1273_v31, 0.0  ;;  %v7099_v28 = vld [vmem:[#allocation17 + $0x64] ss:$8 sps:$4 sm:$0xff]  }
 0x423   :  { %v1279_v13 = vadd.f32 %v1278_v36, %v8614_v39  ;;  %v1348_v40 = vmax.f32 %v1275_v33, 0.0  ;;  %v7115_v33 = vld [vmem:[#allocation22] ss:$8 sps:$4 sm:$0xff]  }
 0x424   :  { %v1349_v38 = vmax.f32 %v1277_v35, 0.0  ;;  %2586 = vmatpush1.bf16.msra.mxu0 %v7091_v16  ;;  %v7097_v36 = vld [vmem:[#allocation17 + $0x60] ss:$8 sps:$4 sm:$0xff]  }
 0x425   :  { %v1350_v41 = vmax.f32 %v1279_v13, 0.0  ;;  %2587 = vmatprep.subr.bf16.mxu0 %v7096_v19  ;;  %v7117_v13 = vld [vmem:[#allocation22 + $0x4] ss:$8 sps:$4 sm:$0xff]   ;;  %v7114_v19 = vld [vmem:[#allocation17 + $0xb4] ss:$8 sps:$4 sm:$0xff]  }
 0x426   :  { %v1383_v42 = vpack.c.bf16 %v1349_v38, %v1347_v37  ;;  %v7102_v38 = vld [vmem:[#allocation17 + $0x74] ss:$8 sps:$4 sm:$0xff]   ;;  %2994 = vmatprep.subr.bf16.mxu1 %v7117_v13 }
 0x427   :  { %v1384_v43 = vpack.c.bf16 %v1350_v41, %v1348_v40  ;;  %v1282_v44 = vpop.f32.mrb[60].mxu1  ;;  %v7123_v13 = vld [vmem:[#allocation17 + $0xd4] ss:$8 sps:$4 sm:$0xff]  }
 0x428   :  { %v1283_v45 = vadd.f32 %v1282_v44, %v8611_v14  ;;  %v1284_v46 = vpop.f32.mrb[61].mxu1  ;;  %2588 = vmatpush1.bf16.msra.mxu0 %v7094_v25  ;;  %v7124_v44 = vld [vmem:[#allocation22 + $0x10] ss:$8 sps:$4 sm:$0xff]  }
 0x429   :  { %v1285_v47 = vadd.f32 %v1284_v46, %v8614_v39  ;;  %v1286_v48 = vpop.f32.mrb[62].mxu1  ;;  %1763 = vmatprep.mubr.bf16.mxu0 %v1384_v43  ;;  %2589 = vmatprep.subr.bf16.mxu0 %v7099_v28  ;;  %v7112_v25 = vld [vmem:[#allocation17 + $0xb0] ss:$8 sps:$4 sm:$0xff]   ;;  %v7120_v28 = vld [vmem:[#allocation17 + $0xc4] ss:$8 sps:$4 sm:$0xff]  }
 0x42a   :  { %v1287_v49 = vadd.f32 %v1286_v48, %v8611_v14  ;;  %v1288_v50 = vpop.f32.mrb[63].mxu1  ;;  %1764 = vmatmul.mubr.bf16.gmra.mrb[120].mxu0 %v1383_v42  ;;  %v1351_v52 = vmax.f32 %v1283_v45, 0.0  ;;  %v1419_v14 = vld [vmem:[#allocation13] sm:$0x3]  ;;  %v7126_v45 = vld [vmem:[#allocation22 + $0x14] ss:$8 sps:$4 sm:$0xff]  }
 0x42b   :  { %v1289_v51 = vadd.f32 %v1288_v50, %v8614_v39  ;;  %v1352_v54 = vmax.f32 %v1285_v47, 0.0  ;;  %v8681_v39 = vrot.slane %v1419_v14, %v8536_v8  ;;  %v8684_v1 = vrot.slane %v1419_v14, %v8538_v10  ;;  %v7100_v47 = vld [vmem:[#allocation17 + $0x70] ss:$8 sps:$4 sm:$0xff]   ;;  %v7105_v50 = vld [vmem:[#allocation17 + $0x84] ss:$8 sps:$4 sm:$0xff]  }
 0x42c   :  { %v1353_v53 = vmax.f32 %v1287_v49, 0.0  ;;  %2590 = vmatpush1.bf16.msra.mxu0 %v7097_v36 }
 0x42d   :  { %v1354_v55 = vmax.f32 %v1289_v51, 0.0  ;;  %2591 = vmatprep.subr.bf16.mxu0 %v7102_v38 }
 0x42e   :  { %v1385_v56 = vpack.c.bf16 %v1353_v53, %v1351_v52 }
 0x42f   :  { %v1386_v57 = vpack.c.bf16 %v1354_v55, %v1352_v54 }
 0x430   :  { %2592 = vmatpush1.bf16.msra.mxu0 %v7100_v47 }
 0x431   :  { %1773 = vmatprep.mubr.bf16.mxu0 %v1386_v57  ;;  %v7103_v57 = vld [vmem:[#allocation17 + $0x80] ss:$8 sps:$4 sm:$0xff]   ;;  %2593 = vmatprep.subr.bf16.mxu0 %v7105_v50 }
 0x432   :  { %1774 = vmatmul.mubr.bf16.gmra.mrb[124].mxu0 %v1385_v56 }
 0x434   :  { %2594 = vmatpush1.bf16.msra.mxu0 %v7103_v57 }
 0x435   :  { %2595 = vmatprep.subr.bf16.mxu0 %v7108_v59 }
 0x48d   :  { %v1625_v2 = vpop.f32.mrb[64].mxu0 }
 0x48e   :  { %v1626_v6 = vadd.f32 %v1625_v2, %v8681_v39  ;;  %v1627_v7 = vpop.f32.mrb[65].mxu0  ;;  %v7106_v2 = vld [vmem:[#allocation17 + $0x90] ss:$8 sps:$4 sm:$0xff]  }
 0x48f   :  { %v1628_v9 = vadd.f32 %v1627_v7, %v8684_v1  ;;  %v1629_v11 = vpop.f32.mrb[66].mxu0  ;;  %2596 = vmatpush1.bf16.msra.mxu0 %v7106_v2 }
 0x490   :  { %v1630_v12 = vadd.f32 %v1629_v11, %v8681_v39  ;;  %v1631_v15 = vpop.f32.mrb[67].mxu0  ;;  %v1784_v20 = vmax.f32 %v1626_v6, 0.0  ;;  %v7111_v6 = vld [vmem:[#allocation17 + $0xa4] ss:$8 sps:$4 sm:$0xff]  }
 0x491   :  { %v1632_v18 = vadd.f32 %v1631_v15, %v8684_v1  ;;  %v1785_v22 = vmax.f32 %v1628_v9, 0.0  ;;  %2597 = vmatprep.subr.bf16.mxu0 %v7111_v6 }
 0x492   :  { %v1786_v21 = vmax.f32 %v1630_v12, 0.0 }
 0x493   :  { %v1787_v23 = vmax.f32 %v1632_v18, 0.0  ;;  %2598 = vmatpush1.bf16.msra.mxu0 %v7109_v17 }
 0x494   :  { %v1848_v24 = vpack.c.bf16 %v1786_v21, %v1784_v20  ;;  %2599 = vmatprep.subr.bf16.mxu0 %v7114_v19 }
 0x495   :  { %v1635_v26 = vpop.f32.mrb[68].mxu0  ;;  %v1849_v27 = vpack.c.bf16 %v1787_v23, %v1785_v22 }
 0x496   :  { %v1636_v29 = vadd.f32 %v1635_v26, %v8681_v39  ;;  %v1637_v30 = vpop.f32.mrb[69].mxu0 }
 0x497   :  { %v1638_v31 = vadd.f32 %v1637_v30, %v8684_v1  ;;  %v1639_v32 = vpop.f32.mrb[70].mxu0  ;;  %2116 = vmatprep.mubr.bf16.mxu1 %v1849_v27  ;;  %2600 = vmatpush1.bf16.msra.mxu0 %v7112_v25 }
 0x498   :  { %v1640_v34 = vadd.f32 %v1639_v32, %v8681_v39  ;;  %v1641_v35 = vpop.f32.mrb[71].mxu0  ;;  %2117 = vmatmul.mubr.bf16.vlgmr.msra.gmra.mrb[64].mxu1 %v1848_v24  ;;  %v1788_v40 = vmax.f32 %v1636_v29, 0.0  ;;  %2601 = vmatprep.subr.bf16.mxu0 %v7120_v28 }
 0x499   :  { %v1642_v37 = vadd.f32 %v1641_v35, %v8684_v1  ;;  %v1789_v42 = vmax.f32 %v1638_v31, 0.0  ;;  %2995 = vmatpush1.bf16.msra.mxu1 %v7115_v33  ;;  %v7118_v35 = vld [vmem:[#allocation17 + $0xc0] ss:$8 sps:$4 sm:$0xff]  }
 0x49a   :  { %v1790_v41 = vmax.f32 %v1640_v34, 0.0  ;;  %2996 = vmatprep.subr.bf16.mxu1 %v7126_v45 }
 0x49b   :  { %v1791_v43 = vmax.f32 %v1642_v37, 0.0  ;;  %2602 = vmatpush1.bf16.msra.mxu0 %v7118_v35 }
 0x49c   :  { %v1850_v46 = vpack.c.bf16 %v1790_v41, %v1788_v40  ;;  %2603 = vmatprep.subr.bf16.mxu0 %v7123_v13 }
 0x49d   :  { %v1645_v48 = vpop.f32.mrb[72].mxu0  ;;  %v1851_v49 = vpack.c.bf16 %v1791_v43, %v1789_v42  ;;  %2997 = vmatpush1.bf16.msra.mxu1 %v7124_v44  ;;  %v7121_v43 = vld [vmem:[#allocation17 + $0xd0] ss:$8 sps:$4 sm:$0xff]  }
 0x49e   :  { %v1646_v51 = vadd.f32 %v1645_v48, %v8681_v39  ;;  %v1647_v52 = vpop.f32.mrb[73].mxu0 }
 0x49f   :  { %v1648_v53 = vadd.f32 %v1647_v52, %v8684_v1  ;;  %v1649_v54 = vpop.f32.mrb[74].mxu0  ;;  %2126 = vmatprep.mubr.bf16.mxu1 %v1851_v49  ;;  %2604 = vmatpush1.bf16.msra.mxu0 %v7121_v43 }
 0x4a0   :  { %v1650_v55 = vadd.f32 %v1649_v54, %v8681_v39  ;;  %v1651_v56 = vpop.f32.mrb[75].mxu0  ;;  %2127 = vmatmul.mubr.bf16.gmra.mrb[68].mxu1 %v1850_v46  ;;  %v1792_v60 = vmax.f32 %v1646_v51, 0.0  ;;  %v7129_v46 = vld [vmem:[#allocation17 + $0xe4] ss:$8 sps:$4 sm:$0xff]  }
 0x4a1   :  { %v1652_v58 = vadd.f32 %v1651_v56, %v8684_v1  ;;  %v1793_v14 = vmax.f32 %v1648_v53, 0.0  ;;  %v7127_v53 = vld [vmem:[#allocation17 + $0xe0] ss:$8 sps:$4 sm:$0xff]   ;;  %2605 = vmatprep.subr.bf16.mxu0 %v7129_v46 }
 0x4a2   :  { %v1794_v61 = vmax.f32 %v1650_v55, 0.0 }
 0x4a3   :  { %v1795_v62 = vmax.f32 %v1652_v58, 0.0  ;;  %2606 = vmatpush1.bf16.msra.mxu0 %v7127_v53 }
 0x4a4   :  { %v1852_v63 = vpack.c.bf16 %v1794_v61, %v1792_v60 }
 0x4a5   :  { %v1655_v3 = vpop.f32.mrb[76].mxu0  ;;  %v1853_v5 = vpack.c.bf16 %v1795_v62, %v1793_v14 }
 0x4a6   :  { %v1656_v7 = vadd.f32 %v1655_v3, %v8681_v39  ;;  %v1657_v9 = vpop.f32.mrb[77].mxu0 }
 0x4a7   :  { %v1658_v11 = vadd.f32 %v1657_v9, %v8684_v1  ;;  %v1659_v12 = vpop.f32.mrb[78].mxu0  ;;  %2136 = vmatprep.mubr.bf16.mxu1 %v1853_v5 }
 0x4a8   :  { %v1660_v15 = vadd.f32 %v1659_v12, %v8681_v39  ;;  %v1661_v16 = vpop.f32.mrb[79].mxu0  ;;  %2137 = vmatmul.mubr.bf16.gmra.mrb[72].mxu1 %v1852_v63  ;;  %v1796_v20 = vmax.f32 %v1656_v7, 0.0 }
 0x4a9   :  { %v1662_v18 = vadd.f32 %v1661_v16, %v8684_v1  ;;  %v1797_v22 = vmax.f32 %v1658_v11, 0.0 }
 0x4aa   :  { %v1798_v21 = vmax.f32 %v1660_v15, 0.0 }
 0x4ab   :  { %v1799_v23 = vmax.f32 %v1662_v18, 0.0 }
 0x4ac   :  { %v1854_v24 = vpack.c.bf16 %v1798_v21, %v1796_v20 }
 0x4ad   :  { %v1665_v26 = vpop.f32.mrb[80].mxu0  ;;  %v1855_v27 = vpack.c.bf16 %v1799_v23, %v1797_v22 }
 0x4ae   :  { %v1666_v29 = vadd.f32 %v1665_v26, %v8681_v39  ;;  %v1667_v30 = vpop.f32.mrb[81].mxu0 }
 0x4af   :  { %v1668_v31 = vadd.f32 %v1667_v30, %v8684_v1  ;;  %v1669_v32 = vpop.f32.mrb[82].mxu0  ;;  %2146 = vmatprep.mubr.bf16.mxu1 %v1855_v27 }
 0x4b0   :  { %v1670_v33 = vadd.f32 %v1669_v32, %v8681_v39  ;;  %v1671_v34 = vpop.f32.mrb[83].mxu0  ;;  %2147 = vmatmul.mubr.bf16.gmra.mrb[76].mxu1 %v1854_v24  ;;  %v1800_v37 = vmax.f32 %v1666_v29, 0.0 }
 0x4b1   :  { %v1672_v36 = vadd.f32 %v1671_v34, %v8684_v1  ;;  %v1801_v40 = vmax.f32 %v1668_v31, 0.0 }
 0x4b2   :  { %v1802_v38 = vmax.f32 %v1670_v33, 0.0 }
 0x4b3   :  { %v1803_v41 = vmax.f32 %v1672_v36, 0.0 }
 0x4b4   :  { %v1856_v42 = vpack.c.bf16 %v1802_v38, %v1800_v37 }
 0x4b5   :  { %v1675_v44 = vpop.f32.mrb[84].mxu0  ;;  %v1857_v45 = vpack.c.bf16 %v1803_v41, %v1801_v40 }
 0x4b6   :  { %v1676_v47 = vadd.f32 %v1675_v44, %v8681_v39  ;;  %v1677_v48 = vpop.f32.mrb[85].mxu0 }
 0x4b7   :  { %v1678_v49 = vadd.f32 %v1677_v48, %v8684_v1  ;;  %v1679_v50 = vpop.f32.mrb[86].mxu0  ;;  %2156 = vmatprep.mubr.bf16.mxu1 %v1857_v45 }
 0x4b8   :  { %v1680_v51 = vadd.f32 %v1679_v50, %v8681_v39  ;;  %v1681_v52 = vpop.f32.mrb[87].mxu0  ;;  %2157 = vmatmul.mubr.bf16.gmra.mrb[80].mxu1 %v1856_v42  ;;  %v1804_v55 = vmax.f32 %v1676_v47, 0.0 }
 0x4b9   :  { %v1682_v54 = vadd.f32 %v1681_v52, %v8684_v1  ;;  %v1805_v57 = vmax.f32 %v1678_v49, 0.0 }
 0x4ba   :  { %v1806_v56 = vmax.f32 %v1680_v51, 0.0 }
 0x4bb   :  { %v1807_v58 = vmax.f32 %v1682_v54, 0.0 }
 0x4bc   :  { %v1858_v59 = vpack.c.bf16 %v1806_v56, %v1804_v55 }
 0x4bd   :  { %v1685_v60 = vpop.f32.mrb[88].mxu0  ;;  %v1859_v61 = vpack.c.bf16 %v1807_v58, %v1805_v57 }
 0x4be   :  { %v1686_v14 = vadd.f32 %v1685_v60, %v8681_v39  ;;  %v1687_v62 = vpop.f32.mrb[89].mxu0 }
 0x4bf   :  { %v1688_v63 = vadd.f32 %v1687_v62, %v8684_v1  ;;  %v1689_v2 = vpop.f32.mrb[90].mxu0  ;;  %2166 = vmatprep.mubr.bf16.mxu1 %v1859_v61 }
 0x4c0   :  { %v1690_v3 = vadd.f32 %v1689_v2, %v8681_v39  ;;  %v1691_v5 = vpop.f32.mrb[91].mxu0  ;;  %2167 = vmatmul.mubr.bf16.gmra.mrb[84].mxu1 %v1858_v59  ;;  %v1808_v7 = vmax.f32 %v1686_v14, 0.0 }
 0x4c1   :  { %v1692_v6 = vadd.f32 %v1691_v5, %v8684_v1  ;;  %v1809_v11 = vmax.f32 %v1688_v63, 0.0 }
 0x4c2   :  { %v1810_v9 = vmax.f32 %v1690_v3, 0.0 }
 0x4c3   :  { %v1811_v12 = vmax.f32 %v1692_v6, 0.0 }
 0x4c4   :  { %v1860_v15 = vpack.c.bf16 %v1810_v9, %v1808_v7 }
 0x4c5   :  { %v1861_v16 = vpack.c.bf16 %v1811_v12, %v1809_v11  ;;  %v1695_v17 = vpop.f32.mrb[92].mxu0 }
 0x4c6   :  { %v1696_v18 = vadd.f32 %v1695_v17, %v8681_v39  ;;  %v1697_v19 = vpop.f32.mrb[93].mxu0 }
 0x4c7   :  { %v1698_v20 = vadd.f32 %v1697_v19, %v8684_v1  ;;  %v1699_v21 = vpop.f32.mrb[94].mxu0  ;;  %2176 = vmatprep.mubr.bf16.mxu1 %v1861_v16 }
 0x4c8   :  { %v1700_v22 = vadd.f32 %v1699_v21, %v8681_v39  ;;  %v1701_v23 = vpop.f32.mrb[95].mxu0  ;;  %2177 = vmatmul.mubr.bf16.gmra.mrb[88].mxu1 %v1860_v15  ;;  %v1812_v25 = vmax.f32 %v1696_v18, 0.0 }
 0x4c9   :  { %v1702_v24 = vadd.f32 %v1701_v23, %v8684_v1  ;;  %v1813_v27 = vmax.f32 %v1698_v20, 0.0 }
 0x4ca   :  { %v1814_v26 = vmax.f32 %v1700_v22, 0.0 }
 0x4cb   :  { %v1815_v28 = vmax.f32 %v1702_v24, 0.0 }
 0x4cc   :  { %v1862_v29 = vpack.c.bf16 %v1814_v26, %v1812_v25 }
 0x4cd   :  { %v1863_v30 = vpack.c.bf16 %v1815_v28, %v1813_v27  ;;  %v1705_v31 = vpop.f32.mrb[96].mxu0 }
 0x4ce   :  { %v1706_v32 = vadd.f32 %v1705_v31, %v8681_v39  ;;  %v1707_v33 = vpop.f32.mrb[97].mxu0 }
 0x4cf   :  { %v1708_v34 = vadd.f32 %v1707_v33, %v8684_v1  ;;  %v1709_v35 = vpop.f32.mrb[98].mxu0  ;;  %2186 = vmatprep.mubr.bf16.mxu1 %v1863_v30 }
 0x4d0   :  { %v1710_v36 = vadd.f32 %v1709_v35, %v8681_v39  ;;  %v1711_v13 = vpop.f32.mrb[99].mxu0  ;;  %2187 = vmatmul.mubr.bf16.gmra.mrb[92].mxu1 %v1862_v29  ;;  %v1816_v38 = vmax.f32 %v1706_v32, 0.0 }
 0x4d1   :  { %v1712_v37 = vadd.f32 %v1711_v13, %v8684_v1  ;;  %v1817_v41 = vmax.f32 %v1708_v34, 0.0 }
 0x4d2   :  { %v1818_v40 = vmax.f32 %v1710_v36, 0.0  ;;  %v7132_v36 = vld [vmem:[#allocation17 + $0xf4] ss:$8 sps:$4 sm:$0xff]  }
 0x4d3   :  { %v1819_v42 = vmax.f32 %v1712_v37, 0.0  ;;  %v7130_v37 = vld [vmem:[#allocation17 + $0xf0] ss:$8 sps:$4 sm:$0xff]   ;;  %2607 = vmatprep.subr.bf16.mxu0 %v7132_v36 }
 0x4d4   :  { %v1864_v43 = vpack.c.bf16 %v1818_v40, %v1816_v38  ;;  %2608 = vmatpush1.bf16.msra.mxu0 %v7130_v37  ;;  %v7147_v36 = vld [vmem:[#allocation22 + $0x64] ss:$8 sps:$4 sm:$0xff]   ;;  %v7150_v37 = vld [vmem:[#allocation22 + $0x74] ss:$8 sps:$4 sm:$0xff]  }
 0x4d5   :  { %v1865_v44 = vpack.c.bf16 %v1819_v42, %v1817_v41  ;;  %v1715_v45 = vpop.f32.mrb[100].mxu0 }
 0x4d6   :  { %v1716_v46 = vadd.f32 %v1715_v45, %v8681_v39  ;;  %v1717_v47 = vpop.f32.mrb[101].mxu0 }
 0x4d7   :  { %v1718_v48 = vadd.f32 %v1717_v47, %v8684_v1  ;;  %v1719_v49 = vpop.f32.mrb[102].mxu0  ;;  %2196 = vmatprep.mubr.bf16.mxu1 %v1865_v44 }
 0x4d8   :  { %v1720_v50 = vadd.f32 %v1719_v49, %v8681_v39  ;;  %v1721_v51 = vpop.f32.mrb[103].mxu0  ;;  %2197 = vmatmul.mubr.bf16.gmra.mrb[96].mxu1 %v1864_v43  ;;  %v1820_v53 = vmax.f32 %v1716_v46, 0.0  ;;  %v7135_v49 = vld [vmem:[#allocation22 + $0x24] ss:$8 sps:$4 sm:$0xff]  }
 0x4d9   :  { %v1722_v52 = vadd.f32 %v1721_v51, %v8684_v1  ;;  %v1821_v55 = vmax.f32 %v1718_v48, 0.0  ;;  %v7133_v48 = vld [vmem:[#allocation22 + $0x20] ss:$8 sps:$4 sm:$0xff]   ;;  %2998 = vmatprep.subr.bf16.mxu1 %v7135_v49  ;;  %v7159_v49 = vld [vmem:[#allocation20 + $0x24] ss:$8 sps:$4 sm:$0xff]  }
 0x4da   :  { %v1822_v54 = vmax.f32 %v1720_v50, 0.0  ;;  %2999 = vmatpush1.bf16.msra.mxu1 %v7133_v48  ;;  %v7157_v48 = vld [vmem:[#allocation20 + $0x20] ss:$8 sps:$4 sm:$0xff]  }
 0x4db   :  { %v1823_v56 = vmax.f32 %v1722_v52, 0.0 }
 0x4dc   :  { %v1866_v57 = vpack.c.bf16 %v1822_v54, %v1820_v53 }
 0x4dd   :  { %v1867_v58 = vpack.c.bf16 %v1823_v56, %v1821_v55  ;;  %v1725_v59 = vpop.f32.mrb[104].mxu0 }
 0x4de   :  { %v1726_v60 = vadd.f32 %v1725_v59, %v8681_v39  ;;  %v1727_v61 = vpop.f32.mrb[105].mxu0 }
 0x4df   :  { %v1728_v14 = vadd.f32 %v1727_v61, %v8684_v1  ;;  %v1729_v62 = vpop.f32.mrb[106].mxu0  ;;  %2206 = vmatprep.mubr.bf16.mxu1 %v1867_v58 }
 0x4e0   :  { %v1730_v63 = vadd.f32 %v1729_v62, %v8681_v39  ;;  %v1731_v2 = vpop.f32.mrb[107].mxu0  ;;  %2207 = vmatmul.mubr.bf16.gmra.mrb[100].mxu1 %v1866_v57  ;;  %v1824_v5 = vmax.f32 %v1726_v60, 0.0 }
 0x4e1   :  { %v1732_v3 = vadd.f32 %v1731_v2, %v8684_v1  ;;  %v1825_v7 = vmax.f32 %v1728_v14, 0.0 }
 0x4e2   :  { %v1826_v6 = vmax.f32 %v1730_v63, 0.0 }
 0x4e3   :  { %v1827_v9 = vmax.f32 %v1732_v3, 0.0 }
 0x4e4   :  { %v1868_v11 = vpack.c.bf16 %v1826_v6, %v1824_v5 }
 0x4e5   :  { %v1869_v12 = vpack.c.bf16 %v1827_v9, %v1825_v7  ;;  %v1735_v15 = vpop.f32.mrb[108].mxu0 }
 0x4e6   :  { %v1736_v16 = vadd.f32 %v1735_v15, %v8681_v39  ;;  %v1737_v17 = vpop.f32.mrb[109].mxu0 }
 0x4e7   :  { %v1738_v18 = vadd.f32 %v1737_v17, %v8684_v1  ;;  %v1739_v19 = vpop.f32.mrb[110].mxu0  ;;  %2216 = vmatprep.mubr.bf16.mxu1 %v1869_v12 }
 0x4e8   :  { %v1740_v20 = vadd.f32 %v1739_v19, %v8681_v39  ;;  %v1741_v21 = vpop.f32.mrb[111].mxu0  ;;  %2217 = vmatmul.mubr.bf16.gmra.mrb[104].mxu1 %v1868_v11  ;;  %v1828_v23 = vmax.f32 %v1736_v16, 0.0 }
 0x4e9   :  { %v1742_v22 = vadd.f32 %v1741_v21, %v8684_v1  ;;  %v1829_v25 = vmax.f32 %v1738_v18, 0.0  ;;  %v7138_v21 = vld [vmem:[#allocation22 + $0x34] ss:$8 sps:$4 sm:$0xff]  }
 0x4ea   :  { %v1830_v24 = vmax.f32 %v1740_v20, 0.0  ;;  %v7136_v20 = vld [vmem:[#allocation22 + $0x30] ss:$8 sps:$4 sm:$0xff]   ;;  %3000 = vmatprep.subr.bf16.mxu1 %v7138_v21 }
 0x4eb   :  { %v1831_v26 = vmax.f32 %v1742_v22, 0.0  ;;  %3001 = vmatpush1.bf16.msra.mxu1 %v7136_v20 }
 0x4ec   :  { %v1870_v27 = vpack.c.bf16 %v1830_v24, %v1828_v23 }
 0x4ed   :  { %v1871_v28 = vpack.c.bf16 %v1831_v26, %v1829_v25  ;;  %v1745_v29 = vpop.f32.mrb[112].mxu0 }
 0x4ee   :  { %v1746_v30 = vadd.f32 %v1745_v29, %v8681_v39  ;;  %v1747_v31 = vpop.f32.mrb[113].mxu0 }
 0x4ef   :  { %v1748_v32 = vadd.f32 %v1747_v31, %v8684_v1  ;;  %v1749_v33 = vpop.f32.mrb[114].mxu0  ;;  %2226 = vmatprep.mubr.bf16.mxu1 %v1871_v28 }
 0x4f0   :  { %v1750_v34 = vadd.f32 %v1749_v33, %v8681_v39  ;;  %v1751_v35 = vpop.f32.mrb[115].mxu0  ;;  %2227 = vmatmul.mubr.bf16.gmra.mrb[108].mxu1 %v1870_v27  ;;  %v1832_v38 = vmax.f32 %v1746_v30, 0.0  ;;  %v7139_v33 = vld [vmem:[#allocation22 + $0x40] ss:$8 sps:$4 sm:$0xff]  }
 0x4f1   :  { %v1752_v13 = vadd.f32 %v1751_v35, %v8684_v1  ;;  %v1833_v41 = vmax.f32 %v1748_v32, 0.0  ;;  %v7144_v35 = vld [vmem:[#allocation22 + $0x54] ss:$8 sps:$4 sm:$0xff]  }
 0x4f2   :  { %v1834_v40 = vmax.f32 %v1750_v34, 0.0  ;;  %v7141_v34 = vld [vmem:[#allocation22 + $0x44] ss:$8 sps:$4 sm:$0xff]  }
 0x4f3   :  { %v1835_v42 = vmax.f32 %v1752_v13, 0.0  ;;  %3002 = vmatprep.subr.bf16.mxu1 %v7141_v34  ;;  %v7148_v13 = vld [vmem:[#allocation22 + $0x70] ss:$8 sps:$4 sm:$0xff]  }
 0x4f4   :  { %v1872_v43 = vpack.c.bf16 %v1834_v40, %v1832_v38  ;;  %3003 = vmatpush1.bf16.msra.mxu1 %v7139_v33  ;;  %v7431_v38 = vld [vmem:[#allocation2] sm:$0xff]   ;;  %v7432_v40 = vld [vmem:[#allocation2 + $0x8] sm:$0xff]  }
 0x4f5   :  { %v1873_v44 = vpack.c.bf16 %v1835_v42, %v1833_v41  ;;  %v1755_v45 = vpop.f32.mrb[116].mxu0  ;;  %3004 = vmatprep.subr.bf16.mxu1 %v7144_v35  ;;  %v7151_v41 = vld [vmem:[#allocation20] ss:$8 sps:$4 sm:$0xff]   ;;  %v7153_v42 = vld [vmem:[#allocation20 + $0x4] ss:$8 sps:$4 sm:$0xff]  }
 0x4f6   :  { %v1756_v46 = vadd.f32 %v1755_v45, %v8681_v39  ;;  %v1757_v47 = vpop.f32.mrb[117].mxu0  ;;  %v7156_v45 = vld [vmem:[#allocation20 + $0x14] ss:$8 sps:$4 sm:$0xff]  }
 0x4f7   :  { %v1758_v50 = vadd.f32 %v1757_v47, %v8684_v1  ;;  %v1759_v51 = vpop.f32.mrb[118].mxu0  ;;  %2236 = vmatprep.mubr.bf16.mxu1 %v1873_v44  ;;  %v7154_v44 = vld [vmem:[#allocation20 + $0x10] ss:$8 sps:$4 sm:$0xff]   ;;  %v1912_v47 = vld [vmem:[#allocation16] sm:$0x3] }
 0x4f8   :  { %v1760_v52 = vadd.f32 %v1759_v51, %v8681_v39  ;;  %v1761_v53 = vpop.f32.mrb[119].mxu0  ;;  %2237 = vmatmul.mubr.bf16.gmra.mrb[112].mxu1 %v1872_v43  ;;  %v1836_v55 = vmax.f32 %v1756_v46, 0.0  ;;  %v7433_v43 = vld [vmem:[#allocation2 + $0x10] sm:$0xff]   ;;  %v7434_v46 = vld [vmem:[#allocation2 + $0x18] sm:$0xff]   ;;  %v8759_v51 = vrot.slane %v1912_v47, %v8538_v10 }
 0x4f9   :  { %v1762_v54 = vadd.f32 %v1761_v53, %v8684_v1  ;;  %v1837_v57 = vmax.f32 %v1758_v50, 0.0  ;;  %v8756_v50 = vrot.slane %v1912_v47, %v8536_v8  ;;  %v7160_v53 = vld [vmem:[#allocation20 + $0x30] ss:$8 sps:$4 sm:$0xff]  }
 0x4fa   :  { %v1838_v56 = vmax.f32 %v1760_v52, 0.0 }
 0x4fb   :  { %v1839_v58 = vmax.f32 %v1762_v54, 0.0  ;;  %v7162_v54 = vld [vmem:[#allocation20 + $0x34] ss:$8 sps:$4 sm:$0xff]  }
 0x4fc   :  { %v1874_v59 = vpack.c.bf16 %v1838_v56, %v1836_v55 }
 0x4fd   :  { %v1875_v60 = vpack.c.bf16 %v1839_v58, %v1837_v57  ;;  %v1765_v61 = vpop.f32.mrb[120].mxu0  ;;  %v7435_v57 = vld [vmem:[#allocation2 + $0x20] sm:$0xff]  }
 0x4fe   :  { %v1766_v14 = vadd.f32 %v1765_v61, %v8681_v39  ;;  %v1767_v62 = vpop.f32.mrb[121].mxu0 }
 0x4ff   :  { %v1768_v63 = vadd.f32 %v1767_v62, %v8684_v1  ;;  %v1769_v2 = vpop.f32.mrb[122].mxu0  ;;  %2246 = vmatprep.mubr.bf16.mxu1 %v1875_v60  ;;  %v7165_v62 = vld [vmem:[#allocation20 + $0x44] ss:$8 sps:$4 sm:$0xff]  }
 0x500   :  { %v1770_v3 = vadd.f32 %v1769_v2, %v8681_v39  ;;  %v1771_v5 = vpop.f32.mrb[123].mxu0  ;;  %2247 = vmatmul.mubr.bf16.gmra.mrb[116].mxu1 %v1874_v59  ;;  %v1840_v7 = vmax.f32 %v1766_v14, 0.0  ;;  %v7163_v14 = vld [vmem:[#allocation20 + $0x40] ss:$8 sps:$4 sm:$0xff]   ;;  %v7168_v2 = vld [vmem:[#allocation20 + $0x54] ss:$8 sps:$4 sm:$0xff]  }
 0x501   :  { %v1772_v6 = vadd.f32 %v1771_v5, %v8684_v1  ;;  %v1841_v11 = vmax.f32 %v1768_v63, 0.0 }
 0x502   :  { %v1842_v9 = vmax.f32 %v1770_v3, 0.0 }
 0x503   :  { %v1843_v12 = vmax.f32 %v1772_v6, 0.0 }
 0x504   :  { %v1876_v15 = vpack.c.bf16 %v1842_v9, %v1840_v7 }
 0x505   :  { %v1877_v16 = vpack.c.bf16 %v1843_v12, %v1841_v11  ;;  %v1775_v17 = vpop.f32.mrb[124].mxu0  ;;  %v7166_v11 = vld [vmem:[#allocation20 + $0x50] ss:$8 sps:$4 sm:$0xff]  }
 0x506   :  { %v1776_v18 = vadd.f32 %v1775_v17, %v8681_v39  ;;  %v1777_v19 = vpop.f32.mrb[125].mxu0 }
 0x507   :  { %v1778_v22 = vadd.f32 %v1777_v19, %v8684_v1  ;;  %v1779_v23 = vpop.f32.mrb[126].mxu0  ;;  %2256 = vmatprep.mubr.bf16.mxu1 %v1877_v16  ;;  %v7171_v16 = vld [vmem:[#allocation20 + $0x64] ss:$8 sps:$4 sm:$0xff]  }
 0x508   :  { %v1780_v24 = vadd.f32 %v1779_v23, %v8681_v39  ;;  %v1781_v25 = vpop.f32.mrb[127].mxu0  ;;  %2257 = vmatmul.mubr.bf16.gmra.mrb[120].mxu1 %v1876_v15  ;;  %v1844_v27 = vmax.f32 %v1776_v18, 0.0  ;;  %v7142_v39 = vld [vmem:[#allocation22 + $0x50] ss:$8 sps:$4 sm:$0xff]   ;;  %v7436_v19 = vld [vmem:[#allocation2 + $0x28] sm:$0xff]  }
 0x509   :  { %v1782_v26 = vadd.f32 %v1781_v25, %v8684_v1  ;;  %v1845_v29 = vmax.f32 %v1778_v22, 0.0  ;;  %3005 = vmatpush1.bf16.msra.mxu1 %v7142_v39  ;;  %v7145_v1 = vld [vmem:[#allocation22 + $0x60] ss:$8 sps:$4 sm:$0xff]   ;;  %v7177_v39 = vld [vmem:[#allocation20 + $0x84] ss:$8 sps:$4 sm:$0xff]  }
 0x50a   :  { %v1846_v28 = vmax.f32 %v1780_v24, 0.0  ;;  %3006 = vmatprep.subr.bf16.mxu1 %v7147_v36  ;;  %v7169_v24 = vld [vmem:[#allocation20 + $0x60] ss:$8 sps:$4 sm:$0xff]  }
 0x50b   :  { %v1847_v30 = vmax.f32 %v1782_v26, 0.0  ;;  %v7174_v26 = vld [vmem:[#allocation20 + $0x74] ss:$8 sps:$4 sm:$0xff]   ;;  %v7437_v36 = vld [vmem:[#allocation2 + $0x30] sm:$0xff]  }
 0x50c   :  { %v1878_v31 = vpack.c.bf16 %v1846_v28, %v1844_v27 }
 0x50d   :  { %v1879_v32 = vpack.c.bf16 %v1847_v30, %v1845_v29  ;;  %3007 = vmatpush1.bf16.msra.mxu1 %v7145_v1 }
 0x50e   :  { %3008 = vmatprep.subr.bf16.mxu1 %v7150_v37 }
 0x50f   :  { %2266 = vmatprep.mubr.bf16.mxu1 %v1879_v32  ;;  %v7172_v32 = vld [vmem:[#allocation20 + $0x70] ss:$8 sps:$4 sm:$0xff]  }
 0x510   :  { %2267 = vmatmul.mubr.bf16.gmra.mrb[124].mxu1 %v1878_v31 }
 0x511   :  { %3026 = vmatprep.mubr.bf16.mxu1 %v8044_v0  ;;  %3009 = vmatpush1.bf16.msra.mxu1 %v7148_v13 }
 0x512   :  { %3347 = vmatprep.subr.bf16.mxu1 %v7153_v42 }
 0x518   :  { %3027 = vmatmul.mubr.bf16.vlgmr.msra.gmra.mrb[128].mxu1 %v7431_v38 }
 0x519   :  { %3036 = vmatprep.mubr.bf16.mxu1 %v8044_v0  ;;  %3348 = vmatpush1.bf16.msra.mxu1 %v7151_v41  ;;  %v7175_v41 = vld [vmem:[#allocation20 + $0x80] ss:$8 sps:$4 sm:$0xff]  }
 0x51a   :  { %3349 = vmatprep.subr.bf16.mxu1 %v7156_v45 }
 0x51d   :  { %3350 = vmatpush1.bf16.msra.mxu1 %v7154_v44 }
 0x51e   :  { %3351 = vmatprep.subr.bf16.mxu1 %v7159_v49  ;;  %v7178_v49 = vld [vmem:[#allocation20 + $0x90] ss:$8 sps:$4 sm:$0xff]  }
 0x520   :  { %3037 = vmatmul.mubr.bf16.gmra.mrb[132].mxu1 %v7432_v40 }
 0x521   :  { %3046 = vmatprep.mubr.bf16.mxu1 %v8044_v0  ;;  %3352 = vmatpush1.bf16.msra.mxu1 %v7157_v48 }
 0x522   :  { %3353 = vmatprep.subr.bf16.mxu1 %v7162_v54  ;;  %v7183_v54 = vld [vmem:[#allocation20 + $0xa4] ss:$8 sps:$4 sm:$0xff]  }
 0x525   :  { %3354 = vmatpush1.bf16.msra.mxu1 %v7160_v53 }
 0x526   :  { %3355 = vmatprep.subr.bf16.mxu1 %v7165_v62 }
 0x528   :  { %3047 = vmatmul.mubr.bf16.gmra.mrb[136].mxu1 %v7433_v43  ;;  %v7180_v43 = vld [vmem:[#allocation20 + $0x94] ss:$8 sps:$4 sm:$0xff]  }
 0x529   :  { %3056 = vmatprep.mubr.bf16.mxu1 %v8044_v0  ;;  %3356 = vmatpush1.bf16.msra.mxu1 %v7163_v14  ;;  %v7181_v14 = vld [vmem:[#allocation20 + $0xa0] ss:$8 sps:$4 sm:$0xff]  }
 0x52a   :  { %3357 = vmatprep.subr.bf16.mxu1 %v7168_v2 }
 0x52d   :  { %3358 = vmatpush1.bf16.msra.mxu1 %v7166_v11 }
 0x52e   :  { %3359 = vmatprep.subr.bf16.mxu1 %v7171_v16 }
 0x530   :  { %3057 = vmatmul.mubr.bf16.gmra.mrb[140].mxu1 %v7434_v46 }
 0x531   :  { %3066 = vmatprep.mubr.bf16.mxu1 %v8044_v0  ;;  %3360 = vmatpush1.bf16.msra.mxu1 %v7169_v24 }
 0x532   :  { %3361 = vmatprep.subr.bf16.mxu1 %v7174_v26 }
 0x535   :  { %3362 = vmatpush1.bf16.msra.mxu1 %v7172_v32 }
 0x536   :  { %3363 = vmatprep.subr.bf16.mxu1 %v7177_v39 }
 0x538   :  { %3067 = vmatmul.mubr.bf16.gmra.mrb[144].mxu1 %v7435_v57  ;;  %v7438_v57 = vld [vmem:[#allocation2 + $0x38] sm:$0xff]  }
 0x539   :  { %3076 = vmatprep.mubr.bf16.mxu1 %v8044_v0  ;;  %3364 = vmatpush1.bf16.msra.mxu1 %v7175_v41 }
 0x53a   :  { %3365 = vmatprep.subr.bf16.mxu1 %v7180_v43 }
 0x53d   :  { %3366 = vmatpush1.bf16.msra.mxu1 %v7178_v49 }
 0x53e   :  { %3367 = vmatprep.subr.bf16.mxu1 %v7183_v54 }
 0x540   :  { %3077 = vmatmul.mubr.bf16.gmra.mrb[148].mxu1 %v7436_v19 }
 0x541   :  { %3086 = vmatprep.mubr.bf16.mxu1 %v8044_v0  ;;  %3368 = vmatpush1.bf16.msra.mxu1 %v7181_v14 }
 0x548   :  { %3087 = vmatmul.mubr.bf16.gmra.mrb[152].mxu1 %v7437_v36 }
 0x549   :  { %3096 = vmatprep.mubr.bf16.mxu1 %v8044_v0 }
 0x550   :  { %3097 = vmatmul.mubr.bf16.gmra.mrb[156].mxu1 %v7438_v57 }
 0x551   :  { %3106 = vmatprep.mubr.bf16.mxu1 %v8044_v0 }
 0x56b   :  { %v2118_v52 = vpop.f32.mrb[64].mxu1 }
 0x56c   :  { %v2119_v55 = vadd.f32 %v2118_v52, %v8756_v50  ;;  %v2120_v56 = vpop.f32.mrb[65].mxu1 }
 0x56d   :  { %v2121_v58 = vadd.f32 %v2120_v56, %v8759_v51  ;;  %v2122_v59 = vpop.f32.mrb[66].mxu1 }
 0x56e   :  { %v2123_v60 = vadd.f32 %v2122_v59, %v8756_v50  ;;  %v2124_v61 = vpop.f32.mrb[67].mxu1  ;;  %v2277_v3 = vmax.f32 %v2119_v55, 0.0 }
 0x56f   :  { %v2125_v63 = vadd.f32 %v2124_v61, %v8759_v51  ;;  %v2278_v6 = vmax.f32 %v2121_v58, 0.0 }
 0x570   :  { %v2279_v5 = vmax.f32 %v2123_v60, 0.0 }
 0x571   :  { %v2280_v7 = vmax.f32 %v2125_v63, 0.0  ;;  %v7186_v63 = vld [vmem:[#allocation20 + $0xb4] ss:$8 sps:$4 sm:$0xff]  }
 0x572   :  { %v2341_v9 = vpack.c.bf16 %v2279_v5, %v2277_v3  ;;  %3369 = vmatprep.subr.bf16.mxu1 %v7186_v63 }
 0x573   :  { %v2342_v12 = vpack.c.bf16 %v2280_v7, %v2278_v6  ;;  %v2128_v15 = vpop.f32.mrb[68].mxu1 }
 0x574   :  { %v2129_v17 = vadd.f32 %v2128_v15, %v8756_v50  ;;  %v2130_v18 = vpop.f32.mrb[69].mxu1  ;;  %v7189_v15 = vld [vmem:[#allocation20 + $0xc4] ss:$8 sps:$4 sm:$0xff]  }
 0x575   :  { %v2131_v20 = vadd.f32 %v2130_v18, %v8759_v51  ;;  %v2132_v21 = vpop.f32.mrb[70].mxu1  ;;  %2609 = vmatprep.mubr.bf16.mxu0 %v2342_v12  ;;  %v7439_v18 = vld [vmem:[#allocation2 + $0x40] sm:$0xff]  }
 0x576   :  { %v2133_v22 = vadd.f32 %v2132_v21, %v8756_v50  ;;  %v2134_v23 = vpop.f32.mrb[71].mxu1  ;;  %2610 = vmatmul.mubr.bf16.vlgmr.msra.gmra.mrb[128].mxu0 %v2341_v9  ;;  %v2281_v27 = vmax.f32 %v2129_v17, 0.0  ;;  %v7184_v9 = vld [vmem:[#allocation20 + $0xb0] ss:$8 sps:$4 sm:$0xff]   ;;  %3107 = vmatmul.mubr.bf16.gmra.mrb[160].mxu1 %v7439_v18 }
 0x577   :  { %v2135_v25 = vadd.f32 %v2134_v23, %v8759_v51  ;;  %v2282_v29 = vmax.f32 %v2131_v20, 0.0  ;;  %3116 = vmatprep.mubr.bf16.mxu1 %v8044_v0  ;;  %3370 = vmatpush1.bf16.msra.mxu1 %v7184_v9  ;;  %v7187_v23 = vld [vmem:[#allocation20 + $0xc0] ss:$8 sps:$4 sm:$0xff]  }
 0x578   :  { %v2283_v28 = vmax.f32 %v2133_v22, 0.0  ;;  %3371 = vmatprep.subr.bf16.mxu1 %v7189_v15 }
 0x579   :  { %v2284_v30 = vmax.f32 %v2135_v25, 0.0  ;;  %v7192_v25 = vld [vmem:[#allocation20 + $0xd4] ss:$8 sps:$4 sm:$0xff]  }
 0x57a   :  { %v2343_v31 = vpack.c.bf16 %v2283_v28, %v2281_v27 }
 0x57b   :  { %v2344_v33 = vpack.c.bf16 %v2284_v30, %v2282_v29  ;;  %v2138_v34 = vpop.f32.mrb[72].mxu1  ;;  %3372 = vmatpush1.bf16.msra.mxu1 %v7187_v23 }
 0x57c   :  { %v2139_v35 = vadd.f32 %v2138_v34, %v8756_v50  ;;  %v2140_v1 = vpop.f32.mrb[73].mxu1  ;;  %3373 = vmatprep.subr.bf16.mxu1 %v7192_v25  ;;  %v7195_v34 = vld [vmem:[#allocation20 + $0xe4] ss:$8 sps:$4 sm:$0xff]   ;;  %v7443_v25 = vld [vmem:[#allocation2 + $0x60] sm:$0xff]  }
 0x57d   :  { %v2141_v13 = vadd.f32 %v2140_v1, %v8759_v51  ;;  %v2142_v37 = vpop.f32.mrb[74].mxu1  ;;  %2619 = vmatprep.mubr.bf16.mxu0 %v2344_v33  ;;  %v7440_v1 = vld [vmem:[#allocation2 + $0x48] sm:$0xff]  }
 0x57e   :  { %v2143_v38 = vadd.f32 %v2142_v37, %v8756_v50  ;;  %v2144_v40 = vpop.f32.mrb[75].mxu1  ;;  %2620 = vmatmul.mubr.bf16.gmra.mrb[132].mxu0 %v2343_v31  ;;  %v2285_v44 = vmax.f32 %v2139_v35, 0.0  ;;  %v7190_v31 = vld [vmem:[#allocation20 + $0xd0] ss:$8 sps:$4 sm:$0xff]   ;;  %3117 = vmatmul.mubr.bf16.gmra.mrb[164].mxu1 %v7440_v1 }
 0x57f   :  { %v2145_v42 = vadd.f32 %v2144_v40, %v8759_v51  ;;  %v2286_v46 = vmax.f32 %v2141_v13, 0.0  ;;  %3126 = vmatprep.mubr.bf16.mxu1 %v8044_v0  ;;  %3374 = vmatpush1.bf16.msra.mxu1 %v7190_v31  ;;  %v7193_v40 = vld [vmem:[#allocation20 + $0xe0] ss:$8 sps:$4 sm:$0xff]  }
 0x580   :  { %v2287_v45 = vmax.f32 %v2143_v38, 0.0  ;;  %3375 = vmatprep.subr.bf16.mxu1 %v7195_v34 }
 0x581   :  { %v2288_v47 = vmax.f32 %v2145_v42, 0.0 }
 0x582   :  { %v2345_v48 = vpack.c.bf16 %v2287_v45, %v2285_v44 }
 0x583   :  { %v2346_v52 = vpack.c.bf16 %v2288_v47, %v2286_v46  ;;  %v2148_v53 = vpop.f32.mrb[76].mxu1  ;;  %3376 = vmatpush1.bf16.msra.mxu1 %v7193_v40 }
 0x584   :  { %v2149_v55 = vadd.f32 %v2148_v53, %v8756_v50  ;;  %v2150_v56 = vpop.f32.mrb[77].mxu1  ;;  %v7441_v53 = vld [vmem:[#allocation2 + $0x50] sm:$0xff]  }
 0x585   :  { %v2151_v58 = vadd.f32 %v2150_v56, %v8759_v51  ;;  %v2152_v59 = vpop.f32.mrb[78].mxu1  ;;  %2629 = vmatprep.mubr.bf16.mxu0 %v2346_v52 }
 0x586   :  { %v2153_v60 = vadd.f32 %v2152_v59, %v8756_v50  ;;  %v2154_v61 = vpop.f32.mrb[79].mxu1  ;;  %2630 = vmatmul.mubr.bf16.gmra.mrb[136].mxu0 %v2345_v48  ;;  %v2289_v2 = vmax.f32 %v2149_v55, 0.0  ;;  %3127 = vmatmul.mubr.bf16.gmra.mrb[168].mxu1 %v7441_v53 }
 0x587   :  { %v2155_v62 = vadd.f32 %v2154_v61, %v8759_v51  ;;  %v2290_v5 = vmax.f32 %v2151_v58, 0.0  ;;  %3136 = vmatprep.mubr.bf16.mxu1 %v8044_v0 }
 0x588   :  { %v2291_v3 = vmax.f32 %v2153_v60, 0.0 }
 0x589   :  { %v2292_v6 = vmax.f32 %v2155_v62, 0.0 }
 0x58a   :  { %v2347_v7 = vpack.c.bf16 %v2291_v3, %v2289_v2 }
 0x58b   :  { %v2348_v11 = vpack.c.bf16 %v2292_v6, %v2290_v5  ;;  %v2158_v12 = vpop.f32.mrb[80].mxu1  ;;  %v7442_v6 = vld [vmem:[#allocation2 + $0x58] sm:$0xff]  }
 0x58c   :  { %v2159_v16 = vadd.f32 %v2158_v12, %v8756_v50  ;;  %v2160_v17 = vpop.f32.mrb[81].mxu1 }
 0x58d   :  { %v2161_v19 = vadd.f32 %v2160_v17, %v8759_v51  ;;  %v2162_v20 = vpop.f32.mrb[82].mxu1  ;;  %2639 = vmatprep.mubr.bf16.mxu0 %v2348_v11 }
 0x58e   :  { %v2163_v21 = vadd.f32 %v2162_v20, %v8756_v50  ;;  %v2164_v22 = vpop.f32.mrb[83].mxu1  ;;  %2640 = vmatmul.mubr.bf16.gmra.mrb[140].mxu0 %v2347_v7  ;;  %v2293_v26 = vmax.f32 %v2159_v16, 0.0  ;;  %3137 = vmatmul.mubr.bf16.gmra.mrb[172].mxu1 %v7442_v6 }
 0x58f   :  { %v2165_v24 = vadd.f32 %v2164_v22, %v8759_v51  ;;  %v2294_v28 = vmax.f32 %v2161_v19, 0.0  ;;  %3146 = vmatprep.mubr.bf16.mxu1 %v8044_v0 }
 0x590   :  { %v2295_v27 = vmax.f32 %v2163_v21, 0.0 }
 0x591   :  { %v2296_v29 = vmax.f32 %v2165_v24, 0.0 }
 0x592   :  { %v2349_v30 = vpack.c.bf16 %v2295_v27, %v2293_v26 }
 0x593   :  { %v2350_v32 = vpack.c.bf16 %v2296_v29, %v2294_v28  ;;  %v2168_v33 = vpop.f32.mrb[84].mxu1 }
 0x594   :  { %v2169_v39 = vadd.f32 %v2168_v33, %v8756_v50  ;;  %v2170_v35 = vpop.f32.mrb[85].mxu1 }
 0x595   :  { %v2171_v36 = vadd.f32 %v2170_v35, %v8759_v51  ;;  %v2172_v13 = vpop.f32.mrb[86].mxu1  ;;  %2649 = vmatprep.mubr.bf16.mxu0 %v2350_v32 }
 0x596   :  { %v2173_v37 = vadd.f32 %v2172_v13, %v8756_v50  ;;  %v2174_v38 = vpop.f32.mrb[87].mxu1  ;;  %2650 = vmatmul.mubr.bf16.gmra.mrb[144].mxu0 %v2349_v30  ;;  %v2297_v42 = vmax.f32 %v2169_v39, 0.0  ;;  %3147 = vmatmul.mubr.bf16.gmra.mrb[176].mxu1 %v7443_v25 }
 0x597   :  { %v2175_v41 = vadd.f32 %v2174_v38, %v8759_v51  ;;  %v2298_v44 = vmax.f32 %v2171_v36, 0.0  ;;  %3156 = vmatprep.mubr.bf16.mxu1 %v8044_v0 }
 0x598   :  { %v2299_v43 = vmax.f32 %v2173_v37, 0.0  ;;  %v7444_v37 = vld [vmem:[#allocation2 + $0x68] sm:$0xff]  }
 0x599   :  { %v2300_v45 = vmax.f32 %v2175_v41, 0.0 }
 0x59a   :  { %v2351_v46 = vpack.c.bf16 %v2299_v43, %v2297_v42 }
 0x59b   :  { %v2352_v47 = vpack.c.bf16 %v2300_v45, %v2298_v44  ;;  %v2178_v48 = vpop.f32.mrb[88].mxu1 }
 0x59c   :  { %v2179_v49 = vadd.f32 %v2178_v48, %v8756_v50  ;;  %v2180_v52 = vpop.f32.mrb[89].mxu1 }
 0x59d   :  { %v2181_v54 = vadd.f32 %v2180_v52, %v8759_v51  ;;  %v2182_v55 = vpop.f32.mrb[90].mxu1  ;;  %2659 = vmatprep.mubr.bf16.mxu0 %v2352_v47 }
 0x59e   :  { %v2183_v56 = vadd.f32 %v2182_v55, %v8756_v50  ;;  %v2184_v57 = vpop.f32.mrb[91].mxu1  ;;  %2660 = vmatmul.mubr.bf16.gmra.mrb[148].mxu0 %v2351_v46  ;;  %v2301_v59 = vmax.f32 %v2179_v49, 0.0  ;;  %3157 = vmatmul.mubr.bf16.gmra.mrb[180].mxu1 %v7444_v37  ;;  %v7445_v55 = vld [vmem:[#allocation2 + $0x70] sm:$0xff]  }
 0x59f   :  { %v2185_v58 = vadd.f32 %v2184_v57, %v8759_v51  ;;  %v2302_v61 = vmax.f32 %v2181_v54, 0.0  ;;  %3166 = vmatprep.mubr.bf16.mxu1 %v8044_v0 }
 0x5a0   :  { %v2303_v60 = vmax.f32 %v2183_v56, 0.0 }
 0x5a1   :  { %v2304_v14 = vmax.f32 %v2185_v58, 0.0 }
 0x5a2   :  { %v2353_v62 = vpack.c.bf16 %v2303_v60, %v2301_v59 }
 0x5a3   :  { %v2354_v63 = vpack.c.bf16 %v2304_v14, %v2302_v61  ;;  %v2188_v2 = vpop.f32.mrb[92].mxu1 }
 0x5a4   :  { %v2189_v3 = vadd.f32 %v2188_v2, %v8756_v50  ;;  %v2190_v5 = vpop.f32.mrb[93].mxu1 }
 0x5a5   :  { %v2191_v7 = vadd.f32 %v2190_v5, %v8759_v51  ;;  %v2192_v9 = vpop.f32.mrb[94].mxu1  ;;  %2669 = vmatprep.mubr.bf16.mxu0 %v2354_v63 }
 0x5a6   :  { %v2193_v11 = vadd.f32 %v2192_v9, %v8756_v50  ;;  %v2194_v12 = vpop.f32.mrb[95].mxu1  ;;  %2670 = vmatmul.mubr.bf16.gmra.mrb[152].mxu0 %v2353_v62  ;;  %v2305_v16 = vmax.f32 %v2189_v3, 0.0  ;;  %3167 = vmatmul.mubr.bf16.gmra.mrb[184].mxu1 %v7445_v55  ;;  %v7446_v9 = vld [vmem:[#allocation2 + $0x78] sm:$0xff]  }
 0x5a7   :  { %v2195_v15 = vadd.f32 %v2194_v12, %v8759_v51  ;;  %v2306_v18 = vmax.f32 %v2191_v7, 0.0  ;;  %3176 = vmatprep.mubr.bf16.mxu1 %v8044_v0 }
 0x5a8   :  { %v2307_v17 = vmax.f32 %v2193_v11, 0.0 }
 0x5a9   :  { %v2308_v19 = vmax.f32 %v2195_v15, 0.0 }
 0x5aa   :  { %v2355_v20 = vpack.c.bf16 %v2307_v17, %v2305_v16 }
 0x5ab   :  { %v2356_v21 = vpack.c.bf16 %v2308_v19, %v2306_v18  ;;  %v2198_v22 = vpop.f32.mrb[96].mxu1 }
 0x5ac   :  { %v2199_v23 = vadd.f32 %v2198_v22, %v8756_v50  ;;  %v2200_v24 = vpop.f32.mrb[97].mxu1 }
 0x5ad   :  { %v2201_v26 = vadd.f32 %v2200_v24, %v8759_v51  ;;  %v2202_v27 = vpop.f32.mrb[98].mxu1  ;;  %2679 = vmatprep.mubr.bf16.mxu0 %v2356_v21 }
 0x5ae   :  { %v2203_v28 = vadd.f32 %v2202_v27, %v8756_v50  ;;  %v2204_v29 = vpop.f32.mrb[99].mxu1  ;;  %2680 = vmatmul.mubr.bf16.gmra.mrb[156].mxu0 %v2355_v20  ;;  %v2309_v31 = vmax.f32 %v2199_v23, 0.0  ;;  %3177 = vmatmul.mubr.bf16.gmra.mrb[188].mxu1 %v7446_v9 }
 0x5af   :  { %v2205_v30 = vadd.f32 %v2204_v29, %v8759_v51  ;;  %v2310_v33 = vmax.f32 %v2201_v26, 0.0 }
 0x5b0   :  { %v2311_v32 = vmax.f32 %v2203_v28, 0.0 }
 0x5b1   :  { %v2312_v34 = vmax.f32 %v2205_v30, 0.0  ;;  %v7198_v30 = vld [vmem:[#allocation20 + $0xf4] ss:$8 sps:$4 sm:$0xff]  }
 0x5b2   :  { %v2357_v39 = vpack.c.bf16 %v2311_v32, %v2309_v31  ;;  %v7196_v32 = vld [vmem:[#allocation20 + $0xf0] ss:$8 sps:$4 sm:$0xff]   ;;  %3377 = vmatprep.subr.bf16.mxu1 %v7198_v30 }
 0x5b3   :  { %v2358_v35 = vpack.c.bf16 %v2312_v34, %v2310_v33  ;;  %v2208_v1 = vpop.f32.mrb[100].mxu1  ;;  %3378 = vmatpush1.bf16.msra.mxu1 %v7196_v32  ;;  %v8845_v30 = vld [vmem:[#allocation25 + $0x30] ss:$8 sps:$4 sm:$0xff]  }
 0x5b4   :  { %v2209_v36 = vadd.f32 %v2208_v1, %v8756_v50  ;;  %v2210_v13 = vpop.f32.mrb[101].mxu1 }
 0x5b5   :  { %v2211_v38 = vadd.f32 %v2210_v13, %v8759_v51  ;;  %v2212_v40 = vpop.f32.mrb[102].mxu1  ;;  %2689 = vmatprep.mubr.bf16.mxu0 %v2358_v35 }
 0x5b6   :  { %v2213_v41 = vadd.f32 %v2212_v40, %v8756_v50  ;;  %v2214_v42 = vpop.f32.mrb[103].mxu1  ;;  %2690 = vmatmul.mubr.bf16.gmra.mrb[160].mxu0 %v2357_v39  ;;  %v2313_v44 = vmax.f32 %v2209_v36, 0.0 }
 0x5b7   :  { %v2215_v43 = vadd.f32 %v2214_v42, %v8759_v51  ;;  %v2314_v46 = vmax.f32 %v2211_v38, 0.0 }
 0x5b8   :  { %v2315_v45 = vmax.f32 %v2213_v41, 0.0 }
 0x5b9   :  { %v2316_v47 = vmax.f32 %v2215_v43, 0.0 }
 0x5ba   :  { %v2359_v48 = vpack.c.bf16 %v2315_v45, %v2313_v44 }
 0x5bb   :  { %v2360_v49 = vpack.c.bf16 %v2316_v47, %v2314_v46  ;;  %v2218_v52 = vpop.f32.mrb[104].mxu1 }
 0x5bc   :  { %v2219_v53 = vadd.f32 %v2218_v52, %v8756_v50  ;;  %v2220_v54 = vpop.f32.mrb[105].mxu1 }
 0x5bd   :  { %v2221_v56 = vadd.f32 %v2220_v54, %v8759_v51  ;;  %v2222_v57 = vpop.f32.mrb[106].mxu1  ;;  %2699 = vmatprep.mubr.bf16.mxu0 %v2360_v49 }
 0x5be   :  { %v2223_v58 = vadd.f32 %v2222_v57, %v8756_v50  ;;  %v2224_v59 = vpop.f32.mrb[107].mxu1  ;;  %2700 = vmatmul.mubr.bf16.gmra.mrb[164].mxu0 %v2359_v48  ;;  %v2317_v61 = vmax.f32 %v2219_v53, 0.0 }
 0x5bf   :  { %v2225_v60 = vadd.f32 %v2224_v59, %v8759_v51  ;;  %v2318_v62 = vmax.f32 %v2221_v56, 0.0 }
 0x5c0   :  { %v2319_v14 = vmax.f32 %v2223_v58, 0.0 }
 0x5c1   :  { %v2320_v63 = vmax.f32 %v2225_v60, 0.0 }
 0x5c2   :  { %v2361_v2 = vpack.c.bf16 %v2319_v14, %v2317_v61 }
 0x5c3   :  { %v2362_v3 = vpack.c.bf16 %v2320_v63, %v2318_v62  ;;  %v2228_v5 = vpop.f32.mrb[108].mxu1 }
 0x5c4   :  { %v2229_v6 = vadd.f32 %v2228_v5, %v8756_v50  ;;  %v2230_v7 = vpop.f32.mrb[109].mxu1 }
 0x5c5   :  { %v2231_v0 = vadd.f32 %v2230_v7, %v8759_v51  ;;  %v2232_v11 = vpop.f32.mrb[110].mxu1  ;;  %2709 = vmatprep.mubr.bf16.mxu0 %v2362_v3 }
 0x5c6   :  { %v2233_v12 = vadd.f32 %v2232_v11, %v8756_v50  ;;  %v2234_v15 = vpop.f32.mrb[111].mxu1  ;;  %2710 = vmatmul.mubr.bf16.gmra.mrb[168].mxu0 %v2361_v2  ;;  %v2321_v17 = vmax.f32 %v2229_v6, 0.0 }
 0x5c7   :  { %v2235_v16 = vadd.f32 %v2234_v15, %v8759_v51  ;;  %v2322_v19 = vmax.f32 %v2231_v0, 0.0 }
 0x5c8   :  { %v2323_v18 = vmax.f32 %v2233_v12, 0.0 }
 0x5c9   :  { %v2324_v20 = vmax.f32 %v2235_v16, 0.0 }
 0x5ca   :  { %v2363_v21 = vpack.c.bf16 %v2323_v18, %v2321_v17 }
 0x5cb   :  { %v2364_v22 = vpack.c.bf16 %v2324_v20, %v2322_v19  ;;  %v2238_v23 = vpop.f32.mrb[112].mxu1 }
 0x5cc   :  { %v2239_v24 = vadd.f32 %v2238_v23, %v8756_v50  ;;  %v2240_v25 = vpop.f32.mrb[113].mxu1  ;;  %v7201_v23 = vld [vmem:[#allocation25 + $0x4] ss:$8 sps:$4 sm:$0xff]  }
 0x5cd   :  { %v2241_v26 = vadd.f32 %v2240_v25, %v8759_v51  ;;  %v2242_v27 = vpop.f32.mrb[114].mxu1  ;;  %2719 = vmatprep.mubr.bf16.mxu0 %v2364_v22  ;;  %v7199_v22 = vld [vmem:[#allocation25] ss:$8 sps:$4 sm:$0xff]   ;;  %3916 = vmatprep.subr.bf16.mxu0 %v7201_v23  ;;  %v7204_v25 = vld [vmem:[#allocation25 + $0x14] ss:$8 sps:$4 sm:$0xff]  }
 0x5ce   :  { %v2243_v28 = vadd.f32 %v2242_v27, %v8756_v50  ;;  %v2244_v29 = vpop.f32.mrb[115].mxu1  ;;  %2720 = vmatmul.mubr.bf16.gmra.mrb[172].mxu0 %v2363_v21  ;;  %v2325_v33 = vmax.f32 %v2239_v24, 0.0  ;;  %6706 = vmatprep.subr.bf16.mxu1 %v7201_v23  ;;  %v7202_v24 = vld [vmem:[#allocation25 + $0x10] ss:$8 sps:$4 sm:$0xff]  }
 0x5cf   :  { %v2245_v31 = vadd.f32 %v2244_v29, %v8759_v51  ;;  %v2326_v39 = vmax.f32 %v2241_v26, 0.0  ;;  %3917 = vmatpush1.bf16.msra.mxu0 %v7199_v22  ;;  %v8836_v26 = vld [vmem:[#allocation25 + $0x20] ss:$8 sps:$4 sm:$0xff]  }
 0x5d0   :  { %v2327_v34 = vmax.f32 %v2243_v28, 0.0  ;;  %3918 = vmatprep.subr.bf16.mxu0 %v7204_v25 }
 0x5d1   :  { %v2328_v35 = vmax.f32 %v2245_v31, 0.0  ;;  %v8847_v31 = vld [vmem:[#allocation25 + $0x34] ss:$8 sps:$4 sm:$0xff]  }
 0x5d2   :  { %v2365_v1 = vpack.c.bf16 %v2327_v34, %v2325_v33 }
 0x5d3   :  { %v2366_v36 = vpack.c.bf16 %v2328_v35, %v2326_v39  ;;  %v2248_v13 = vpop.f32.mrb[116].mxu1  ;;  %3919 = vmatpush1.bf16.msra.mxu0 %v7202_v24 }
 0x5d4   :  { %v2249_v37 = vadd.f32 %v2248_v13, %v8756_v50  ;;  %v2250_v38 = vpop.f32.mrb[117].mxu1  ;;  %v8856_v13 = vld [vmem:[#allocation25 + $0x44] ss:$8 sps:$4 sm:$0xff]  }
 0x5d5   :  { %v2251_v40 = vadd.f32 %v2250_v38, %v8759_v51  ;;  %v2252_v41 = vpop.f32.mrb[118].mxu1  ;;  %2729 = vmatprep.mubr.bf16.mxu0 %v2366_v36  ;;  %v8854_v36 = vld [vmem:[#allocation25 + $0x40] ss:$8 sps:$4 sm:$0xff]   ;;  %v8859_v38 = vld [vmem:[#allocation25 + $0x54] ss:$8 sps:$4 sm:$0xff]  }
 0x5d6   :  { %v2253_v42 = vadd.f32 %v2252_v41, %v8756_v50  ;;  %v2254_v43 = vpop.f32.mrb[119].mxu1  ;;  %2730 = vmatmul.mubr.bf16.gmra.mrb[176].mxu0 %v2365_v1  ;;  %v2329_v45 = vmax.f32 %v2249_v37, 0.0 }
 0x5d7   :  { %v2255_v44 = vadd.f32 %v2254_v43, %v8759_v51  ;;  %v2330_v47 = vmax.f32 %v2251_v40, 0.0 }
 0x5d8   :  { %v2331_v46 = vmax.f32 %v2253_v42, 0.0 }
 0x5d9   :  { %v2332_v48 = vmax.f32 %v2255_v44, 0.0 }
 0x5da   :  { %v2367_v49 = vpack.c.bf16 %v2331_v46, %v2329_v45  ;;  %v8863_v45 = vld [vmem:[#allocation25 + $0x50] ss:$8 sps:$4 sm:$0xff]  }
 0x5db   :  { %v2368_v52 = vpack.c.bf16 %v2332_v48, %v2330_v47  ;;  %v2258_v53 = vpop.f32.mrb[120].mxu1  ;;  %v8866_v48 = vld [vmem:[#allocation25 + $0x64] ss:$8 sps:$4 sm:$0xff]  }
 0x5dc   :  { %v2259_v54 = vadd.f32 %v2258_v53, %v8756_v50  ;;  %v2260_v55 = vpop.f32.mrb[121].mxu1 }
 0x5dd   :  { %v2261_v56 = vadd.f32 %v2260_v55, %v8759_v51  ;;  %v2262_v57 = vpop.f32.mrb[122].mxu1  ;;  %2739 = vmatprep.mubr.bf16.mxu0 %v2368_v52 }
 0x5de   :  { %v2263_v58 = vadd.f32 %v2262_v57, %v8756_v50  ;;  %v2264_v59 = vpop.f32.mrb[123].mxu1  ;;  %2740 = vmatmul.mubr.bf16.gmra.mrb[180].mxu0 %v2367_v49  ;;  %v2333_v61 = vmax.f32 %v2259_v54, 0.0  ;;  %v8872_v57 = vld [vmem:[#allocation25 + $0x60] ss:$8 sps:$4 sm:$0xff]  }
 0x5df   :  { %v2265_v60 = vadd.f32 %v2264_v59, %v8759_v51  ;;  %v2334_v62 = vmax.f32 %v2261_v56, 0.0  ;;  %v8876_v59 = vld [vmem:[#allocation25 + $0x74] ss:$8 sps:$4 sm:$0xff]  }
 0x5e0   :  { %v2335_v14 = vmax.f32 %v2263_v58, 0.0 }
 0x5e1   :  { %v2336_v63 = vmax.f32 %v2265_v60, 0.0 }
 0x5e2   :  { %v2369_v2 = vpack.c.bf16 %v2335_v14, %v2333_v61 }
 0x5e3   :  { %v2370_v3 = vpack.c.bf16 %v2336_v63, %v2334_v62  ;;  %v2268_v5 = vpop.f32.mrb[124].mxu1 }
 0x5e4   :  { %v2269_v6 = vadd.f32 %v2268_v5, %v8756_v50  ;;  %v2270_v7 = vpop.f32.mrb[125].mxu1 }
 0x5e5   :  { %v2271_v9 = vadd.f32 %v2270_v7, %v8759_v51  ;;  %v2272_v0 = vpop.f32.mrb[126].mxu1  ;;  %2749 = vmatprep.mubr.bf16.mxu0 %v2370_v3 }
 0x5e6   :  { %v2273_v11 = vadd.f32 %v2272_v0, %v8756_v50  ;;  %v2274_v12 = vpop.f32.mrb[127].mxu1  ;;  %2750 = vmatmul.mubr.bf16.gmra.mrb[184].mxu0 %v2369_v2  ;;  %v2337_v16 = vmax.f32 %v2269_v6, 0.0  ;;  %v2405_v50 = vld [vmem:[#allocation19] sm:$0x3]  ;;  %v8879_v2 = vld [vmem:[#allocation25 + $0x70] ss:$8 sps:$4 sm:$0xff]  }
 0x5e7   :  { %v2275_v15 = vadd.f32 %v2274_v12, %v8759_v51  ;;  %v2338_v18 = vmax.f32 %v2271_v9, 0.0  ;;  %v7207_v51 = vld [vmem:[#allocation25 + $0x24] ss:$8 sps:$4 sm:$0xff]   ;;  %v8839_v27 = vrot.slane %v2405_v50, %v8536_v8  ;;  %v8842_v28 = vrot.slane %v2405_v50, %v8538_v10 }
 0x5e8   :  { %v2339_v17 = vmax.f32 %v2273_v11, 0.0  ;;  %3920 = vmatprep.subr.bf16.mxu0 %v7207_v51  ;;  %v8882_v6 = vld [vmem:[#allocation25 + $0x84] ss:$8 sps:$4 sm:$0xff]  }
 0x5e9   :  { %v2340_v19 = vmax.f32 %v2275_v15, 0.0  ;;  %3921 = vmatpush1.bf16.msra.mxu0 %v8836_v26 }
 0x5ea   :  { %v2371_v20 = vpack.c.bf16 %v2339_v17, %v2337_v16  ;;  %3922 = vmatprep.subr.bf16.mxu0 %v8847_v31  ;;  %v8888_v16 = vld [vmem:[#allocation25 + $0x80] ss:$8 sps:$4 sm:$0xff]  }
 0x5eb   :  { %v2372_v21 = vpack.c.bf16 %v2340_v19, %v2338_v18  ;;  %v8893_v18 = vld [vmem:[#allocation25 + $0x94] ss:$8 sps:$4 sm:$0xff]  }
 0x5ed   :  { %2759 = vmatprep.mubr.bf16.mxu0 %v2372_v21  ;;  %3923 = vmatpush1.bf16.msra.mxu0 %v8845_v30 }
 0x5ee   :  { %2760 = vmatmul.mubr.bf16.gmra.mrb[188].mxu0 %v2371_v20  ;;  %3924 = vmatprep.subr.bf16.mxu0 %v8856_v13 }
 0x5f1   :  { %3925 = vmatpush1.bf16.msra.mxu0 %v8854_v36 }
 0x5f2   :  { %3926 = vmatprep.subr.bf16.mxu0 %v8859_v38 }
 0x5f5   :  { %3927 = vmatpush1.bf16.msra.mxu0 %v8863_v45 }
 0x5f6   :  { %3928 = vmatprep.subr.bf16.mxu0 %v8866_v48 }
 0x5f9   :  { %3929 = vmatpush1.bf16.msra.mxu0 %v8872_v57 }
 0x5fa   :  { %3930 = vmatprep.subr.bf16.mxu0 %v8876_v59 }
 0x5fd   :  { %3931 = vmatpush1.bf16.msra.mxu0 %v8879_v2 }
 0x5fe   :  { %3932 = vmatprep.subr.bf16.mxu0 %v8882_v6 }
 0x601   :  { %3933 = vmatpush1.bf16.msra.mxu0 %v8888_v16 }
 0x602   :  { %3934 = vmatprep.subr.bf16.mxu0 %v8893_v18 }
 0x649   :  { %v2611_v29 = vpop.f32.mrb[128].mxu0 }
 0x64a   :  { %v2612_v32 = vadd.f32 %v2611_v29, %v8839_v27  ;;  %v2613_v33 = vpop.f32.mrb[129].mxu0 }
 0x64b   :  { %v2614_v34 = vadd.f32 %v2613_v33, %v8842_v28  ;;  %v2615_v39 = vpop.f32.mrb[130].mxu0 }
 0x64c   :  { %v2616_v35 = vadd.f32 %v2615_v39, %v8839_v27  ;;  %v2617_v1 = vpop.f32.mrb[131].mxu0  ;;  %v2770_v40 = vmax.f32 %v2612_v32, 0.0  ;;  %v8908_v39 = vld [vmem:[#allocation25 + $0xa0] ss:$8 sps:$4 sm:$0xff]  }
 0x64d   :  { %v2618_v37 = vadd.f32 %v2617_v1, %v8842_v28  ;;  %v2771_v42 = vmax.f32 %v2614_v34, 0.0 }
 0x64e   :  { %v2772_v41 = vmax.f32 %v2616_v35, 0.0  ;;  %v8913_v35 = vld [vmem:[#allocation25 + $0xb4] ss:$8 sps:$4 sm:$0xff]  }
 0x64f   :  { %v2773_v43 = vmax.f32 %v2618_v37, 0.0 }
 0x650   :  { %v2834_v44 = vpack.c.bf16 %v2772_v41, %v2770_v40 }
 0x651   :  { %v2835_v46 = vpack.c.bf16 %v2773_v43, %v2771_v42  ;;  %v2621_v47 = vpop.f32.mrb[132].mxu0  ;;  %v8917_v42 = vld [vmem:[#allocation25 + $0xb0] ss:$8 sps:$4 sm:$0xff]  }
 0x652   :  { %v2622_v49 = vadd.f32 %v2621_v47, %v8839_v27  ;;  %v2623_v52 = vpop.f32.mrb[133].mxu0 }
 0x653   :  { %v2624_v53 = vadd.f32 %v2623_v52, %v8842_v28  ;;  %v2625_v54 = vpop.f32.mrb[134].mxu0  ;;  %3379 = vmatprep.mubr.bf16.mxu1 %v2835_v46 }
 0x654   :  { %v2626_v55 = vadd.f32 %v2625_v54, %v8839_v27  ;;  %v2627_v56 = vpop.f32.mrb[135].mxu0  ;;  %3380 = vmatmul.mubr.bf16.vlgmr.msra.gmra.mrb[128].mxu1 %v2834_v44  ;;  %v2774_v60 = vmax.f32 %v2622_v49, 0.0  ;;  %v8928_v54 = vld [vmem:[#allocation25 + $0xc0] ss:$8 sps:$4 sm:$0xff]  }
 0x655   :  { %v2628_v58 = vadd.f32 %v2627_v56, %v8842_v28  ;;  %6722 = vmatpush1.bf16.msra.mxu1 %v7199_v22  ;;  %v2775_v14 = vmax.f32 %v2624_v53, 0.0 }
 0x656   :  { %v2776_v61 = vmax.f32 %v2626_v55, 0.0  ;;  %6707 = vmatprep.subr.bf16.mxu1 %v7204_v25  ;;  %v8933_v55 = vld [vmem:[#allocation25 + $0xd4] ss:$8 sps:$4 sm:$0xff]  }
 0x657   :  { %v2777_v62 = vmax.f32 %v2628_v58, 0.0 }
 0x658   :  { %v2836_v63 = vpack.c.bf16 %v2776_v61, %v2774_v60 }
 0x659   :  { %v2837_v3 = vpack.c.bf16 %v2777_v62, %v2775_v14  ;;  %v2631_v5 = vpop.f32.mrb[136].mxu0  ;;  %6723 = vmatpush1.bf16.msra.mxu1 %v7202_v24  ;;  %v8897_v24 = vld [vmem:[#allocation25 + $0x90] ss:$8 sps:$4 sm:$0xff]  }
 0x65a   :  { %v2632_v7 = vadd.f32 %v2631_v5, %v8839_v27  ;;  %v2633_v9 = vpop.f32.mrb[137].mxu0  ;;  %6708 = vmatprep.subr.bf16.mxu1 %v7207_v51  ;;  %3935 = vmatpush1.bf16.msra.mxu0 %v8897_v24  ;;  %v8937_v14 = vld [vmem:[#allocation25 + $0xd0] ss:$8 sps:$4 sm:$0xff]  }
 0x65b   :  { %v2634_v0 = vadd.f32 %v2633_v9, %v8842_v28  ;;  %v2635_v11 = vpop.f32.mrb[138].mxu0  ;;  %3389 = vmatprep.mubr.bf16.mxu1 %v2837_v3 }
 0x65c   :  { %v2636_v12 = vadd.f32 %v2635_v11, %v8839_v27  ;;  %v2637_v15 = vpop.f32.mrb[139].mxu0  ;;  %3390 = vmatmul.mubr.bf16.gmra.mrb[132].mxu1 %v2836_v63  ;;  %v2778_v19 = vmax.f32 %v2632_v7, 0.0  ;;  %v8948_v11 = vld [vmem:[#allocation25 + $0xe0] ss:$8 sps:$4 sm:$0xff]  }
 0x65d   :  { %v2638_v17 = vadd.f32 %v2637_v15, %v8842_v28  ;;  %6724 = vmatpush1.bf16.msra.mxu1 %v8836_v26  ;;  %v2779_v21 = vmax.f32 %v2634_v0, 0.0  ;;  %v8901_v26 = vld [vmem:[#allocation25 + $0xa4] ss:$8 sps:$4 sm:$0xff]  }
 0x65e   :  { %v2780_v20 = vmax.f32 %v2636_v12, 0.0  ;;  %6709 = vmatprep.subr.bf16.mxu1 %v8847_v31  ;;  %3936 = vmatprep.subr.bf16.mxu0 %v8901_v26 }
 0x65f   :  { %v2781_v22 = vmax.f32 %v2638_v17, 0.0  ;;  %3937 = vmatpush1.bf16.msra.mxu0 %v8908_v39 }
 0x660   :  { %v2838_v23 = vpack.c.bf16 %v2780_v20, %v2778_v19  ;;  %3938 = vmatprep.subr.bf16.mxu0 %v8913_v35 }
 0x661   :  { %v2839_v25 = vpack.c.bf16 %v2781_v22, %v2779_v21  ;;  %v2641_v50 = vpop.f32.mrb[140].mxu0  ;;  %6725 = vmatpush1.bf16.msra.mxu1 %v8845_v30 }
 0x662   :  { %v2642_v51 = vadd.f32 %v2641_v50, %v8839_v27  ;;  %v2643_v29 = vpop.f32.mrb[141].mxu0  ;;  %6710 = vmatprep.subr.bf16.mxu1 %v8856_v13 }
 0x663   :  { %v2644_v31 = vadd.f32 %v2643_v29, %v8842_v28  ;;  %v2645_v32 = vpop.f32.mrb[142].mxu0  ;;  %3399 = vmatprep.mubr.bf16.mxu1 %v2839_v25  ;;  %3939 = vmatpush1.bf16.msra.mxu0 %v8917_v42 }
 0x664   :  { %v2646_v33 = vadd.f32 %v2645_v32, %v8839_v27  ;;  %v2647_v34 = vpop.f32.mrb[143].mxu0  ;;  %3400 = vmatmul.mubr.bf16.gmra.mrb[136].mxu1 %v2838_v23  ;;  %v2782_v1 = vmax.f32 %v2642_v51, 0.0 }
 0x665   :  { %v2648_v30 = vadd.f32 %v2647_v34, %v8842_v28  ;;  %6726 = vmatpush1.bf16.msra.mxu1 %v8854_v36  ;;  %v2783_v37 = vmax.f32 %v2644_v31, 0.0  ;;  %v8921_v36 = vld [vmem:[#allocation25 + $0xc4] ss:$8 sps:$4 sm:$0xff]  }
 0x666   :  { %v2784_v13 = vmax.f32 %v2646_v33, 0.0  ;;  %6711 = vmatprep.subr.bf16.mxu1 %v8859_v38  ;;  %3940 = vmatprep.subr.bf16.mxu0 %v8921_v36 }
 0x667   :  { %v2785_v40 = vmax.f32 %v2648_v30, 0.0  ;;  %3941 = vmatpush1.bf16.msra.mxu0 %v8928_v54 }
 0x668   :  { %v2840_v41 = vpack.c.bf16 %v2784_v13, %v2782_v1  ;;  %3942 = vmatprep.subr.bf16.mxu0 %v8933_v55 }
 0x669   :  { %v2841_v43 = vpack.c.bf16 %v2785_v40, %v2783_v37  ;;  %v2651_v44 = vpop.f32.mrb[144].mxu0  ;;  %6727 = vmatpush1.bf16.msra.mxu1 %v8863_v45 }
 0x66a   :  { %v2652_v46 = vadd.f32 %v2651_v44, %v8839_v27  ;;  %v2653_v47 = vpop.f32.mrb[145].mxu0  ;;  %6712 = vmatprep.subr.bf16.mxu1 %v8866_v48 }
 0x66b   :  { %v2654_v38 = vadd.f32 %v2653_v47, %v8842_v28  ;;  %v2655_v49 = vpop.f32.mrb[146].mxu0  ;;  %3409 = vmatprep.mubr.bf16.mxu1 %v2841_v43  ;;  %3943 = vmatpush1.bf16.msra.mxu0 %v8937_v14 }
 0x66c   :  { %v2656_v52 = vadd.f32 %v2655_v49, %v8839_v27  ;;  %v2657_v53 = vpop.f32.mrb[147].mxu0  ;;  %3410 = vmatmul.mubr.bf16.gmra.mrb[140].mxu1 %v2840_v41  ;;  %v2786_v48 = vmax.f32 %v2652_v46, 0.0 }
 0x66d   :  { %v2658_v45 = vadd.f32 %v2657_v53, %v8842_v28  ;;  %6728 = vmatpush1.bf16.msra.mxu1 %v8872_v57  ;;  %v2787_v58 = vmax.f32 %v2654_v38, 0.0  ;;  %v8941_v57 = vld [vmem:[#allocation25 + $0xe4] ss:$8 sps:$4 sm:$0xff]  }
 0x66e   :  { %v2788_v56 = vmax.f32 %v2656_v52, 0.0  ;;  %6713 = vmatprep.subr.bf16.mxu1 %v8876_v59  ;;  %3944 = vmatprep.subr.bf16.mxu0 %v8941_v57 }
 0x66f   :  { %v2789_v60 = vmax.f32 %v2658_v45, 0.0  ;;  %3945 = vmatpush1.bf16.msra.mxu0 %v8948_v11 }
 0x670   :  { %v2842_v61 = vpack.c.bf16 %v2788_v56, %v2786_v48 }
 0x671   :  { %v2843_v62 = vpack.c.bf16 %v2789_v60, %v2787_v58  ;;  %v2661_v63 = vpop.f32.mrb[148].mxu0  ;;  %6729 = vmatpush1.bf16.msra.mxu1 %v8879_v2 }
 0x672   :  { %v2662_v3 = vadd.f32 %v2661_v63, %v8839_v27  ;;  %v2663_v5 = vpop.f32.mrb[149].mxu0  ;;  %6714 = vmatprep.subr.bf16.mxu1 %v8882_v6 }
 0x673   :  { %v2664_v59 = vadd.f32 %v2663_v5, %v8842_v28  ;;  %v2665_v7 = vpop.f32.mrb[150].mxu0  ;;  %3419 = vmatprep.mubr.bf16.mxu1 %v2843_v62 }
 0x674   :  { %v2666_v9 = vadd.f32 %v2665_v7, %v8839_v27  ;;  %v2667_v0 = vpop.f32.mrb[151].mxu0  ;;  %3420 = vmatmul.mubr.bf16.gmra.mrb[144].mxu1 %v2842_v61  ;;  %v2790_v12 = vmax.f32 %v2662_v3, 0.0 }
 0x675   :  { %v2668_v2 = vadd.f32 %v2667_v0, %v8842_v28  ;;  %6730 = vmatpush1.bf16.msra.mxu1 %v8888_v16  ;;  %v2791_v15 = vmax.f32 %v2664_v59, 0.0 }
 0x676   :  { %v2792_v6 = vmax.f32 %v2666_v9, 0.0  ;;  %6715 = vmatprep.subr.bf16.mxu1 %v8893_v18 }
 0x677   :  { %v2793_v17 = vmax.f32 %v2668_v2, 0.0 }
 0x678   :  { %v2844_v19 = vpack.c.bf16 %v2792_v6, %v2790_v12 }
 0x679   :  { %v2845_v20 = vpack.c.bf16 %v2793_v17, %v2791_v15  ;;  %v2671_v21 = vpop.f32.mrb[152].mxu0  ;;  %6731 = vmatpush1.bf16.msra.mxu1 %v8897_v24 }
 0x67a   :  { %v2672_v22 = vadd.f32 %v2671_v21, %v8839_v27  ;;  %v2673_v23 = vpop.f32.mrb[153].mxu0  ;;  %6716 = vmatprep.subr.bf16.mxu1 %v8901_v26 }
 0x67b   :  { %v2674_v16 = vadd.f32 %v2673_v23, %v8842_v28  ;;  %v2675_v25 = vpop.f32.mrb[154].mxu0  ;;  %3429 = vmatprep.mubr.bf16.mxu1 %v2845_v20 }
 0x67c   :  { %v2676_v18 = vadd.f32 %v2675_v25, %v8839_v27  ;;  %v2677_v50 = vpop.f32.mrb[155].mxu0  ;;  %3430 = vmatmul.mubr.bf16.gmra.mrb[148].mxu1 %v2844_v19  ;;  %v2794_v29 = vmax.f32 %v2672_v22, 0.0 }
 0x67d   :  { %v2678_v51 = vadd.f32 %v2677_v50, %v8842_v28  ;;  %6732 = vmatpush1.bf16.msra.mxu1 %v8908_v39  ;;  %v2795_v24 = vmax.f32 %v2674_v16, 0.0 }
 0x67e   :  { %v2796_v31 = vmax.f32 %v2676_v18, 0.0  ;;  %6717 = vmatprep.subr.bf16.mxu1 %v8913_v35 }
 0x67f   :  { %v2797_v32 = vmax.f32 %v2678_v51, 0.0 }
 0x680   :  { %v2846_v33 = vpack.c.bf16 %v2796_v31, %v2794_v29 }
 0x681   :  { %v2847_v26 = vpack.c.bf16 %v2797_v32, %v2795_v24  ;;  %v2681_v34 = vpop.f32.mrb[156].mxu0  ;;  %6733 = vmatpush1.bf16.msra.mxu1 %v8917_v42 }
 0x682   :  { %v2682_v30 = vadd.f32 %v2681_v34, %v8839_v27  ;;  %v2683_v1 = vpop.f32.mrb[157].mxu0  ;;  %6718 = vmatprep.subr.bf16.mxu1 %v8921_v36 }
 0x683   :  { %v2684_v13 = vadd.f32 %v2683_v1, %v8842_v28  ;;  %v2685_v37 = vpop.f32.mrb[158].mxu0  ;;  %3439 = vmatprep.mubr.bf16.mxu1 %v2847_v26 }
 0x684   :  { %v2686_v39 = vadd.f32 %v2685_v37, %v8839_v27  ;;  %v2687_v40 = vpop.f32.mrb[159].mxu0  ;;  %3440 = vmatmul.mubr.bf16.gmra.mrb[152].mxu1 %v2846_v33  ;;  %v2798_v41 = vmax.f32 %v2682_v30, 0.0 }
 0x685   :  { %v2688_v35 = vadd.f32 %v2687_v40, %v8842_v28  ;;  %6734 = vmatpush1.bf16.msra.mxu1 %v8928_v54  ;;  %v2799_v42 = vmax.f32 %v2684_v13, 0.0 }
 0x686   :  { %v2800_v43 = vmax.f32 %v2686_v39, 0.0  ;;  %6719 = vmatprep.subr.bf16.mxu1 %v8933_v55 }
 0x687   :  { %v2801_v44 = vmax.f32 %v2688_v35, 0.0 }
 0x688   :  { %v2848_v46 = vpack.c.bf16 %v2800_v43, %v2798_v41 }
 0x689   :  { %v2849_v36 = vpack.c.bf16 %v2801_v44, %v2799_v42  ;;  %v2691_v47 = vpop.f32.mrb[160].mxu0  ;;  %6735 = vmatpush1.bf16.msra.mxu1 %v8937_v14 }
 0x68a   :  { %v2692_v38 = vadd.f32 %v2691_v47, %v8839_v27  ;;  %v2693_v49 = vpop.f32.mrb[161].mxu0  ;;  %6720 = vmatprep.subr.bf16.mxu1 %v8941_v57 }
 0x68b   :  { %v2694_v52 = vadd.f32 %v2693_v49, %v8842_v28  ;;  %v2695_v53 = vpop.f32.mrb[162].mxu0  ;;  %3449 = vmatprep.mubr.bf16.mxu1 %v2849_v36 }
 0x68c   :  { %v2696_v54 = vadd.f32 %v2695_v53, %v8839_v27  ;;  %v2697_v45 = vpop.f32.mrb[163].mxu0  ;;  %3450 = vmatmul.mubr.bf16.gmra.mrb[156].mxu1 %v2848_v46  ;;  %v2802_v48 = vmax.f32 %v2692_v38, 0.0  ;;  %v7246_v53 = vld [vmem:[#allocation25 + $0xf4] ss:$8 sps:$4 sm:$0xff]  }
 0x68d   :  { %v2698_v55 = vadd.f32 %v2697_v45, %v8842_v28  ;;  %6736 = vmatpush1.bf16.msra.mxu1 %v8948_v11  ;;  %v2803_v58 = vmax.f32 %v2694_v52, 0.0  ;;  %v7244_v45 = vld [vmem:[#allocation25 + $0xf0] ss:$8 sps:$4 sm:$0xff]   ;;  %3946 = vmatprep.subr.bf16.mxu0 %v7246_v53 }
 0x68e   :  { %v2804_v56 = vmax.f32 %v2696_v54, 0.0  ;;  %6721 = vmatprep.subr.bf16.mxu1 %v7246_v53  ;;  %3947 = vmatpush1.bf16.msra.mxu0 %v7244_v45 }
 0x68f   :  { %v2805_v60 = vmax.f32 %v2698_v55, 0.0 }
 0x690   :  { %v2850_v61 = vpack.c.bf16 %v2804_v56, %v2802_v48 }
 0x691   :  { %v2851_v14 = vpack.c.bf16 %v2805_v60, %v2803_v58  ;;  %v2701_v62 = vpop.f32.mrb[164].mxu0  ;;  %6737 = vmatpush1.bf16.msra.mxu1 %v7244_v45  ;;  %v7259_v45 = vld [vmem:[#allocation28 + $0x40] sm:$0xff]  }
 0x692   :  { %v2702_v63 = vadd.f32 %v2701_v62, %v8839_v27  ;;  %v2703_v57 = vpop.f32.mrb[165].mxu0  ;;  %6290 = vmatprep.subr.bf16.mxu1 %v7259_v45 }
 0x693   :  { %v2704_v3 = vadd.f32 %v2703_v57, %v8842_v28  ;;  %v2705_v5 = vpop.f32.mrb[166].mxu0  ;;  %3459 = vmatprep.mubr.bf16.mxu1 %v2851_v14 }
 0x694   :  { %v2706_v59 = vadd.f32 %v2705_v5, %v8839_v27  ;;  %v2707_v7 = vpop.f32.mrb[167].mxu0  ;;  %3460 = vmatmul.mubr.bf16.gmra.mrb[160].mxu1 %v2850_v61  ;;  %v2806_v0 = vmax.f32 %v2702_v63, 0.0 }
 0x695   :  { %v2708_v9 = vadd.f32 %v2707_v7, %v8842_v28  ;;  %v2807_v2 = vmax.f32 %v2704_v3, 0.0 }
 0x696   :  { %v2808_v11 = vmax.f32 %v2706_v59, 0.0 }
 0x697   :  { %v2809_v12 = vmax.f32 %v2708_v9, 0.0 }
 0x698   :  { %v2852_v6 = vpack.c.bf16 %v2808_v11, %v2806_v0 }
 0x699   :  { %v2853_v15 = vpack.c.bf16 %v2809_v12, %v2807_v2  ;;  %v2711_v17 = vpop.f32.mrb[168].mxu0 }
 0x69a   :  { %v2712_v19 = vadd.f32 %v2711_v17, %v8839_v27  ;;  %v2713_v20 = vpop.f32.mrb[169].mxu0 }
 0x69b   :  { %v2714_v21 = vadd.f32 %v2713_v20, %v8842_v28  ;;  %v2715_v22 = vpop.f32.mrb[170].mxu0  ;;  %3469 = vmatprep.mubr.bf16.mxu1 %v2853_v15 }
 0x69c   :  { %v2716_v23 = vadd.f32 %v2715_v22, %v8839_v27  ;;  %v2717_v16 = vpop.f32.mrb[171].mxu0  ;;  %3470 = vmatmul.mubr.bf16.gmra.mrb[164].mxu1 %v2852_v6  ;;  %v2810_v18 = vmax.f32 %v2712_v19, 0.0 }
 0x69d   :  { %v2718_v25 = vadd.f32 %v2717_v16, %v8842_v28  ;;  %v2811_v51 = vmax.f32 %v2714_v21, 0.0 }
 0x69e   :  { %v2812_v50 = vmax.f32 %v2716_v23, 0.0 }
 0x69f   :  { %v2813_v29 = vmax.f32 %v2718_v25, 0.0 }
 0x6a0   :  { %v2854_v31 = vpack.c.bf16 %v2812_v50, %v2810_v18 }
 0x6a1   :  { %v2855_v24 = vpack.c.bf16 %v2813_v29, %v2811_v51  ;;  %v2721_v32 = vpop.f32.mrb[172].mxu0 }
 0x6a2   :  { %v2722_v33 = vadd.f32 %v2721_v32, %v8839_v27  ;;  %v2723_v26 = vpop.f32.mrb[173].mxu0 }
 0x6a3   :  { %v2724_v34 = vadd.f32 %v2723_v26, %v8842_v28  ;;  %v2725_v30 = vpop.f32.mrb[174].mxu0  ;;  %3479 = vmatprep.mubr.bf16.mxu1 %v2855_v24 }
 0x6a4   :  { %v2726_v1 = vadd.f32 %v2725_v30, %v8839_v27  ;;  %v2727_v13 = vpop.f32.mrb[175].mxu0  ;;  %3480 = vmatmul.mubr.bf16.gmra.mrb[168].mxu1 %v2854_v31  ;;  %v2814_v39 = vmax.f32 %v2722_v33, 0.0 }
 0x6a5   :  { %v2728_v37 = vadd.f32 %v2727_v13, %v8842_v28  ;;  %v2815_v35 = vmax.f32 %v2724_v34, 0.0 }
 0x6a6   :  { %v2816_v40 = vmax.f32 %v2726_v1, 0.0 }
 0x6a7   :  { %v2817_v41 = vmax.f32 %v2728_v37, 0.0 }
 0x6a8   :  { %v2856_v43 = vpack.c.bf16 %v2816_v40, %v2814_v39 }
 0x6a9   :  { %v2857_v42 = vpack.c.bf16 %v2817_v41, %v2815_v35  ;;  %v2731_v44 = vpop.f32.mrb[176].mxu0 }
 0x6aa   :  { %v2732_v46 = vadd.f32 %v2731_v44, %v8839_v27  ;;  %v2733_v36 = vpop.f32.mrb[177].mxu0  ;;  %v3540_v44 = vld [vmem:[#allocation23] sm:$0x3] }
 0x6ab   :  { %v2734_v47 = vadd.f32 %v2733_v36, %v8842_v28  ;;  %v2735_v38 = vpop.f32.mrb[178].mxu0  ;;  %3489 = vmatprep.mubr.bf16.mxu1 %v2857_v42  ;;  %v7247_v42 = vld [vmem:[#allocation29] sm:$0xff]  }
 0x6ac   :  { %v2736_v49 = vadd.f32 %v2735_v38, %v8839_v27  ;;  %v2737_v52 = vpop.f32.mrb[179].mxu0  ;;  %3490 = vmatmul.mubr.bf16.gmra.mrb[172].mxu1 %v2856_v43  ;;  %v2818_v55 = vmax.f32 %v2732_v46, 0.0  ;;  %6562 = vmatprep.subr.bf16.mxu0 %v7247_v42  ;;  %v9007_v46 = vrot.slane %v3540_v44, %v8536_v8 }
 0x6ad   :  { %v2738_v54 = vadd.f32 %v2737_v52, %v8842_v28  ;;  %v2819_v56 = vmax.f32 %v2734_v47, 0.0 }
 0x6ae   :  { %v2820_v48 = vmax.f32 %v2736_v49, 0.0 }
 0x6af   :  { %v2821_v58 = vmax.f32 %v2738_v54, 0.0 }
 0x6b0   :  { %v2858_v60 = vpack.c.bf16 %v2820_v48, %v2818_v55 }
 0x6b1   :  { %v2859_v61 = vpack.c.bf16 %v2821_v58, %v2819_v56  ;;  %v2741_v14 = vpop.f32.mrb[180].mxu0 }
 0x6b2   :  { %v2742_v62 = vadd.f32 %v2741_v14, %v8839_v27  ;;  %v2743_v63 = vpop.f32.mrb[181].mxu0 }
 0x6b3   :  { %v2744_v57 = vadd.f32 %v2743_v63, %v8842_v28  ;;  %v2745_v3 = vpop.f32.mrb[182].mxu0  ;;  %3499 = vmatprep.mubr.bf16.mxu1 %v2859_v61 }
 0x6b4   :  { %v2746_v5 = vadd.f32 %v2745_v3, %v8839_v27  ;;  %v2747_v59 = vpop.f32.mrb[183].mxu0  ;;  %3500 = vmatmul.mubr.bf16.gmra.mrb[176].mxu1 %v2858_v60  ;;  %v2822_v9 = vmax.f32 %v2742_v62, 0.0 }
 0x6b5   :  { %v2748_v7 = vadd.f32 %v2747_v59, %v8842_v28  ;;  %v2823_v11 = vmax.f32 %v2744_v57, 0.0  ;;  %v7248_v57 = vld [vmem:[#allocation29 + $0x8] sm:$0xff]  }
 0x6b6   :  { %v2824_v0 = vmax.f32 %v2746_v5, 0.0 }
 0x6b7   :  { %v2825_v2 = vmax.f32 %v2748_v7, 0.0 }
 0x6b8   :  { %v2860_v12 = vpack.c.bf16 %v2824_v0, %v2822_v9 }
 0x6b9   :  { %v2861_v6 = vpack.c.bf16 %v2825_v2, %v2823_v11  ;;  %v2751_v15 = vpop.f32.mrb[184].mxu0  ;;  %v7249_v2 = vld [vmem:[#allocation29 + $0x10] sm:$0xff]  }
 0x6ba   :  { %v2752_v17 = vadd.f32 %v2751_v15, %v8839_v27  ;;  %v2753_v19 = vpop.f32.mrb[185].mxu0 }
 0x6bb   :  { %v2754_v20 = vadd.f32 %v2753_v19, %v8842_v28  ;;  %v2755_v21 = vpop.f32.mrb[186].mxu0  ;;  %3509 = vmatprep.mubr.bf16.mxu1 %v2861_v6 }
 0x6bc   :  { %v2756_v22 = vadd.f32 %v2755_v21, %v8839_v27  ;;  %v2757_v23 = vpop.f32.mrb[187].mxu0  ;;  %3510 = vmatmul.mubr.bf16.gmra.mrb[180].mxu1 %v2860_v12  ;;  %v2826_v25 = vmax.f32 %v2752_v17, 0.0 }
 0x6bd   :  { %v2758_v16 = vadd.f32 %v2757_v23, %v8842_v28  ;;  %v2827_v50 = vmax.f32 %v2754_v20, 0.0 }
 0x6be   :  { %v2828_v18 = vmax.f32 %v2756_v22, 0.0  ;;  %v7250_v22 = vld [vmem:[#allocation29 + $0x18] sm:$0xff]  }
 0x6bf   :  { %v2829_v51 = vmax.f32 %v2758_v16, 0.0 }
 0x6c0   :  { %v2862_v29 = vpack.c.bf16 %v2828_v18, %v2826_v25 }
 0x6c1   :  { %v2863_v31 = vpack.c.bf16 %v2829_v51, %v2827_v50  ;;  %v2761_v24 = vpop.f32.mrb[188].mxu0 }
 0x6c2   :  { %v2762_v32 = vadd.f32 %v2761_v24, %v8839_v27  ;;  %v2763_v33 = vpop.f32.mrb[189].mxu0 }
 0x6c3   :  { %v2764_v26 = vadd.f32 %v2763_v33, %v8842_v28  ;;  %v2765_v34 = vpop.f32.mrb[190].mxu0  ;;  %3519 = vmatprep.mubr.bf16.mxu1 %v2863_v31  ;;  %v7251_v31 = vld [vmem:[#allocation29 + $0x20] sm:$0xff]  }
 0x6c4   :  { %v2766_v30 = vadd.f32 %v2765_v34, %v8839_v27  ;;  %v2767_v1 = vpop.f32.mrb[191].mxu0  ;;  %3520 = vmatmul.mubr.bf16.gmra.mrb[184].mxu1 %v2862_v29  ;;  %v2830_v37 = vmax.f32 %v2762_v32, 0.0  ;;  %v9010_v27 = vrot.slane %v3540_v44, %v8538_v10  ;;  %v7253_v44 = vld [vmem:[#allocation29 + $0x30] sm:$0xff]  }
 0x6c5   :  { %v2768_v13 = vadd.f32 %v2767_v1, %v8842_v28  ;;  %v2831_v40 = vmax.f32 %v2764_v26, 0.0 }
 0x6c6   :  { %v2832_v39 = vmax.f32 %v2766_v30, 0.0 }
 0x6c7   :  { %v2833_v35 = vmax.f32 %v2768_v13, 0.0  ;;  %v7252_v13 = vld [vmem:[#allocation29 + $0x28] sm:$0xff]  }
 0x6c8   :  { %v2864_v41 = vpack.c.bf16 %v2832_v39, %v2830_v37 }
 0x6c9   :  { %v2865_v43 = vpack.c.bf16 %v2833_v35, %v2831_v40 }
 0x6cb   :  { %3529 = vmatprep.mubr.bf16.mxu1 %v2865_v43 }
 0x6cc   :  { %3530 = vmatmul.mubr.bf16.gmra.mrb[188].mxu1 %v2864_v41 }
 0x727   :  { %v3381_v36 = vpop.f32.mrb[128].mxu1 }
 0x728   :  { %v3552_v28 = vadd.f32 %v9007_v46, %v3381_v36  ;;  %v3383_v47 = vpop.f32.mrb[129].mxu1 }
 0x729   :  { %v3553_v38 = vadd.f32 %v9010_v27, %v3383_v47  ;;  %v3385_v49 = vpop.f32.mrb[130].mxu1 }
 0x72a   :  { %v3554_v52 = vadd.f32 %v9007_v46, %v3385_v49  ;;  %v3387_v53 = vpop.f32.mrb[131].mxu1  ;;  %v3616_v55 = vmax.f32 %v3552_v28, 0.0 }
 0x72b   :  { %v3555_v54 = vadd.f32 %v9010_v27, %v3387_v53  ;;  %v3617_v56 = vmax.f32 %v3553_v38, 0.0 }
 0x72c   :  { %v3618_v48 = vmax.f32 %v3554_v52, 0.0 }
 0x72d   :  { %v3619_v58 = vmax.f32 %v3555_v54, 0.0  ;;  %v7254_v54 = vld [vmem:[#allocation29 + $0x38] sm:$0xff]  }
 0x72e   :  { %v3680_v60 = vpack.c.bf16 %v3618_v48, %v3616_v55 }
 0x72f   :  { %v3681_v61 = vpack.c.bf16 %v3619_v58, %v3617_v56  ;;  %v3391_v14 = vpop.f32.mrb[132].mxu1 }
 0x730   :  { %v3556_v62 = vadd.f32 %v9007_v46, %v3391_v14  ;;  %v3393_v63 = vpop.f32.mrb[133].mxu1  ;;  %v7255_v14 = vld [vmem:[#allocation34] sm:$0xff]  }
 0x731   :  { %v3557_v3 = vadd.f32 %v9010_v27, %v3393_v63  ;;  %v3395_v5 = vpop.f32.mrb[134].mxu1  ;;  %3948 = vmatprep.mubr.bf16.mxu0 %v3681_v61 }
 0x732   :  { %v3558_v59 = vadd.f32 %v9007_v46, %v3395_v5  ;;  %v3397_v7 = vpop.f32.mrb[135].mxu1  ;;  %3949 = vmatmul.mubr.bf16.vlgmr.msra.gmra.mrb[192].mxu0 %v3680_v60  ;;  %v3620_v0 = vmax.f32 %v3556_v62, 0.0 }
 0x733   :  { %v3559_v9 = vadd.f32 %v9010_v27, %v3397_v7  ;;  %6563 = vmatpush3.bf16.msra.mxu0 %v7247_v42  ;;  %v3621_v12 = vmax.f32 %v3557_v3, 0.0 }
 0x734   :  { %v3622_v11 = vmax.f32 %v3558_v59, 0.0  ;;  %6564 = vmatprep.subr.bf16.mxu0 %v7248_v57 }
 0x735   :  { %v3623_v6 = vmax.f32 %v3559_v9, 0.0 }
 0x736   :  { %v3682_v15 = vpack.c.bf16 %v3622_v11, %v3620_v0 }
 0x737   :  { %v3683_v17 = vpack.c.bf16 %v3623_v6, %v3621_v12  ;;  %v3401_v19 = vpop.f32.mrb[136].mxu1  ;;  %6565 = vmatpush3.bf16.msra.mxu0 %v7248_v57 }
 0x738   :  { %v3560_v20 = vadd.f32 %v9007_v46, %v3401_v19  ;;  %v3403_v21 = vpop.f32.mrb[137].mxu1  ;;  %6566 = vmatprep.subr.bf16.mxu0 %v7249_v2 }
 0x739   :  { %v3561_v23 = vadd.f32 %v9010_v27, %v3403_v21  ;;  %v3405_v16 = vpop.f32.mrb[138].mxu1  ;;  %3958 = vmatprep.mubr.bf16.mxu0 %v3683_v17 }
 0x73a   :  { %v3562_v25 = vadd.f32 %v9007_v46, %v3405_v16  ;;  %v3407_v18 = vpop.f32.mrb[139].mxu1  ;;  %3959 = vmatmul.mubr.bf16.gmra.mrb[196].mxu0 %v3682_v15  ;;  %v3624_v51 = vmax.f32 %v3560_v20, 0.0 }
 0x73b   :  { %v3563_v50 = vadd.f32 %v9010_v27, %v3407_v18  ;;  %6567 = vmatpush3.bf16.msra.mxu0 %v7249_v2  ;;  %v3625_v24 = vmax.f32 %v3561_v23, 0.0 }
 0x73c   :  { %v3626_v29 = vmax.f32 %v3562_v25, 0.0  ;;  %6568 = vmatprep.subr.bf16.mxu0 %v7250_v22 }
 0x73d   :  { %v3627_v32 = vmax.f32 %v3563_v50, 0.0 }
 0x73e   :  { %v3684_v33 = vpack.c.bf16 %v3626_v29, %v3624_v51 }
 0x73f   :  { %v3685_v26 = vpack.c.bf16 %v3627_v32, %v3625_v24  ;;  %v3411_v34 = vpop.f32.mrb[140].mxu1  ;;  %6569 = vmatpush3.bf16.msra.mxu0 %v7250_v22 }
 0x740   :  { %v3564_v30 = vadd.f32 %v9007_v46, %v3411_v34  ;;  %v3413_v1 = vpop.f32.mrb[141].mxu1  ;;  %6570 = vmatprep.subr.bf16.mxu0 %v7251_v31 }
 0x741   :  { %v3565_v37 = vadd.f32 %v9010_v27, %v3413_v1  ;;  %v3415_v39 = vpop.f32.mrb[142].mxu1  ;;  %3968 = vmatprep.mubr.bf16.mxu0 %v3685_v26 }
 0x742   :  { %v3566_v40 = vadd.f32 %v9007_v46, %v3415_v39  ;;  %v3417_v35 = vpop.f32.mrb[143].mxu1  ;;  %3969 = vmatmul.mubr.bf16.gmra.mrb[200].mxu0 %v3684_v33  ;;  %v3628_v43 = vmax.f32 %v3564_v30, 0.0  ;;  %v7256_v39 = vld [vmem:[#allocation34 + $0x8] sm:$0xff]  }
 0x743   :  { %v3567_v41 = vadd.f32 %v9010_v27, %v3417_v35  ;;  %6571 = vmatpush3.bf16.msra.mxu0 %v7251_v31  ;;  %v3629_v36 = vmax.f32 %v3565_v37, 0.0  ;;  %v9040_v31 = vld [vmem:[#allocation2] sm:$0xff]  }
 0x744   :  { %v3630_v42 = vmax.f32 %v3566_v40, 0.0  ;;  %6572 = vmatprep.subr.bf16.mxu0 %v7252_v13  ;;  %v7260_v40 = vld [vmem:[#allocation28] sm:$0xff]  }
 0x745   :  { %v3631_v28 = vmax.f32 %v3567_v41, 0.0 }
 0x746   :  { %v3686_v47 = vpack.c.bf16 %v3630_v42, %v3628_v43  ;;  %v7264_v43 = vld [vmem:[#allocation28 + $0x48] sm:$0xff]  }
 0x747   :  { %v3687_v38 = vpack.c.bf16 %v3631_v28, %v3629_v36  ;;  %v3421_v49 = vpop.f32.mrb[144].mxu1  ;;  %6573 = vmatpush3.bf16.msra.mxu0 %v7252_v13  ;;  %v9046_v36 = vld [vmem:[#allocation2 + $0x8] sm:$0xff]  }
 0x748   :  { %v3568_v52 = vadd.f32 %v9007_v46, %v3421_v49  ;;  %v3423_v53 = vpop.f32.mrb[145].mxu1  ;;  %6574 = vmatprep.subr.bf16.mxu0 %v7253_v44 }
 0x749   :  { %v3569_v45 = vadd.f32 %v9010_v27, %v3423_v53  ;;  %v3425_v55 = vpop.f32.mrb[146].mxu1  ;;  %3978 = vmatprep.mubr.bf16.mxu0 %v3687_v38  ;;  %v7265_v53 = vld [vmem:[#allocation28 + $0x8] sm:$0xff]  }
 0x74a   :  { %v3570_v48 = vadd.f32 %v9007_v46, %v3425_v55  ;;  %v3427_v56 = vpop.f32.mrb[147].mxu1  ;;  %3979 = vmatmul.mubr.bf16.gmra.mrb[204].mxu0 %v3686_v47  ;;  %v3632_v60 = vmax.f32 %v3568_v52, 0.0  ;;  %v9050_v47 = vld [vmem:[#allocation2 + $0x10] sm:$0xff]   ;;  %v7257_v52 = vld [vmem:[#allocation34 + $0x10] sm:$0xff]  }
 0x74b   :  { %v3571_v58 = vadd.f32 %v9010_v27, %v3427_v56  ;;  %6575 = vmatpush3.bf16.msra.mxu0 %v7253_v44  ;;  %v3633_v62 = vmax.f32 %v3569_v45, 0.0  ;;  %v7267_v55 = vld [vmem:[#allocation28 + $0x50] sm:$0xff]  }
 0x74c   :  { %v3634_v61 = vmax.f32 %v3570_v48, 0.0  ;;  %6576 = vmatprep.subr.bf16.mxu0 %v7254_v54 }
 0x74d   :  { %v3635_v63 = vmax.f32 %v3571_v58, 0.0 }
 0x74e   :  { %v3688_v57 = vpack.c.bf16 %v3634_v61, %v3632_v60 }
 0x74f   :  { %v3689_v3 = vpack.c.bf16 %v3635_v63, %v3633_v62  ;;  %v3431_v5 = vpop.f32.mrb[148].mxu1  ;;  %6577 = vmatpush3.bf16.msra.mxu0 %v7254_v54  ;;  %v7258_v62 = vld [vmem:[#allocation34 + $0x18] sm:$0xff]  }
 0x750   :  { %v3572_v59 = vadd.f32 %v9007_v46, %v3431_v5  ;;  %v3433_v7 = vpop.f32.mrb[149].mxu1  ;;  %6610 = vmatprep.subr.bf16.mxu0 %v7255_v14 }
 0x751   :  { %v3573_v9 = vadd.f32 %v9010_v27, %v3433_v7  ;;  %v3435_v0 = vpop.f32.mrb[150].mxu1  ;;  %3988 = vmatprep.mubr.bf16.mxu0 %v3689_v3  ;;  %v7269_v3 = vld [vmem:[#allocation28 + $0x58] sm:$0xff]   ;;  %v9056_v7 = vld [vmem:[#allocation2 + $0x18] sm:$0xff]  }
 0x752   :  { %v3574_v11 = vadd.f32 %v9007_v46, %v3435_v0  ;;  %v3437_v2 = vpop.f32.mrb[151].mxu1  ;;  %3989 = vmatmul.mubr.bf16.gmra.mrb[208].mxu0 %v3688_v57  ;;  %v3636_v6 = vmax.f32 %v3572_v59, 0.0  ;;  %v9060_v0 = vld [vmem:[#allocation2 + $0x20] sm:$0xff]  }
 0x753   :  { %v3575_v12 = vadd.f32 %v9010_v27, %v3437_v2  ;;  %v3637_v17 = vmax.f32 %v3573_v9, 0.0 }
 0x754   :  { %v3638_v15 = vmax.f32 %v3574_v11, 0.0 }
 0x755   :  { %v3639_v19 = vmax.f32 %v3575_v12, 0.0  ;;  %v7261_v12 = vld [vmem:[#allocation34 + $0x20] sm:$0xff]  }
 0x756   :  { %v3690_v20 = vpack.c.bf16 %v3638_v15, %v3636_v6  ;;  %v7270_v6 = vld [vmem:[#allocation28 + $0x18] sm:$0xff]  }
 0x757   :  { %v3691_v21 = vpack.c.bf16 %v3639_v19, %v3637_v17  ;;  %v3441_v22 = vpop.f32.mrb[152].mxu1  ;;  %v7271_v19 = vld [vmem:[#allocation28 + $0x60] sm:$0xff]  }
 0x758   :  { %v3576_v23 = vadd.f32 %v9007_v46, %v3441_v22  ;;  %v3443_v16 = vpop.f32.mrb[153].mxu1 }
 0x759   :  { %v3577_v25 = vadd.f32 %v9010_v27, %v3443_v16  ;;  %v3445_v18 = vpop.f32.mrb[154].mxu1  ;;  %3998 = vmatprep.mubr.bf16.mxu0 %v3691_v21 }
 0x75a   :  { %v3578_v50 = vadd.f32 %v9007_v46, %v3445_v18  ;;  %v3447_v51 = vpop.f32.mrb[155].mxu1  ;;  %3999 = vmatmul.mubr.bf16.gmra.mrb[212].mxu0 %v3690_v20  ;;  %v3640_v24 = vmax.f32 %v3576_v23, 0.0  ;;  %v7272_v18 = vld [vmem:[#allocation28 + $0x20] sm:$0xff]  }
 0x75b   :  { %v3579_v29 = vadd.f32 %v9010_v27, %v3447_v51  ;;  %6578 = vmatprep.mubr.bf16.mxu0 %v9040_v31  ;;  %v3641_v33 = vmax.f32 %v3577_v25, 0.0  ;;  %v7262_v25 = vld [vmem:[#allocation34 + $0x28] sm:$0xff]  }
 0x75c   :  { %v3642_v32 = vmax.f32 %v3578_v50, 0.0 }
 0x75d   :  { %v3643_v26 = vmax.f32 %v3579_v29, 0.0  ;;  %v7274_v29 = vld [vmem:[#allocation28 + $0x68] sm:$0xff]  }
 0x75e   :  { %v3692_v34 = vpack.c.bf16 %v3642_v32, %v3640_v24 }
 0x75f   :  { %v3693_v30 = vpack.c.bf16 %v3643_v26, %v3641_v33  ;;  %v3451_v1 = vpop.f32.mrb[156].mxu1  ;;  %v9066_v33 = vld [vmem:[#allocation2 + $0x28] sm:$0xff]  }
 0x760   :  { %v3580_v13 = vadd.f32 %v9007_v46, %v3451_v1  ;;  %v3453_v37 = vpop.f32.mrb[157].mxu1 }
 0x761   :  { %v3581_v35 = vadd.f32 %v9010_v27, %v3453_v37  ;;  %v3455_v41 = vpop.f32.mrb[158].mxu1  ;;  %4008 = vmatprep.mubr.bf16.mxu1 %v3693_v30  ;;  %v7276_v37 = vld [vmem:[#allocation28 + $0x28] sm:$0xff]  }
 0x762   :  { %v3582_v42 = vadd.f32 %v9007_v46, %v3455_v41  ;;  %v3457_v44 = vpop.f32.mrb[159].mxu1  ;;  %4009 = vmatmul.mubr.bf16.vlgmr.msra.gmra.mrb[192].mxu1 %v3692_v34  ;;  %6579 = vmatmul.mubr.bf16.vlgmr.msra.gmra.mrb[216].mxu0 %v9046_v36  ;;  %v3644_v38 = vmax.f32 %v3580_v13, 0.0  ;;  %v9070_v34 = vld [vmem:[#allocation2 + $0x30] sm:$0xff]   ;;  %v7263_v13 = vld [vmem:[#allocation34 + $0x30] sm:$0xff]  }
 0x763   :  { %v3583_v28 = vadd.f32 %v9010_v27, %v3457_v44  ;;  %6582 = vmatprep.mubr.bf16.mxu0 %v9050_v47  ;;  %6611 = vmatpush3.bf16.msra.mxu0 %v7255_v14  ;;  %v3645_v54 = vmax.f32 %v3581_v35, 0.0  ;;  %v7268_v14 = vld [vmem:[#allocation28 + $0x10] sm:$0xff]  }
 0x764   :  { %v3646_v49 = vmax.f32 %v3582_v42, 0.0  ;;  %6612 = vmatprep.subr.bf16.mxu0 %v7256_v39  ;;  %6291 = vmatpush3.bf16.msra.mxu1 %v7260_v40  ;;  %v7281_v35 = vld [vmem:[#allocation28 + $0x70] sm:$0xff]  }
 0x765   :  { %v3647_v45 = vmax.f32 %v3583_v28, 0.0  ;;  %6292 = vmatprep.subr.bf16.mxu1 %v7264_v43 }
 0x766   :  { %v3694_v48 = vpack.c.bf16 %v3646_v49, %v3644_v38  ;;  %v7266_v38 = vld [vmem:[#allocation34 + $0x38] sm:$0xff]   ;;  %v7282_v49 = vld [vmem:[#allocation28 + $0x30] sm:$0xff]  }
 0x767   :  { %v3695_v56 = vpack.c.bf16 %v3647_v45, %v3645_v54  ;;  %v3461_v58 = vpop.f32.mrb[160].mxu1  ;;  %6613 = vmatpush3.bf16.msra.mxu0 %v7256_v39 }
 0x768   :  { %v3584_v60 = vadd.f32 %v9007_v46, %v3461_v58  ;;  %v3463_v61 = vpop.f32.mrb[161].mxu1  ;;  %6614 = vmatprep.subr.bf16.mxu0 %v7257_v52  ;;  %6293 = vmatpush3.bf16.msra.mxu1 %v7265_v53 }
 0x769   :  { %v3585_v63 = vadd.f32 %v9010_v27, %v3463_v61  ;;  %v3465_v57 = vpop.f32.mrb[162].mxu1  ;;  %4018 = vmatprep.mubr.bf16.mxu1 %v3695_v56  ;;  %6294 = vmatprep.subr.bf16.mxu1 %v7267_v55  ;;  %v9076_v55 = vld [vmem:[#allocation2 + $0x38] sm:$0xff]   ;;  %v9080_v56 = vld [vmem:[#allocation2 + $0x40] sm:$0xff]   ;;  %v7273_v61 = vld [vmem:[#allocation32 + $0x40] sm:$0xff]  }
 0x76a   :  { %v3586_v5 = vadd.f32 %v9007_v46, %v3465_v57  ;;  %v3467_v59 = vpop.f32.mrb[163].mxu1  ;;  %4019 = vmatmul.mubr.bf16.gmra.mrb[196].mxu1 %v3694_v48  ;;  %6583 = vmatmul.mubr.bf16.gmra.mrb[220].mxu0 %v9056_v7  ;;  %v3648_v11 = vmax.f32 %v3584_v60, 0.0 }
 0x76b   :  { %v3587_v9 = vadd.f32 %v9010_v27, %v3467_v59  ;;  %6586 = vmatprep.mubr.bf16.mxu0 %v9060_v0  ;;  %6615 = vmatpush3.bf16.msra.mxu0 %v7257_v52  ;;  %v3649_v15 = vmax.f32 %v3585_v63, 0.0 }
 0x76c   :  { %v3650_v2 = vmax.f32 %v3586_v5, 0.0  ;;  %6616 = vmatprep.subr.bf16.mxu0 %v7258_v62  ;;  %6295 = vmatpush3.bf16.msra.mxu1 %v7268_v14 }
 0x76d   :  { %v3651_v17 = vmax.f32 %v3587_v9, 0.0  ;;  %6296 = vmatprep.subr.bf16.mxu1 %v7269_v3 }
 0x76e   :  { %v3696_v20 = vpack.c.bf16 %v3650_v2, %v3648_v11 }
 0x76f   :  { %v3697_v21 = vpack.c.bf16 %v3651_v17, %v3649_v15  ;;  %v3471_v22 = vpop.f32.mrb[164].mxu1  ;;  %6617 = vmatpush3.bf16.msra.mxu0 %v7258_v62  ;;  %v9090_v17 = vld [vmem:[#allocation2 + $0x50] sm:$0xff]  }
 0x770   :  { %v3588_v23 = vadd.f32 %v9007_v46, %v3471_v22  ;;  %v3473_v16 = vpop.f32.mrb[165].mxu1  ;;  %6618 = vmatprep.subr.bf16.mxu0 %v7261_v12  ;;  %6297 = vmatpush3.bf16.msra.mxu1 %v7270_v6  ;;  %v9086_v6 = vld [vmem:[#allocation2 + $0x48] sm:$0xff]  }
 0x771   :  { %v3589_v50 = vadd.f32 %v9010_v27, %v3473_v16  ;;  %v3475_v51 = vpop.f32.mrb[166].mxu1  ;;  %4028 = vmatprep.mubr.bf16.mxu1 %v3697_v21  ;;  %6298 = vmatprep.subr.bf16.mxu1 %v7271_v19 }
 0x772   :  { %v3590_v24 = vadd.f32 %v9007_v46, %v3475_v51  ;;  %v3477_v32 = vpop.f32.mrb[167].mxu1  ;;  %4029 = vmatmul.mubr.bf16.gmra.mrb[200].mxu1 %v3696_v20  ;;  %6587 = vmatmul.mubr.bf16.gmra.mrb[224].mxu0 %v9066_v33  ;;  %v3652_v30 = vmax.f32 %v3588_v23, 0.0  ;;  %v7288_v51 = vld [vmem:[#allocation28 + $0x78] sm:$0xff]  }
 0x773   :  { %v3591_v26 = vadd.f32 %v9010_v27, %v3477_v32  ;;  %6590 = vmatprep.mubr.bf16.mxu0 %v9070_v34  ;;  %6619 = vmatpush3.bf16.msra.mxu0 %v7261_v12  ;;  %v3653_v39 = vmax.f32 %v3589_v50, 0.0  ;;  %v7290_v32 = vld [vmem:[#allocation28 + $0x38] sm:$0xff]  }
 0x774   :  { %v3654_v1 = vmax.f32 %v3590_v24, 0.0  ;;  %6620 = vmatprep.subr.bf16.mxu0 %v7262_v25  ;;  %6299 = vmatpush3.bf16.msra.mxu1 %v7272_v18 }
 0x775   :  { %v3655_v40 = vmax.f32 %v3591_v26, 0.0  ;;  %6300 = vmatprep.subr.bf16.mxu1 %v7274_v29 }
 0x776   :  { %v3698_v41 = vpack.c.bf16 %v3654_v1, %v3652_v30  ;;  %v9096_v1 = vld [vmem:[#allocation2 + $0x58] sm:$0xff]  }
 0x777   :  { %v3699_v43 = vpack.c.bf16 %v3655_v40, %v3653_v39  ;;  %v3481_v42 = vpop.f32.mrb[168].mxu1  ;;  %6621 = vmatpush3.bf16.msra.mxu0 %v7262_v25 }
 0x778   :  { %v3592_v44 = vadd.f32 %v9007_v46, %v3481_v42  ;;  %v3483_v28 = vpop.f32.mrb[169].mxu1  ;;  %6622 = vmatprep.subr.bf16.mxu0 %v7263_v13  ;;  %6301 = vmatpush3.bf16.msra.mxu1 %v7276_v37  ;;  %v9100_v37 = vld [vmem:[#allocation2 + $0x60] sm:$0xff]  }
 0x779   :  { %v3593_v52 = vadd.f32 %v9010_v27, %v3483_v28  ;;  %v3485_v53 = vpop.f32.mrb[170].mxu1  ;;  %4038 = vmatprep.mubr.bf16.mxu1 %v3699_v43  ;;  %6302 = vmatprep.subr.bf16.mxu1 %v7281_v35 }
 0x77a   :  { %v3594_v54 = vadd.f32 %v9007_v46, %v3485_v53  ;;  %v3487_v45 = vpop.f32.mrb[171].mxu1  ;;  %4039 = vmatmul.mubr.bf16.gmra.mrb[204].mxu1 %v3698_v41  ;;  %6591 = vmatmul.mubr.bf16.gmra.mrb[228].mxu0 %v9076_v55  ;;  %v3656_v58 = vmax.f32 %v3592_v44, 0.0 }
 0x77b   :  { %v3595_v48 = vadd.f32 %v9010_v27, %v3487_v45  ;;  %6594 = vmatprep.mubr.bf16.mxu0 %v9080_v56  ;;  %6623 = vmatpush3.bf16.msra.mxu0 %v7263_v13  ;;  %v3657_v62 = vmax.f32 %v3593_v52, 0.0  ;;  %v9106_v45 = vld [vmem:[#allocation2 + $0x68] sm:$0xff]  }
 0x77c   :  { %v3658_v60 = vmax.f32 %v3594_v54, 0.0  ;;  %6624 = vmatprep.subr.bf16.mxu0 %v7266_v38  ;;  %6303 = vmatpush3.bf16.msra.mxu1 %v7282_v49 }
 0x77d   :  { %v3659_v14 = vmax.f32 %v3595_v48, 0.0  ;;  %6304 = vmatprep.subr.bf16.mxu1 %v7288_v51 }
 0x77e   :  { %v3700_v63 = vpack.c.bf16 %v3658_v60, %v3656_v58  ;;  %v9110_v58 = vld [vmem:[#allocation2 + $0x70] sm:$0xff]  }
 0x77f   :  { %v3701_v57 = vpack.c.bf16 %v3659_v14, %v3657_v62  ;;  %v3491_v3 = vpop.f32.mrb[172].mxu1  ;;  %6625 = vmatpush3.bf16.msra.mxu0 %v7266_v38 }
 0x780   :  { %v3596_v5 = vadd.f32 %v9007_v46, %v3491_v3  ;;  %v3493_v59 = vpop.f32.mrb[173].mxu1  ;;  %6426 = vmatprep.subr.bf16.mxu0 %v7273_v61  ;;  %6305 = vmatpush3.bf16.msra.mxu1 %v7290_v32 }
 0x781   :  { %v3597_v9 = vadd.f32 %v9010_v27, %v3493_v59  ;;  %v3495_v11 = vpop.f32.mrb[174].mxu1  ;;  %4048 = vmatprep.mubr.bf16.mxu1 %v3701_v57 }
 0x782   :  { %v3598_v2 = vadd.f32 %v9007_v46, %v3495_v11  ;;  %v3497_v12 = vpop.f32.mrb[175].mxu1  ;;  %4049 = vmatmul.mubr.bf16.gmra.mrb[208].mxu1 %v3700_v63  ;;  %6595 = vmatmul.mubr.bf16.gmra.mrb[232].mxu0 %v9086_v6  ;;  %v3660_v19 = vmax.f32 %v3596_v5, 0.0 }
 0x783   :  { %v3599_v15 = vadd.f32 %v9010_v27, %v3497_v12  ;;  %6598 = vmatprep.mubr.bf16.mxu0 %v9090_v17  ;;  %v3661_v21 = vmax.f32 %v3597_v9, 0.0 }
 0x784   :  { %v3662_v20 = vmax.f32 %v3598_v2, 0.0 }
 0x785   :  { %v3663_v22 = vmax.f32 %v3599_v15, 0.0  ;;  %v9116_v15 = vld [vmem:[#allocation2 + $0x78] sm:$0xff]  }
 0x786   :  { %v3702_v23 = vpack.c.bf16 %v3662_v20, %v3660_v19 }
 0x787   :  { %v3703_v16 = vpack.c.bf16 %v3663_v22, %v3661_v21  ;;  %v3501_v25 = vpop.f32.mrb[176].mxu1 }
 0x788   :  { %v3600_v18 = vadd.f32 %v9007_v46, %v3501_v25  ;;  %v3503_v50 = vpop.f32.mrb[177].mxu1 }
 0x789   :  { %v3601_v29 = vadd.f32 %v9010_v27, %v3503_v50  ;;  %v3505_v24 = vpop.f32.mrb[178].mxu1  ;;  %4058 = vmatprep.mubr.bf16.mxu1 %v3703_v16  ;;  %v7275_v50 = vld [vmem:[#allocation32] sm:$0xff]  }
 0x78a   :  { %v3602_v26 = vadd.f32 %v9007_v46, %v3505_v24  ;;  %v3507_v30 = vpop.f32.mrb[179].mxu1  ;;  %4059 = vmatmul.mubr.bf16.gmra.mrb[212].mxu1 %v3702_v23  ;;  %6599 = vmatmul.mubr.bf16.gmra.mrb[236].mxu0 %v9096_v1  ;;  %v3664_v39 = vmax.f32 %v3600_v18, 0.0  ;;  %v7277_v24 = vld [vmem:[#allocation32 + $0x48] sm:$0xff]  }
 0x78b   :  { %v3603_v13 = vadd.f32 %v9010_v27, %v3507_v30  ;;  %6602 = vmatprep.mubr.bf16.mxu0 %v9100_v37  ;;  %v3665_v35 = vmax.f32 %v3601_v29, 0.0 }
 0x78c   :  { %v3666_v40 = vmax.f32 %v3602_v26, 0.0 }
 0x78d   :  { %v3667_v41 = vmax.f32 %v3603_v13, 0.0 }
 0x78e   :  { %v3704_v43 = vpack.c.bf16 %v3666_v40, %v3664_v39  ;;  %v7278_v39 = vld [vmem:[#allocation32 + $0x8] sm:$0xff]  }
 0x78f   :  { %v3705_v42 = vpack.c.bf16 %v3667_v41, %v3665_v35  ;;  %v3511_v44 = vpop.f32.mrb[180].mxu1  ;;  %v7279_v41 = vld [vmem:[#allocation32 + $0x50] sm:$0xff]  }
 0x790   :  { %v3604_v28 = vadd.f32 %v9007_v46, %v3511_v44  ;;  %v3513_v38 = vpop.f32.mrb[181].mxu1 }
 0x791   :  { %v3605_v49 = vadd.f32 %v9010_v27, %v3513_v38  ;;  %v3515_v52 = vpop.f32.mrb[182].mxu1  ;;  %4068 = vmatprep.mubr.bf16.mxu1 %v3705_v42  ;;  %v7283_v38 = vld [vmem:[#allocation32 + $0x58] sm:$0xff]  }
 0x792   :  { %v3606_v53 = vadd.f32 %v9007_v46, %v3515_v52  ;;  %v3517_v54 = vpop.f32.mrb[183].mxu1  ;;  %4069 = vmatmul.mubr.bf16.gmra.mrb[216].mxu1 %v3704_v43  ;;  %6603 = vmatmul.mubr.bf16.gmra.mrb[240].mxu0 %v9106_v45  ;;  %v3668_v60 = vmax.f32 %v3604_v28, 0.0  ;;  %v7289_v52 = vld [vmem:[#allocation32 + $0x28] sm:$0xff]  }
 0x793   :  { %v3607_v48 = vadd.f32 %v9010_v27, %v3517_v54  ;;  %6606 = vmatprep.mubr.bf16.mxu0 %v9110_v58  ;;  %v3669_v62 = vmax.f32 %v3605_v49, 0.0  ;;  %v7287_v49 = vld [vmem:[#allocation32 + $0x68] sm:$0xff]   ;;  %v7294_v54 = vld [vmem:[#allocation32 + $0x38] sm:$0xff]  }
 0x794   :  { %v3670_v61 = vmax.f32 %v3606_v53, 0.0  ;;  %v7291_v53 = vld [vmem:[#allocation32 + $0x70] sm:$0xff]  }
 0x795   :  { %v3671_v14 = vmax.f32 %v3607_v48, 0.0 }
 0x796   :  { %v3706_v63 = vpack.c.bf16 %v3670_v61, %v3668_v60 }
 0x797   :  { %v3707_v57 = vpack.c.bf16 %v3671_v14, %v3669_v62  ;;  %v3521_v3 = vpop.f32.mrb[184].mxu1 }
 0x798   :  { %v3608_v5 = vadd.f32 %v9007_v46, %v3521_v3  ;;  %v3523_v59 = vpop.f32.mrb[185].mxu1 }
 0x799   :  { %v3609_v9 = vadd.f32 %v9010_v27, %v3523_v59  ;;  %v3525_v11 = vpop.f32.mrb[186].mxu1  ;;  %4078 = vmatprep.mubr.bf16.mxu1 %v3707_v57  ;;  %v7296_v59 = vld [vmem:[#allocation35 + $0x8] sm:$0xff]  }
 0x79a   :  { %v3610_v2 = vadd.f32 %v9007_v46, %v3525_v11  ;;  %v3527_v12 = vpop.f32.mrb[187].mxu1  ;;  %4079 = vmatmul.mubr.bf16.gmra.mrb[220].mxu1 %v3706_v63  ;;  %6607 = vmatmul.mubr.bf16.gmra.mrb[244].mxu0 %v9116_v15  ;;  %v3672_v20 = vmax.f32 %v3608_v5, 0.0 }
 0x79b   :  { %v3611_v19 = vadd.f32 %v9010_v27, %v3527_v12  ;;  %6626 = vmatprep.mubr.bf16.mxu0 %v9040_v31  ;;  %v3673_v22 = vmax.f32 %v3609_v9, 0.0 }
 0x79c   :  { %v3674_v21 = vmax.f32 %v3610_v2, 0.0 }
 0x79d   :  { %v3675_v23 = vmax.f32 %v3611_v19, 0.0 }
 0x79e   :  { %v3708_v16 = vpack.c.bf16 %v3674_v21, %v3672_v20  ;;  %v7297_v21 = vld [vmem:[#allocation35 + $0x10] sm:$0xff]  }
 0x79f   :  { %v3709_v25 = vpack.c.bf16 %v3675_v23, %v3673_v22  ;;  %v3531_v18 = vpop.f32.mrb[188].mxu1 }
 0x7a0   :  { %v3612_v51 = vadd.f32 %v9007_v46, %v3531_v18  ;;  %v3533_v29 = vpop.f32.mrb[189].mxu1 }
 0x7a1   :  { %v3613_v32 = vadd.f32 %v9010_v27, %v3533_v29  ;;  %v3535_v26 = vpop.f32.mrb[190].mxu1  ;;  %4088 = vmatprep.mubr.bf16.mxu1 %v3709_v25  ;;  %v7298_v29 = vld [vmem:[#allocation35 + $0x18] sm:$0xff]  }
 0x7a2   :  { %v3614_v30 = vadd.f32 %v9007_v46, %v3535_v26  ;;  %v3537_v13 = vpop.f32.mrb[191].mxu1  ;;  %4089 = vmatmul.mubr.bf16.gmra.mrb[224].mxu1 %v3708_v16  ;;  %6627 = vmatmul.mubr.bf16.vlgmr.msra.gmra.mrb[248].mxu0 %v9046_v36  ;;  %v3676_v40 = vmax.f32 %v3612_v51, 0.0  ;;  %v7280_v46 = vld [vmem:[#allocation32 + $0x10] sm:$0xff]   ;;  %v7285_v36 = vld [vmem:[#allocation32 + $0x60] sm:$0xff]  }
 0x7a3   :  { %v3615_v31 = vadd.f32 %v9010_v27, %v3537_v13  ;;  %6630 = vmatprep.mubr.bf16.mxu0 %v9050_v47  ;;  %6427 = vmatpush3.bf16.msra.mxu0 %v7275_v50  ;;  %v3677_v43 = vmax.f32 %v3613_v32, 0.0  ;;  %v7284_v27 = vld [vmem:[#allocation32 + $0x18] sm:$0xff]   ;;  %v7286_v47 = vld [vmem:[#allocation32 + $0x20] sm:$0xff]  }
 0x7a4   :  { %v3678_v35 = vmax.f32 %v3614_v30, 0.0  ;;  %6428 = vmatprep.subr.bf16.mxu0 %v7277_v24 }
 0x7a5   :  { %v3679_v42 = vmax.f32 %v3615_v31, 0.0 }
 0x7a6   :  { %v3710_v44 = vpack.c.bf16 %v3678_v35, %v3676_v40 }
 0x7a7   :  { %v3711_v28 = vpack.c.bf16 %v3679_v42, %v3677_v43  ;;  %6429 = vmatpush3.bf16.msra.mxu0 %v7278_v39 }
 0x7a8   :  { %6430 = vmatprep.subr.bf16.mxu0 %v7279_v41 }
 0x7a9   :  { %4098 = vmatprep.mubr.bf16.mxu1 %v3711_v28 }
 0x7aa   :  { %4099 = vmatmul.mubr.bf16.gmra.mrb[228].mxu1 %v3710_v44  ;;  %6631 = vmatmul.mubr.bf16.gmra.mrb[252].mxu0 %v9056_v7  ;;  %v7292_v7 = vld [vmem:[#allocation32 + $0x30] sm:$0xff]  }
 0x7ab   :  { %6634 = vmatprep.mubr.bf16.mxu0 %v9060_v0  ;;  %6431 = vmatpush3.bf16.msra.mxu0 %v7280_v46  ;;  %v7293_v0 = vld [vmem:[#allocation32 + $0x78] sm:$0xff]  }
 0x7ac   :  { %6432 = vmatprep.subr.bf16.mxu0 %v7283_v38 }
 0x7af   :  { %6433 = vmatpush3.bf16.msra.mxu0 %v7284_v27 }
 0x7b0   :  { %6434 = vmatprep.subr.bf16.mxu0 %v7285_v36 }
 0x7b2   :  { %6635 = vmatmul.mubr.bf16.gmra.mrb[0].mxu0 %v9066_v33  ;;  %v3744_v33 = vld [vmem:[#allocation26] sm:$0x3] }
 0x7b3   :  { %6638 = vmatprep.mubr.bf16.mxu0 %v9070_v34  ;;  %6435 = vmatpush3.bf16.msra.mxu0 %v7286_v47  ;;  %v9141_v34 = vrot.slane %v3744_v33, %v8536_v8 }
 0x7b4   :  { %6436 = vmatprep.subr.bf16.mxu0 %v7287_v49 }
 0x7b7   :  { %6437 = vmatpush3.bf16.msra.mxu0 %v7289_v52 }
 0x7b8   :  { %6438 = vmatprep.subr.bf16.mxu0 %v7291_v53 }
 0x7ba   :  { %6639 = vmatmul.mubr.bf16.gmra.mrb[4].mxu0 %v9076_v55  ;;  %v9144_v55 = vrot.slane %v3744_v33, %v8538_v10 }
 0x7bb   :  { %6642 = vmatprep.mubr.bf16.mxu0 %v9080_v56  ;;  %6439 = vmatpush3.bf16.msra.mxu0 %v7292_v7 }
 0x7bc   :  { %6440 = vmatprep.subr.bf16.mxu0 %v7293_v0 }
 0x7bf   :  { %6441 = vmatpush3.bf16.msra.mxu0 %v7294_v54 }
 0x7c2   :  { %6643 = vmatmul.mubr.bf16.gmra.mrb[8].mxu0 %v9086_v6 }
 0x7c3   :  { %6646 = vmatprep.mubr.bf16.mxu0 %v9090_v17 }
 0x7ca   :  { %6647 = vmatmul.mubr.bf16.gmra.mrb[12].mxu0 %v9096_v1 }
 0x7cb   :  { %6650 = vmatprep.mubr.bf16.mxu0 %v9100_v37 }
 0x7d2   :  { %6651 = vmatmul.mubr.bf16.gmra.mrb[16].mxu0 %v9106_v45 }
 0x7d3   :  { %6654 = vmatprep.mubr.bf16.mxu0 %v9110_v58  ;;  %v7295_v58 = vld [vmem:[#allocation35] sm:$0xff]  }
 0x7d4   :  { %6658 = vmatprep.subr.bf16.mxu0 %v7295_v58 }
 0x7da   :  { %6655 = vmatmul.mubr.bf16.gmra.mrb[20].mxu0 %v9116_v15 }
 0x805   :  { %v3950_v56 = vpop.f32.mrb[192].mxu0 }
 0x806   :  { %v3951_v6 = vadd.f32 %v3950_v56, %v9141_v34  ;;  %v3952_v17 = vpop.f32.mrb[193].mxu0 }
 0x807   :  { %v3953_v1 = vadd.f32 %v3952_v17, %v9144_v55  ;;  %v3954_v37 = vpop.f32.mrb[194].mxu0 }
 0x808   :  { %v3955_v45 = vadd.f32 %v3954_v37, %v9141_v34  ;;  %v3956_v48 = vpop.f32.mrb[195].mxu0  ;;  %v4109_v61 = vmax.f32 %v3951_v6, 0.0 }
 0x809   :  { %v3957_v60 = vadd.f32 %v3956_v48, %v9144_v55  ;;  %v4110_v8 = vmax.f32 %v3953_v1, 0.0 }
 0x80a   :  { %v4111_v62 = vmax.f32 %v3955_v45, 0.0 }
 0x80b   :  { %v4112_v14 = vmax.f32 %v3957_v60, 0.0 }
 0x80c   :  { %v4173_v10 = vpack.c.bf16 %v4111_v62, %v4109_v61 }
 0x80d   :  { %v4174_v63 = vpack.c.bf16 %v4112_v14, %v4110_v8  ;;  %v3960_v57 = vpop.f32.mrb[196].mxu0 }
 0x80e   :  { %v3961_v3 = vadd.f32 %v3960_v57, %v9141_v34  ;;  %v3962_v5 = vpop.f32.mrb[197].mxu0 }
 0x80f   :  { %v3963_v9 = vadd.f32 %v3962_v5, %v9144_v55  ;;  %v3964_v11 = vpop.f32.mrb[198].mxu0  ;;  %4590 = vmatprep.mubr.bf16.mxu1 %v4174_v63  ;;  %5191 = vmatprep.mubr.bf16.mxu0 %v4174_v63 }
 0x810   :  { %v3965_v2 = vadd.f32 %v3964_v11, %v9141_v34  ;;  %v3966_v12 = vpop.f32.mrb[199].mxu0  ;;  %4591 = vmatmul.mubr.bf16.vlgmr.msra.gmra.mrb[232].mxu1 %v4173_v10  ;;  %5192 = vmatmul.mubr.bf16.vlgmr.msra.gmra.mrb[24].mxu0 %v4173_v10  ;;  %v4113_v19 = vmax.f32 %v3961_v3, 0.0 }
 0x811   :  { %v3967_v15 = vadd.f32 %v3966_v12, %v9144_v55  ;;  %6659 = vmatpush3.bf16.msra.mxu0 %v7295_v58  ;;  %v4114_v22 = vmax.f32 %v3963_v9, 0.0 }
 0x812   :  { %v4115_v20 = vmax.f32 %v3965_v2, 0.0  ;;  %6660 = vmatprep.subr.bf16.mxu0 %v7296_v59 }
 0x813   :  { %v4116_v23 = vmax.f32 %v3967_v15, 0.0 }
 0x814   :  { %v4175_v16 = vpack.c.bf16 %v4115_v20, %v4113_v19 }
 0x815   :  { %v4176_v25 = vpack.c.bf16 %v4116_v23, %v4114_v22  ;;  %v3970_v18 = vpop.f32.mrb[200].mxu0  ;;  %6661 = vmatpush3.bf16.msra.mxu0 %v7296_v59 }
 0x816   :  { %v3971_v50 = vadd.f32 %v3970_v18, %v9141_v34  ;;  %v3972_v51 = vpop.f32.mrb[201].mxu0  ;;  %6662 = vmatprep.subr.bf16.mxu0 %v7297_v21 }
 0x817   :  { %v3973_v24 = vadd.f32 %v3972_v51, %v9144_v55  ;;  %v3974_v32 = vpop.f32.mrb[202].mxu0  ;;  %4598 = vmatprep.mubr.bf16.mxu1 %v4176_v25  ;;  %5199 = vmatprep.mubr.bf16.mxu0 %v4176_v25 }
 0x818   :  { %v3975_v26 = vadd.f32 %v3974_v32, %v9141_v34  ;;  %v3976_v30 = vpop.f32.mrb[203].mxu0  ;;  %4599 = vmatmul.mubr.bf16.gmra.mrb[236].mxu1 %v4175_v16  ;;  %5200 = vmatmul.mubr.bf16.gmra.mrb[28].mxu0 %v4175_v16  ;;  %v4117_v31 = vmax.f32 %v3971_v50, 0.0 }
 0x819   :  { %v3977_v13 = vadd.f32 %v3976_v30, %v9144_v55  ;;  %6663 = vmatpush3.bf16.msra.mxu0 %v7297_v21  ;;  %v4118_v40 = vmax.f32 %v3973_v24, 0.0 }
 0x81a   :  { %v4119_v39 = vmax.f32 %v3975_v26, 0.0  ;;  %6664 = vmatprep.subr.bf16.mxu0 %v7298_v29 }
 0x81b   :  { %v4120_v35 = vmax.f32 %v3977_v13, 0.0 }
 0x81c   :  { %v4177_v41 = vpack.c.bf16 %v4119_v39, %v4117_v31 }
 0x81d   :  { %v4178_v43 = vpack.c.bf16 %v4120_v35, %v4118_v40  ;;  %v3980_v42 = vpop.f32.mrb[204].mxu0  ;;  %6665 = vmatpush3.bf16.msra.mxu0 %v7298_v29 }
 0x81e   :  { %v3981_v44 = vadd.f32 %v3980_v42, %v9141_v34  ;;  %v3982_v28 = vpop.f32.mrb[205].mxu0 }
 0x81f   :  { %v3983_v46 = vadd.f32 %v3982_v28, %v9144_v55  ;;  %v3984_v38 = vpop.f32.mrb[206].mxu0  ;;  %4606 = vmatprep.mubr.bf16.mxu1 %v4178_v43  ;;  %5207 = vmatprep.mubr.bf16.mxu0 %v4178_v43 }
 0x820   :  { %v3985_v27 = vadd.f32 %v3984_v38, %v9141_v34  ;;  %v3986_v36 = vpop.f32.mrb[207].mxu0  ;;  %4607 = vmatmul.mubr.bf16.gmra.mrb[240].mxu1 %v4177_v41  ;;  %5208 = vmatmul.mubr.bf16.gmra.mrb[32].mxu0 %v4177_v41  ;;  %v4121_v49 = vmax.f32 %v3981_v44, 0.0 }
 0x821   :  { %v3987_v47 = vadd.f32 %v3986_v36, %v9144_v55  ;;  %v4122_v53 = vmax.f32 %v3983_v46, 0.0 }
 0x822   :  { %v4123_v52 = vmax.f32 %v3985_v27, 0.0 }
 0x823   :  { %v4124_v7 = vmax.f32 %v3987_v47, 0.0 }
 0x824   :  { %v4179_v0 = vpack.c.bf16 %v4123_v52, %v4121_v49 }
 0x825   :  { %v4180_v54 = vpack.c.bf16 %v4124_v7, %v4122_v53  ;;  %v3990_v33 = vpop.f32.mrb[208].mxu0 }
 0x826   :  { %v3991_v56 = vadd.f32 %v3990_v33, %v9141_v34  ;;  %v3992_v6 = vpop.f32.mrb[209].mxu0 }
 0x827   :  { %v3993_v17 = vadd.f32 %v3992_v6, %v9144_v55  ;;  %v3994_v1 = vpop.f32.mrb[210].mxu0  ;;  %4614 = vmatprep.mubr.bf16.mxu1 %v4180_v54  ;;  %5215 = vmatprep.mubr.bf16.mxu0 %v4180_v54 }
 0x828   :  { %v3995_v37 = vadd.f32 %v3994_v1, %v9141_v34  ;;  %v3996_v45 = vpop.f32.mrb[211].mxu0  ;;  %4615 = vmatmul.mubr.bf16.gmra.mrb[244].mxu1 %v4179_v0  ;;  %5216 = vmatmul.mubr.bf16.gmra.mrb[36].mxu0 %v4179_v0  ;;  %v4125_v58 = vmax.f32 %v3991_v56, 0.0 }
 0x829   :  { %v3997_v48 = vadd.f32 %v3996_v45, %v9144_v55  ;;  %v4126_v61 = vmax.f32 %v3993_v17, 0.0 }
 0x82a   :  { %v4127_v60 = vmax.f32 %v3995_v37, 0.0 }
 0x82b   :  { %v4128_v62 = vmax.f32 %v3997_v48, 0.0 }
 0x82c   :  { %v4181_v8 = vpack.c.bf16 %v4127_v60, %v4125_v58 }
 0x82d   :  { %v4182_v14 = vpack.c.bf16 %v4128_v62, %v4126_v61  ;;  %v4000_v10 = vpop.f32.mrb[212].mxu0 }
 0x82e   :  { %v4001_v63 = vadd.f32 %v4000_v10, %v9141_v34  ;;  %v4002_v57 = vpop.f32.mrb[213].mxu0 }
 0x82f   :  { %v4003_v3 = vadd.f32 %v4002_v57, %v9144_v55  ;;  %v4004_v5 = vpop.f32.mrb[214].mxu0  ;;  %4622 = vmatprep.mubr.bf16.mxu1 %v4182_v14  ;;  %5223 = vmatprep.mubr.bf16.mxu0 %v4182_v14 }
 0x830   :  { %v4005_v59 = vadd.f32 %v4004_v5, %v9141_v34  ;;  %v4006_v9 = vpop.f32.mrb[215].mxu0  ;;  %4623 = vmatmul.mubr.bf16.gmra.mrb[248].mxu1 %v4181_v8  ;;  %5224 = vmatmul.mubr.bf16.gmra.mrb[40].mxu0 %v4181_v8  ;;  %v4129_v2 = vmax.f32 %v4001_v63, 0.0 }
 0x831   :  { %v4007_v11 = vadd.f32 %v4006_v9, %v9144_v55  ;;  %v4130_v15 = vmax.f32 %v4003_v3, 0.0 }
 0x832   :  { %v4131_v12 = vmax.f32 %v4005_v59, 0.0 }
 0x833   :  { %v4132_v19 = vmax.f32 %v4007_v11, 0.0 }
 0x834   :  { %v4183_v20 = vpack.c.bf16 %v4131_v12, %v4129_v2 }
 0x835   :  { %v4184_v21 = vpack.c.bf16 %v4132_v19, %v4130_v15  ;;  %v4010_v22 = vpop.f32.mrb[192].mxu1  ;;  %v9170_v23 = vpop.f32.mrb[216].mxu0 }
 0x836   :  { %v4011_v16 = vadd.f32 %v4010_v22, %v9141_v34  ;;  %v4012_v25 = vpop.f32.mrb[193].mxu1  ;;  %v9173_v18 = vpop.f32.mrb[217].mxu0 }
 0x837   :  { %v4013_v50 = vadd.f32 %v4012_v25, %v9144_v55  ;;  %v4014_v51 = vpop.f32.mrb[194].mxu1  ;;  %4630 = vmatprep.mubr.bf16.mxu1 %v4184_v21  ;;  %5231 = vmatprep.mubr.bf16.mxu0 %v4184_v21  ;;  %v9176_v29 = vpop.f32.mrb[218].mxu0 }
 0x838   :  { %v4015_v24 = vadd.f32 %v4014_v51, %v9141_v34  ;;  %v4016_v32 = vpop.f32.mrb[195].mxu1  ;;  %4631 = vmatmul.mubr.bf16.gmra.mrb[252].mxu1 %v4183_v20  ;;  %5232 = vmatmul.mubr.bf16.gmra.mrb[44].mxu0 %v4183_v20  ;;  %v9179_v26 = vpop.f32.mrb[219].mxu0  ;;  %v4133_v13 = vmax.f32 %v4011_v16, 0.0 }
 0x839   :  { %v4017_v30 = vadd.f32 %v4016_v32, %v9144_v55  ;;  %v4134_v39 = vmax.f32 %v4013_v50, 0.0 }
 0x83a   :  { %v4135_v31 = vmax.f32 %v4015_v24, 0.0 }
 0x83b   :  { %v4136_v40 = vmax.f32 %v4017_v30, 0.0 }
 0x83c   :  { %v4185_v35 = vpack.c.bf16 %v4135_v31, %v4133_v13 }
 0x83d   :  { %v4186_v41 = vpack.c.bf16 %v4136_v40, %v4134_v39  ;;  %v4020_v43 = vpop.f32.mrb[196].mxu1  ;;  %v9182_v42 = vpop.f32.mrb[220].mxu0 }
 0x83e   :  { %v4021_v44 = vadd.f32 %v4020_v43, %v9141_v34  ;;  %v4022_v28 = vpop.f32.mrb[197].mxu1  ;;  %v9185_v46 = vpop.f32.mrb[221].mxu0 }
 0x83f   :  { %v4023_v38 = vadd.f32 %v4022_v28, %v9144_v55  ;;  %v4024_v27 = vpop.f32.mrb[198].mxu1  ;;  %4638 = vmatprep.mubr.bf16.mxu1 %v4186_v41  ;;  %5239 = vmatprep.mubr.bf16.mxu0 %v4186_v41  ;;  %v9188_v36 = vpop.f32.mrb[222].mxu0 }
 0x840   :  { %v4025_v47 = vadd.f32 %v4024_v27, %v9141_v34  ;;  %v4026_v49 = vpop.f32.mrb[199].mxu1  ;;  %4639 = vmatmul.mubr.bf16.gmra.mrb[0].mxu1 %v4185_v35  ;;  %5240 = vmatmul.mubr.bf16.gmra.mrb[48].mxu0 %v4185_v35  ;;  %v9191_v52 = vpop.f32.mrb[223].mxu0  ;;  %v4137_v7 = vmax.f32 %v4021_v44, 0.0 }
 0x841   :  { %v4027_v53 = vadd.f32 %v4026_v49, %v9144_v55  ;;  %v4138_v54 = vmax.f32 %v4023_v38, 0.0 }
 0x842   :  { %v4139_v0 = vmax.f32 %v4025_v47, 0.0 }
 0x843   :  { %v4140_v33 = vmax.f32 %v4027_v53, 0.0 }
 0x844   :  { %v4187_v56 = vpack.c.bf16 %v4139_v0, %v4137_v7 }
 0x845   :  { %v4188_v6 = vpack.c.bf16 %v4140_v33, %v4138_v54  ;;  %v4030_v17 = vpop.f32.mrb[200].mxu1  ;;  %v9194_v1 = vpop.f32.mrb[224].mxu0 }
 0x846   :  { %v4031_v37 = vadd.f32 %v4030_v17, %v9141_v34  ;;  %v4032_v45 = vpop.f32.mrb[201].mxu1  ;;  %v9197_v48 = vpop.f32.mrb[225].mxu0 }
 0x847   :  { %v4033_v58 = vadd.f32 %v4032_v45, %v9144_v55  ;;  %v4034_v60 = vpop.f32.mrb[202].mxu1  ;;  %4646 = vmatprep.mubr.bf16.mxu1 %v4188_v6  ;;  %5247 = vmatprep.mubr.bf16.mxu0 %v4188_v6  ;;  %v9200_v61 = vpop.f32.mrb[226].mxu0 }
 0x848   :  { %v4035_v62 = vadd.f32 %v4034_v60, %v9141_v34  ;;  %v4036_v8 = vpop.f32.mrb[203].mxu1  ;;  %4647 = vmatmul.mubr.bf16.gmra.mrb[4].mxu1 %v4187_v56  ;;  %5248 = vmatmul.mubr.bf16.gmra.mrb[52].mxu0 %v4187_v56  ;;  %v9203_v14 = vpop.f32.mrb[227].mxu0  ;;  %v4141_v63 = vmax.f32 %v4031_v37, 0.0 }
 0x849   :  { %v4037_v10 = vadd.f32 %v4036_v8, %v9144_v55  ;;  %v4142_v3 = vmax.f32 %v4033_v58, 0.0 }
 0x84a   :  { %v4143_v57 = vmax.f32 %v4035_v62, 0.0 }
 0x84b   :  { %v4144_v5 = vmax.f32 %v4037_v10, 0.0 }
 0x84c   :  { %v4189_v59 = vpack.c.bf16 %v4143_v57, %v4141_v63 }
 0x84d   :  { %v4190_v9 = vpack.c.bf16 %v4144_v5, %v4142_v3  ;;  %v4040_v11 = vpop.f32.mrb[204].mxu1  ;;  %v9206_v2 = vpop.f32.mrb[228].mxu0 }
 0x84e   :  { %v4041_v12 = vadd.f32 %v4040_v11, %v9141_v34  ;;  %v4042_v15 = vpop.f32.mrb[205].mxu1  ;;  %v9209_v19 = vpop.f32.mrb[229].mxu0 }
 0x84f   :  { %v4043_v20 = vadd.f32 %v4042_v15, %v9144_v55  ;;  %v4044_v21 = vpop.f32.mrb[206].mxu1  ;;  %4654 = vmatprep.mubr.bf16.mxu1 %v4190_v9  ;;  %5255 = vmatprep.mubr.bf16.mxu0 %v4190_v9  ;;  %v9212_v22 = vpop.f32.mrb[230].mxu0 }
 0x850   :  { %v4045_v16 = vadd.f32 %v4044_v21, %v9141_v34  ;;  %v4046_v25 = vpop.f32.mrb[207].mxu1  ;;  %4655 = vmatmul.mubr.bf16.gmra.mrb[8].mxu1 %v4189_v59  ;;  %5256 = vmatmul.mubr.bf16.gmra.mrb[56].mxu0 %v4189_v59  ;;  %v9215_v50 = vpop.f32.mrb[231].mxu0  ;;  %v4145_v24 = vmax.f32 %v4041_v12, 0.0 }
 0x851   :  { %v4047_v51 = vadd.f32 %v4046_v25, %v9144_v55  ;;  %v4146_v30 = vmax.f32 %v4043_v20, 0.0 }
 0x852   :  { %v4147_v32 = vmax.f32 %v4045_v16, 0.0 }
 0x853   :  { %v4148_v13 = vmax.f32 %v4047_v51, 0.0 }
 0x854   :  { %v4191_v31 = vpack.c.bf16 %v4147_v32, %v4145_v24 }
 0x855   :  { %v4192_v39 = vpack.c.bf16 %v4148_v13, %v4146_v30  ;;  %v4050_v40 = vpop.f32.mrb[208].mxu1  ;;  %v9218_v35 = vpop.f32.mrb[232].mxu0 }
 0x856   :  { %v4051_v41 = vadd.f32 %v4050_v40, %v9141_v34  ;;  %v4052_v43 = vpop.f32.mrb[209].mxu1  ;;  %v9221_v44 = vpop.f32.mrb[233].mxu0 }
 0x857   :  { %v4053_v28 = vadd.f32 %v4052_v43, %v9144_v55  ;;  %v4054_v38 = vpop.f32.mrb[210].mxu1  ;;  %4662 = vmatprep.mubr.bf16.mxu1 %v4192_v39  ;;  %5263 = vmatprep.mubr.bf16.mxu0 %v4192_v39  ;;  %v9224_v27 = vpop.f32.mrb[234].mxu0  ;;  %v7299_v39 = vld [vmem:[#allocation35 + $0x20] sm:$0xff]  }
 0x858   :  { %v4055_v47 = vadd.f32 %v4054_v38, %v9141_v34  ;;  %v4056_v49 = vpop.f32.mrb[211].mxu1  ;;  %4663 = vmatmul.mubr.bf16.gmra.mrb[12].mxu1 %v4191_v31  ;;  %5264 = vmatmul.mubr.bf16.gmra.mrb[60].mxu0 %v4191_v31  ;;  %v9227_v53 = vpop.f32.mrb[235].mxu0  ;;  %v4149_v0 = vmax.f32 %v4051_v41, 0.0 }
 0x859   :  { %v4057_v7 = vadd.f32 %v4056_v49, %v9144_v55  ;;  %v4150_v33 = vmax.f32 %v4053_v28, 0.0  ;;  %6666 = vmatprep.subr.bf16.mxu0 %v7299_v39 }
 0x85a   :  { %v4151_v54 = vmax.f32 %v4055_v47, 0.0  ;;  %6667 = vmatpush3.bf16.msra.mxu0 %v7299_v39 }
 0x85b   :  { %v4152_v56 = vmax.f32 %v4057_v7, 0.0 }
 0x85c   :  { %v4193_v6 = vpack.c.bf16 %v4151_v54, %v4149_v0  ;;  %v7300_v0 = vld [vmem:[#allocation35 + $0x28] sm:$0xff]  }
 0x85d   :  { %v4194_v17 = vpack.c.bf16 %v4152_v56, %v4150_v33  ;;  %v4060_v37 = vpop.f32.mrb[212].mxu1  ;;  %v9230_v45 = vpop.f32.mrb[236].mxu0  ;;  %6668 = vmatprep.subr.bf16.mxu0 %v7300_v0 }
 0x85e   :  { %v4061_v58 = vadd.f32 %v4060_v37, %v9141_v34  ;;  %v4062_v60 = vpop.f32.mrb[213].mxu1  ;;  %v9233_v62 = vpop.f32.mrb[237].mxu0  ;;  %6669 = vmatpush3.bf16.msra.mxu0 %v7300_v0 }
 0x85f   :  { %v4063_v8 = vadd.f32 %v4062_v60, %v9144_v55  ;;  %v4064_v10 = vpop.f32.mrb[214].mxu1  ;;  %4670 = vmatprep.mubr.bf16.mxu1 %v4194_v17  ;;  %5271 = vmatprep.mubr.bf16.mxu0 %v4194_v17  ;;  %v9236_v63 = vpop.f32.mrb[238].mxu0 }
 0x860   :  { %v4065_v57 = vadd.f32 %v4064_v10, %v9141_v34  ;;  %v4066_v3 = vpop.f32.mrb[215].mxu1  ;;  %4671 = vmatmul.mubr.bf16.gmra.mrb[16].mxu1 %v4193_v6  ;;  %5272 = vmatmul.mubr.bf16.gmra.mrb[64].mxu0 %v4193_v6  ;;  %v9239_v5 = vpop.f32.mrb[239].mxu0  ;;  %v4153_v9 = vmax.f32 %v4061_v58, 0.0 }
 0x861   :  { %v4067_v59 = vadd.f32 %v4066_v3, %v9144_v55  ;;  %v4154_v12 = vmax.f32 %v4063_v8, 0.0 }
 0x862   :  { %v4155_v11 = vmax.f32 %v4065_v57, 0.0  ;;  %v7301_v57 = vld [vmem:[#allocation35 + $0x30] sm:$0xff]  }
 0x863   :  { %v4156_v15 = vmax.f32 %v4067_v59, 0.0  ;;  %6670 = vmatprep.subr.bf16.mxu0 %v7301_v57 }
 0x864   :  { %v4195_v20 = vpack.c.bf16 %v4155_v11, %v4153_v9  ;;  %6671 = vmatpush3.bf16.msra.mxu0 %v7301_v57 }
 0x865   :  { %v4196_v21 = vpack.c.bf16 %v4156_v15, %v4154_v12  ;;  %v4070_v16 = vpop.f32.mrb[216].mxu1  ;;  %v9242_v25 = vpop.f32.mrb[240].mxu0 }
 0x866   :  { %v4071_v51 = vadd.f32 %v4070_v16, %v9141_v34  ;;  %v4072_v24 = vpop.f32.mrb[217].mxu1  ;;  %v9245_v32 = vpop.f32.mrb[241].mxu0  ;;  %v7302_v16 = vld [vmem:[#allocation35 + $0x38] sm:$0xff]  }
 0x867   :  { %v4073_v30 = vadd.f32 %v4072_v24, %v9144_v55  ;;  %v4074_v13 = vpop.f32.mrb[218].mxu1  ;;  %4678 = vmatprep.mubr.bf16.mxu1 %v4196_v21  ;;  %5279 = vmatprep.mubr.bf16.mxu0 %v4196_v21  ;;  %v9248_v31 = vpop.f32.mrb[242].mxu0 }
 0x868   :  { %v4075_v40 = vadd.f32 %v4074_v13, %v9141_v34  ;;  %v4076_v41 = vpop.f32.mrb[219].mxu1  ;;  %4679 = vmatmul.mubr.bf16.gmra.mrb[20].mxu1 %v4195_v20  ;;  %5280 = vmatmul.mubr.bf16.gmra.mrb[68].mxu0 %v4195_v20  ;;  %v9251_v43 = vpop.f32.mrb[243].mxu0  ;;  %v4157_v38 = vmax.f32 %v4071_v51, 0.0 }
 0x869   :  { %v4077_v28 = vadd.f32 %v4076_v41, %v9144_v55  ;;  %v4158_v49 = vmax.f32 %v4073_v30, 0.0  ;;  %6672 = vmatprep.subr.bf16.mxu0 %v7302_v16 }
 0x86a   :  { %v4159_v47 = vmax.f32 %v4075_v40, 0.0  ;;  %6673 = vmatpush3.bf16.msra.mxu0 %v7302_v16 }
 0x86b   :  { %v4160_v7 = vmax.f32 %v4077_v28, 0.0 }
 0x86c   :  { %v4197_v54 = vpack.c.bf16 %v4159_v47, %v4157_v38 }
 0x86d   :  { %v4198_v33 = vpack.c.bf16 %v4160_v7, %v4158_v49  ;;  %v4080_v56 = vpop.f32.mrb[220].mxu1  ;;  %v9254_v6 = vpop.f32.mrb[244].mxu0 }
 0x86e   :  { %v4081_v17 = vadd.f32 %v4080_v56, %v9141_v34  ;;  %v4082_v37 = vpop.f32.mrb[221].mxu1  ;;  %v9257_v58 = vpop.f32.mrb[245].mxu0 }
 0x86f   :  { %v4083_v60 = vadd.f32 %v4082_v37, %v9144_v55  ;;  %v4084_v8 = vpop.f32.mrb[222].mxu1  ;;  %4686 = vmatprep.mubr.bf16.mxu1 %v4198_v33  ;;  %5287 = vmatprep.mubr.bf16.mxu0 %v4198_v33  ;;  %v9260_v10 = vpop.f32.mrb[246].mxu0 }
 0x870   :  { %v4085_v3 = vadd.f32 %v4084_v8, %v9141_v34  ;;  %v4086_v59 = vpop.f32.mrb[223].mxu1  ;;  %4687 = vmatmul.mubr.bf16.gmra.mrb[24].mxu1 %v4197_v54  ;;  %5288 = vmatmul.mubr.bf16.gmra.mrb[72].mxu0 %v4197_v54  ;;  %v9263_v9 = vpop.f32.mrb[247].mxu0  ;;  %v4161_v12 = vmax.f32 %v4081_v17, 0.0 }
 0x871   :  { %v4087_v11 = vadd.f32 %v4086_v59, %v9144_v55  ;;  %v4162_v20 = vmax.f32 %v4083_v60, 0.0 }
 0x872   :  { %v4163_v15 = vmax.f32 %v4085_v3, 0.0 }
 0x873   :  { %v4164_v21 = vmax.f32 %v4087_v11, 0.0 }
 0x874   :  { %v4199_v51 = vpack.c.bf16 %v4163_v15, %v4161_v12 }
 0x875   :  { %v4200_v24 = vpack.c.bf16 %v4164_v21, %v4162_v20  ;;  %v4090_v30 = vpop.f32.mrb[224].mxu1 }
 0x876   :  { %v4091_v13 = vadd.f32 %v4090_v30, %v9141_v34  ;;  %v4092_v39 = vpop.f32.mrb[225].mxu1 }
 0x877   :  { %v4093_v40 = vadd.f32 %v4092_v39, %v9144_v55  ;;  %v4094_v41 = vpop.f32.mrb[226].mxu1  ;;  %4694 = vmatprep.mubr.bf16.mxu1 %v4200_v24  ;;  %5295 = vmatprep.mubr.bf16.mxu0 %v4200_v24 }
 0x878   :  { %v4095_v28 = vadd.f32 %v4094_v41, %v9141_v34  ;;  %v4096_v38 = vpop.f32.mrb[227].mxu1  ;;  %4695 = vmatmul.mubr.bf16.gmra.mrb[28].mxu1 %v4199_v51  ;;  %5296 = vmatmul.mubr.bf16.gmra.mrb[76].mxu0 %v4199_v51  ;;  %v4165_v49 = vmax.f32 %v4091_v13, 0.0 }
 0x879   :  { %v4097_v47 = vadd.f32 %v4096_v38, %v9144_v55  ;;  %v4166_v0 = vmax.f32 %v4093_v40, 0.0 }
 0x87a   :  { %v4167_v7 = vmax.f32 %v4095_v28, 0.0 }
 0x87b   :  { %v4168_v54 = vmax.f32 %v4097_v47, 0.0 }
 0x87c   :  { %v4201_v33 = vpack.c.bf16 %v4167_v7, %v4165_v49 }
 0x87d   :  { %v4202_v56 = vpack.c.bf16 %v4168_v54, %v4166_v0  ;;  %v4100_v17 = vpop.f32.mrb[228].mxu1 }
 0x87e   :  { %v4101_v37 = vadd.f32 %v4100_v17, %v9141_v34  ;;  %v4102_v60 = vpop.f32.mrb[229].mxu1 }
 0x87f   :  { %v4103_v8 = vadd.f32 %v4102_v60, %v9144_v55  ;;  %v4104_v57 = vpop.f32.mrb[230].mxu1  ;;  %4702 = vmatprep.mubr.bf16.mxu1 %v4202_v56  ;;  %5303 = vmatprep.mubr.bf16.mxu0 %v4202_v56 }
 0x880   :  { %v4105_v3 = vadd.f32 %v4104_v57, %v9141_v34  ;;  %v4106_v59 = vpop.f32.mrb[231].mxu1  ;;  %4703 = vmatmul.mubr.bf16.gmra.mrb[32].mxu1 %v4201_v33  ;;  %5304 = vmatmul.mubr.bf16.gmra.mrb[80].mxu0 %v4201_v33  ;;  %v4169_v12 = vmax.f32 %v4101_v37, 0.0 }
 0x881   :  { %v4107_v11 = vadd.f32 %v4106_v59, %v9144_v55  ;;  %v4170_v20 = vmax.f32 %v4103_v8, 0.0  ;;  %v9276_v55 = vld [vmem:[#allocation31] ss:$0 sm:$0xff] }
 0x882   :  { %v4171_v15 = vmax.f32 %v4105_v3, 0.0 }
 0x883   :  { %v4172_v21 = vmax.f32 %v4107_v11, 0.0 }
 0x884   :  { %v4203_v16 = vpack.c.bf16 %v4171_v15, %v4169_v12 }
 0x885   :  { %v4204_v51 = vpack.c.bf16 %v4172_v21, %v4170_v20 }
 0x887   :  { %4710 = vmatprep.mubr.bf16.mxu1 %v4204_v51  ;;  %5311 = vmatprep.mubr.bf16.mxu0 %v4204_v51 }
 0x888   :  { %4711 = vmatmul.mubr.bf16.gmra.mrb[36].mxu1 %v4203_v16  ;;  %5312 = vmatmul.mubr.bf16.gmra.mrb[84].mxu0 %v4203_v16 }
 0x8e3   :  { %v6306_v24 = vpop.f32.mrb[232].mxu1  ;;  %v6442_v30 = vpop.f32.mrb[24].mxu0 }
 0x8e4   :  { %v6307_v13 = vpop.f32.mrb[233].mxu1  ;;  %v6443_v39 = vpop.f32.mrb[25].mxu0 }
 0x8e5   :  { %v6308_v34 = vadd.f32 %v6307_v13, %v6306_v24  ;;  %v9274_v40 = vadd.f32 %v6443_v39, %v6442_v30  ;;  %v6309_v41 = vpop.f32.mrb[234].mxu1  ;;  %v6445_v28 = vpop.f32.mrb[26].mxu0 }
 0x8e6   :  { %v6310_v38 = vpop.f32.mrb[235].mxu1  ;;  %v6446_v47 = vpop.f32.mrb[27].mxu0 }
 0x8e7   :  { %v4593_v49 = vadd.f32 %v6308_v34, %v9173_v18  ;;  %v6311_v7 = vadd.f32 %v6310_v38, %v6309_v41  ;;  %v9279_v0 = vadd.f32 %v6446_v47, %v6445_v28 }
 0x8e9   :  { %v4726_v54 = vadd.f32 %v9276_v55, %v4593_v49  ;;  %v4596_v33 = vadd.f32 %v6311_v7, %v9179_v26 }
 0x8eb   :  { %v4727_v56 = vadd.f32 %v9276_v55, %v4596_v33  ;;  %v6312_v17 = vpop.f32.mrb[236].mxu1  ;;  %v6448_v37 = vpop.f32.mrb[28].mxu0  ;;  %v4758_v57 = vmax.f32 %v4726_v54, 0.0 }
 0x8ec   :  { %v6313_v60 = vpop.f32.mrb[237].mxu1  ;;  %v6449_v8 = vpop.f32.mrb[29].mxu0 }
 0x8ed   :  { %v4759_v3 = vmax.f32 %v4727_v56, 0.0  ;;  %v6314_v59 = vadd.f32 %v6313_v60, %v6312_v17  ;;  %v9284_v11 = vadd.f32 %v6449_v8, %v6448_v37  ;;  %v6315_v12 = vpop.f32.mrb[238].mxu1  ;;  %v6451_v18 = vpop.f32.mrb[30].mxu0 }
 0x8ee   :  { %v6316_v15 = vpop.f32.mrb[239].mxu1  ;;  %v6452_v20 = vpop.f32.mrb[31].mxu0 }
 0x8ef   :  { %v4601_v21 = vadd.f32 %v9170_v23, %v6314_v59  ;;  %v6317_v16 = vadd.f32 %v6316_v15, %v6315_v12  ;;  %v9287_v51 = vadd.f32 %v6452_v20, %v6451_v18  ;;  %v4790_v26 = vpack.c.bf16 %v4759_v3, %v4758_v57 }
 0x8f1   :  { %v4728_v24 = vadd.f32 %v9276_v55, %v4601_v21  ;;  %v4604_v30 = vadd.f32 %v9176_v29, %v6317_v16  ;;  %6674 = vmatprep.mubr.bf16.mxu0 %v4790_v26 }
 0x8f3   :  { %v4729_v13 = vadd.f32 %v9276_v55, %v4604_v30  ;;  %v6318_v39 = vpop.f32.mrb[240].mxu1  ;;  %v6454_v34 = vpop.f32.mrb[32].mxu0  ;;  %v4760_v38 = vmax.f32 %v4728_v24, 0.0 }
 0x8f4   :  { %v6319_v41 = vpop.f32.mrb[241].mxu1  ;;  %v6455_v28 = vpop.f32.mrb[33].mxu0 }
 0x8f5   :  { %v4761_v47 = vmax.f32 %v4729_v13, 0.0  ;;  %v6320_v49 = vadd.f32 %v6319_v41, %v6318_v39  ;;  %v9292_v7 = vadd.f32 %v6455_v28, %v6454_v34  ;;  %v6321_v23 = vpop.f32.mrb[242].mxu1  ;;  %v6457_v54 = vpop.f32.mrb[34].mxu0 }
 0x8f6   :  { %v6322_v33 = vpop.f32.mrb[243].mxu1  ;;  %v6458_v56 = vpop.f32.mrb[35].mxu0 }
 0x8f7   :  { %v4791_v17 = vpack.c.bf16 %v4761_v47, %v4760_v38  ;;  %v4609_v37 = vadd.f32 %v6320_v49, %v9185_v46  ;;  %v6323_v29 = vadd.f32 %v6322_v33, %v6321_v23  ;;  %v9295_v60 = vadd.f32 %v6458_v56, %v6457_v54 }
 0x8f9   :  { %v4730_v8 = vadd.f32 %v9276_v55, %v4609_v37  ;;  %v4612_v57 = vadd.f32 %v6323_v29, %v9191_v52  ;;  %6675 = vmatmul.mubr.bf16.vlgmr.msra.gmra.mrb[248].mxu0 %v4791_v17 }
 0x8fb   :  { %v4731_v3 = vadd.f32 %v9276_v55, %v4612_v57  ;;  %v6324_v59 = vpop.f32.mrb[244].mxu1  ;;  %v6460_v12 = vpop.f32.mrb[36].mxu0  ;;  %v4762_v20 = vmax.f32 %v4730_v8, 0.0 }
 0x8fc   :  { %v6325_v18 = vpop.f32.mrb[245].mxu1  ;;  %v6461_v15 = vpop.f32.mrb[37].mxu0 }
 0x8fd   :  { %v4763_v21 = vmax.f32 %v4731_v3, 0.0  ;;  %v6326_v16 = vadd.f32 %v6325_v18, %v6324_v59  ;;  %v9300_v26 = vadd.f32 %v6461_v15, %v6460_v12  ;;  %v6327_v46 = vpop.f32.mrb[246].mxu1  ;;  %v6463_v24 = vpop.f32.mrb[38].mxu0 }
 0x8fe   :  { %v6328_v30 = vpop.f32.mrb[247].mxu1  ;;  %v6464_v13 = vpop.f32.mrb[39].mxu0 }
 0x8ff   :  { %v4617_v39 = vadd.f32 %v9182_v42, %v6326_v16  ;;  %v6329_v34 = vadd.f32 %v6328_v30, %v6327_v46  ;;  %v9303_v52 = vadd.f32 %v6464_v13, %v6463_v24  ;;  %v4792_v41 = vpack.c.bf16 %v4763_v21, %v4762_v20 }
 0x901   :  { %v4732_v28 = vadd.f32 %v9276_v55, %v4617_v39  ;;  %v4620_v38 = vadd.f32 %v9188_v36, %v6329_v34  ;;  %6678 = vmatprep.mubr.bf16.mxu0 %v4792_v41 }
 0x903   :  { %v4733_v47 = vadd.f32 %v9276_v55, %v4620_v38  ;;  %v6330_v49 = vpop.f32.mrb[248].mxu1  ;;  %v6466_v23 = vpop.f32.mrb[40].mxu0  ;;  %v4764_v56 = vmax.f32 %v4732_v28, 0.0 }
 0x904   :  { %v6331_v54 = vpop.f32.mrb[249].mxu1  ;;  %v6467_v33 = vpop.f32.mrb[41].mxu0 }
 0x905   :  { %v4765_v17 = vmax.f32 %v4733_v47, 0.0  ;;  %v6332_v37 = vadd.f32 %v6331_v54, %v6330_v49  ;;  %v9308_v29 = vadd.f32 %v6467_v33, %v6466_v23  ;;  %v6333_v42 = vpop.f32.mrb[250].mxu1  ;;  %v6469_v8 = vpop.f32.mrb[42].mxu0 }
 0x906   :  { %v6334_v57 = vpop.f32.mrb[251].mxu1  ;;  %v6470_v3 = vpop.f32.mrb[43].mxu0 }
 0x907   :  { %v4625_v59 = vadd.f32 %v6332_v37, %v9197_v48  ;;  %v6335_v12 = vadd.f32 %v6334_v57, %v6333_v42  ;;  %v9311_v36 = vadd.f32 %v6470_v3, %v6469_v8  ;;  %v4793_v18 = vpack.c.bf16 %v4765_v17, %v4764_v56 }
 0x909   :  { %v4734_v15 = vadd.f32 %v9276_v55, %v4625_v59  ;;  %v4628_v20 = vadd.f32 %v6335_v12, %v9203_v14  ;;  %6679 = vmatmul.mubr.bf16.gmra.mrb[252].mxu0 %v4793_v18 }
 0x90b   :  { %v4735_v21 = vadd.f32 %v9276_v55, %v4628_v20  ;;  %v6336_v16 = vpop.f32.mrb[252].mxu1  ;;  %v6472_v46 = vpop.f32.mrb[44].mxu0  ;;  %v4766_v13 = vmax.f32 %v4734_v15, 0.0 }
 0x90c   :  { %v6337_v24 = vpop.f32.mrb[253].mxu1  ;;  %v6473_v30 = vpop.f32.mrb[45].mxu0 }
 0x90d   :  { %v4767_v39 = vmax.f32 %v4735_v21, 0.0  ;;  %v6338_v34 = vadd.f32 %v6337_v24, %v6336_v16  ;;  %v9316_v41 = vadd.f32 %v6473_v30, %v6472_v46  ;;  %v6339_v48 = vpop.f32.mrb[254].mxu1  ;;  %v6475_v28 = vpop.f32.mrb[46].mxu0 }
 0x90e   :  { %v6340_v38 = vpop.f32.mrb[255].mxu1  ;;  %v6476_v47 = vpop.f32.mrb[47].mxu0 }
 0x90f   :  { %v4633_v49 = vadd.f32 %v9194_v1, %v6338_v34  ;;  %v6341_v23 = vadd.f32 %v6340_v38, %v6339_v48  ;;  %v9319_v14 = vadd.f32 %v6476_v47, %v6475_v28  ;;  %v4794_v54 = vpack.c.bf16 %v4767_v39, %v4766_v13 }
 0x911   :  { %v4736_v33 = vadd.f32 %v9276_v55, %v4633_v49  ;;  %v4636_v56 = vadd.f32 %v9200_v61, %v6341_v23  ;;  %6682 = vmatprep.mubr.bf16.mxu0 %v4794_v54 }
 0x913   :  { %v4737_v17 = vadd.f32 %v9276_v55, %v4636_v56  ;;  %v6342_v37 = vpop.f32.mrb[0].mxu1  ;;  %v6478_v42 = vpop.f32.mrb[48].mxu0  ;;  %v4768_v3 = vmax.f32 %v4736_v33, 0.0 }
 0x914   :  { %v6343_v8 = vpop.f32.mrb[1].mxu1  ;;  %v6479_v57 = vpop.f32.mrb[49].mxu0 }
 0x915   :  { %v4769_v59 = vmax.f32 %v4737_v17, 0.0  ;;  %v6344_v12 = vadd.f32 %v6343_v8, %v6342_v37  ;;  %v9324_v18 = vadd.f32 %v6479_v57, %v6478_v42  ;;  %v6345_v1 = vpop.f32.mrb[2].mxu1  ;;  %v6481_v15 = vpop.f32.mrb[50].mxu0 }
 0x916   :  { %v6346_v20 = vpop.f32.mrb[3].mxu1  ;;  %v6482_v21 = vpop.f32.mrb[51].mxu0 }
 0x917   :  { %v4795_v16 = vpack.c.bf16 %v4769_v59, %v4768_v3  ;;  %v4641_v46 = vadd.f32 %v6344_v12, %v9209_v19  ;;  %v6347_v61 = vadd.f32 %v6346_v20, %v6345_v1  ;;  %v9327_v24 = vadd.f32 %v6482_v21, %v6481_v15 }
 0x919   :  { %v4738_v30 = vadd.f32 %v9276_v55, %v4641_v46  ;;  %v4644_v13 = vadd.f32 %v6347_v61, %v9215_v50  ;;  %6683 = vmatmul.mubr.bf16.gmra.mrb[0].mxu0 %v4795_v16 }
 0x91b   :  { %v4739_v39 = vadd.f32 %v9276_v55, %v4644_v13  ;;  %v6348_v34 = vpop.f32.mrb[4].mxu1  ;;  %v6484_v48 = vpop.f32.mrb[52].mxu0  ;;  %v4770_v47 = vmax.f32 %v4738_v30, 0.0 }
 0x91c   :  { %v6349_v28 = vpop.f32.mrb[5].mxu1  ;;  %v6485_v38 = vpop.f32.mrb[53].mxu0 }
 0x91d   :  { %v4771_v49 = vmax.f32 %v4739_v39, 0.0  ;;  %v6350_v23 = vadd.f32 %v6349_v28, %v6348_v34  ;;  %v9332_v54 = vadd.f32 %v6485_v38, %v6484_v48  ;;  %v6351_v19 = vpop.f32.mrb[6].mxu1  ;;  %v6487_v33 = vpop.f32.mrb[54].mxu0 }
 0x91e   :  { %v6352_v56 = vpop.f32.mrb[7].mxu1  ;;  %v6488_v17 = vpop.f32.mrb[55].mxu0 }
 0x91f   :  { %v4649_v37 = vadd.f32 %v9206_v2, %v6350_v23  ;;  %v6353_v42 = vadd.f32 %v6352_v56, %v6351_v19  ;;  %v9335_v50 = vadd.f32 %v6488_v17, %v6487_v33  ;;  %v4796_v8 = vpack.c.bf16 %v4771_v49, %v4770_v47 }
 0x921   :  { %v4740_v57 = vadd.f32 %v9276_v55, %v4649_v37  ;;  %v4652_v3 = vadd.f32 %v9212_v22, %v6353_v42  ;;  %6686 = vmatprep.mubr.bf16.mxu0 %v4796_v8 }
 0x923   :  { %v4741_v59 = vadd.f32 %v9276_v55, %v4652_v3  ;;  %v6354_v12 = vpop.f32.mrb[8].mxu1  ;;  %v6490_v1 = vpop.f32.mrb[56].mxu0  ;;  %v4772_v21 = vmax.f32 %v4740_v57, 0.0 }
 0x924   :  { %v6355_v15 = vpop.f32.mrb[9].mxu1  ;;  %v6491_v20 = vpop.f32.mrb[57].mxu0 }
 0x925   :  { %v4773_v16 = vmax.f32 %v4741_v59, 0.0  ;;  %v6356_v46 = vadd.f32 %v6355_v15, %v6354_v12  ;;  %v9340_v61 = vadd.f32 %v6491_v20, %v6490_v1  ;;  %v6357_v2 = vpop.f32.mrb[10].mxu1  ;;  %v6493_v30 = vpop.f32.mrb[58].mxu0 }
 0x926   :  { %v6358_v13 = vpop.f32.mrb[11].mxu1  ;;  %v6494_v39 = vpop.f32.mrb[59].mxu0 }
 0x927   :  { %v4797_v34 = vpack.c.bf16 %v4773_v16, %v4772_v21  ;;  %v4657_v48 = vadd.f32 %v6356_v46, %v9221_v44  ;;  %v6359_v22 = vadd.f32 %v6358_v13, %v6357_v2  ;;  %v9343_v28 = vadd.f32 %v6494_v39, %v6493_v30 }
 0x929   :  { %v4742_v38 = vadd.f32 %v9276_v55, %v4657_v48  ;;  %v4660_v47 = vadd.f32 %v6359_v22, %v9227_v53  ;;  %6687 = vmatmul.mubr.bf16.gmra.mrb[4].mxu0 %v4797_v34 }
 0x92b   :  { %v4743_v49 = vadd.f32 %v9276_v55, %v4660_v47  ;;  %v6360_v23 = vpop.f32.mrb[12].mxu1  ;;  %v6496_v19 = vpop.f32.mrb[60].mxu0  ;;  %v4774_v17 = vmax.f32 %v4742_v38, 0.0 }
 0x92c   :  { %v6361_v33 = vpop.f32.mrb[13].mxu1  ;;  %v6497_v56 = vpop.f32.mrb[61].mxu0 }
 0x92d   :  { %v4775_v37 = vmax.f32 %v4743_v49, 0.0  ;;  %v6362_v42 = vadd.f32 %v6361_v33, %v6360_v23  ;;  %v9348_v8 = vadd.f32 %v6497_v56, %v6496_v19  ;;  %v6363_v44 = vpop.f32.mrb[14].mxu1  ;;  %v6499_v57 = vpop.f32.mrb[62].mxu0 }
 0x92e   :  { %v6364_v3 = vpop.f32.mrb[15].mxu1  ;;  %v6500_v59 = vpop.f32.mrb[63].mxu0 }
 0x92f   :  { %v4665_v12 = vadd.f32 %v9218_v35, %v6362_v42  ;;  %v6365_v1 = vadd.f32 %v6364_v3, %v6363_v44  ;;  %v9351_v53 = vadd.f32 %v6500_v59, %v6499_v57  ;;  %v4798_v15 = vpack.c.bf16 %v4775_v37, %v4774_v17 }
 0x931   :  { %v4744_v20 = vadd.f32 %v9276_v55, %v4665_v12  ;;  %v4668_v21 = vadd.f32 %v9224_v27, %v6365_v1  ;;  %6690 = vmatprep.mubr.bf16.mxu0 %v4798_v15 }
 0x933   :  { %v4745_v16 = vadd.f32 %v9276_v55, %v4668_v21  ;;  %v6366_v46 = vpop.f32.mrb[16].mxu1  ;;  %v6502_v2 = vpop.f32.mrb[64].mxu0  ;;  %v4776_v39 = vmax.f32 %v4744_v20, 0.0 }
 0x934   :  { %v6367_v30 = vpop.f32.mrb[17].mxu1  ;;  %v6503_v13 = vpop.f32.mrb[65].mxu0 }
 0x935   :  { %v4777_v34 = vmax.f32 %v4745_v16, 0.0  ;;  %v6368_v48 = vadd.f32 %v6367_v30, %v6366_v46  ;;  %v9356_v22 = vadd.f32 %v6503_v13, %v6502_v2  ;;  %v6369_v35 = vpop.f32.mrb[18].mxu1  ;;  %v6505_v38 = vpop.f32.mrb[66].mxu0 }
 0x936   :  { %v6370_v47 = vpop.f32.mrb[19].mxu1  ;;  %v6506_v49 = vpop.f32.mrb[67].mxu0 }
 0x937   :  { %v4799_v23 = vpack.c.bf16 %v4777_v34, %v4776_v39  ;;  %v4673_v19 = vadd.f32 %v6368_v48, %v9233_v62  ;;  %v6371_v27 = vadd.f32 %v6370_v47, %v6369_v35  ;;  %v9359_v33 = vadd.f32 %v6506_v49, %v6505_v38 }
 0x939   :  { %v4746_v56 = vadd.f32 %v9276_v55, %v4673_v19  ;;  %v4676_v17 = vadd.f32 %v6371_v27, %v9239_v5  ;;  %6691 = vmatmul.mubr.bf16.gmra.mrb[8].mxu0 %v4799_v23 }
 0x93b   :  { %v4747_v37 = vadd.f32 %v9276_v55, %v4676_v17  ;;  %v6372_v42 = vpop.f32.mrb[20].mxu1  ;;  %v6508_v44 = vpop.f32.mrb[68].mxu0  ;;  %v4778_v59 = vmax.f32 %v4746_v56, 0.0 }
 0x93c   :  { %v6373_v57 = vpop.f32.mrb[21].mxu1  ;;  %v6509_v3 = vpop.f32.mrb[69].mxu0 }
 0x93d   :  { %v4779_v12 = vmax.f32 %v4747_v37, 0.0  ;;  %v6374_v1 = vadd.f32 %v6373_v57, %v6372_v42  ;;  %v9364_v15 = vadd.f32 %v6509_v3, %v6508_v44  ;;  %v6375_v62 = vpop.f32.mrb[22].mxu1  ;;  %v6511_v20 = vpop.f32.mrb[70].mxu0 }
 0x93e   :  { %v6376_v21 = vpop.f32.mrb[23].mxu1  ;;  %v6512_v16 = vpop.f32.mrb[71].mxu0 }
 0x93f   :  { %v4681_v46 = vadd.f32 %v9230_v45, %v6374_v1  ;;  %v6377_v2 = vadd.f32 %v6376_v21, %v6375_v62  ;;  %v9367_v5 = vadd.f32 %v6512_v16, %v6511_v20  ;;  %v4800_v30 = vpack.c.bf16 %v4779_v12, %v4778_v59 }
 0x941   :  { %v4748_v13 = vadd.f32 %v9276_v55, %v4681_v46  ;;  %v4684_v39 = vadd.f32 %v9236_v63, %v6377_v2  ;;  %6694 = vmatprep.mubr.bf16.mxu0 %v4800_v30 }
 0x943   :  { %v4749_v34 = vadd.f32 %v9276_v55, %v4684_v39  ;;  %v6378_v48 = vpop.f32.mrb[24].mxu1  ;;  %v6514_v35 = vpop.f32.mrb[72].mxu0  ;;  %v4780_v49 = vmax.f32 %v4748_v13, 0.0 }
 0x944   :  { %v6379_v38 = vpop.f32.mrb[25].mxu1  ;;  %v6515_v47 = vpop.f32.mrb[73].mxu0 }
 0x945   :  { %v4781_v23 = vmax.f32 %v4749_v34, 0.0  ;;  %v6380_v19 = vadd.f32 %v6379_v38, %v6378_v48  ;;  %v9372_v27 = vadd.f32 %v6515_v47, %v6514_v35  ;;  %v6381_v45 = vpop.f32.mrb[26].mxu1  ;;  %v6517_v56 = vpop.f32.mrb[74].mxu0 }
 0x946   :  { %v6382_v17 = vpop.f32.mrb[27].mxu1  ;;  %v6518_v37 = vpop.f32.mrb[75].mxu0 }
 0x947   :  { %v4801_v42 = vpack.c.bf16 %v4781_v23, %v4780_v49  ;;  %v4689_v44 = vadd.f32 %v6380_v19, %v9245_v32  ;;  %v6383_v63 = vadd.f32 %v6382_v17, %v6381_v45  ;;  %v9375_v57 = vadd.f32 %v6518_v37, %v6517_v56 }
 0x949   :  { %v4750_v3 = vadd.f32 %v9276_v55, %v4689_v44  ;;  %v4692_v59 = vadd.f32 %v6383_v63, %v9251_v43  ;;  %6695 = vmatmul.mubr.bf16.gmra.mrb[12].mxu0 %v4801_v42 }
 0x94b   :  { %v4751_v12 = vadd.f32 %v9276_v55, %v4692_v59  ;;  %v6384_v1 = vpop.f32.mrb[28].mxu1  ;;  %v6520_v62 = vpop.f32.mrb[76].mxu0  ;;  %v4782_v16 = vmax.f32 %v4750_v3, 0.0 }
 0x94c   :  { %v6385_v20 = vpop.f32.mrb[29].mxu1  ;;  %v6521_v21 = vpop.f32.mrb[77].mxu0 }
 0x94d   :  { %v4783_v46 = vmax.f32 %v4751_v12, 0.0  ;;  %v6386_v2 = vadd.f32 %v6385_v20, %v6384_v1  ;;  %v9380_v30 = vadd.f32 %v6521_v21, %v6520_v62  ;;  %v6387_v32 = vpop.f32.mrb[30].mxu1  ;;  %v6523_v13 = vpop.f32.mrb[78].mxu0 }
 0x94e   :  { %v6388_v39 = vpop.f32.mrb[31].mxu1  ;;  %v6524_v34 = vpop.f32.mrb[79].mxu0 }
 0x94f   :  { %v4697_v48 = vadd.f32 %v9242_v25, %v6386_v2  ;;  %v6389_v35 = vadd.f32 %v6388_v39, %v6387_v32  ;;  %v9383_v43 = vadd.f32 %v6524_v34, %v6523_v13  ;;  %v4802_v38 = vpack.c.bf16 %v4783_v46, %v4782_v16 }
 0x951   :  { %v4752_v47 = vadd.f32 %v9276_v55, %v4697_v48  ;;  %v4700_v49 = vadd.f32 %v9248_v31, %v6389_v35  ;;  %6698 = vmatprep.mubr.bf16.mxu0 %v4802_v38 }
 0x953   :  { %v4753_v23 = vadd.f32 %v9276_v55, %v4700_v49  ;;  %v6390_v19 = vpop.f32.mrb[32].mxu1  ;;  %v6526_v45 = vpop.f32.mrb[80].mxu0  ;;  %v4784_v37 = vmax.f32 %v4752_v47, 0.0 }
 0x954   :  { %v6391_v56 = vpop.f32.mrb[33].mxu1  ;;  %v6527_v17 = vpop.f32.mrb[81].mxu0 }
 0x955   :  { %v4785_v42 = vmax.f32 %v4753_v23, 0.0  ;;  %v6392_v44 = vadd.f32 %v6391_v56, %v6390_v19  ;;  %v9388_v63 = vadd.f32 %v6527_v17, %v6526_v45  ;;  %v6393_v25 = vpop.f32.mrb[34].mxu1  ;;  %v6529_v3 = vpop.f32.mrb[82].mxu0 }
 0x956   :  { %v6394_v59 = vpop.f32.mrb[35].mxu1  ;;  %v6530_v12 = vpop.f32.mrb[83].mxu0 }
 0x957   :  { %v4803_v1 = vpack.c.bf16 %v4785_v42, %v4784_v37  ;;  %v4705_v62 = vadd.f32 %v6392_v44, %v9257_v58  ;;  %v6395_v31 = vadd.f32 %v6394_v59, %v6393_v25  ;;  %v9391_v20 = vadd.f32 %v6530_v12, %v6529_v3  ;;  %v9404_v12 = vld [vmem:[#allocation37] ss:$0 sm:$0xff] }
 0x959   :  { %v4754_v21 = vadd.f32 %v9276_v55, %v4705_v62  ;;  %v4708_v16 = vadd.f32 %v6395_v31, %v9263_v9  ;;  %6699 = vmatmul.mubr.bf16.gmra.mrb[16].mxu0 %v4803_v1 }
 0x95b   :  { %v4755_v46 = vadd.f32 %v9276_v55, %v4708_v16  ;;  %v6396_v2 = vpop.f32.mrb[36].mxu1  ;;  %v6532_v32 = vpop.f32.mrb[84].mxu0  ;;  %v4786_v34 = vmax.f32 %v4754_v21, 0.0 }
 0x95c   :  { %v6397_v13 = vpop.f32.mrb[37].mxu1  ;;  %v6533_v39 = vpop.f32.mrb[85].mxu0 }
 0x95d   :  { %v4787_v48 = vmax.f32 %v4755_v46, 0.0  ;;  %v6398_v35 = vadd.f32 %v6397_v13, %v6396_v2  ;;  %v9396_v38 = vadd.f32 %v6533_v39, %v6532_v32  ;;  %v6399_v58 = vpop.f32.mrb[38].mxu1  ;;  %v6535_v47 = vpop.f32.mrb[86].mxu0 }
 0x95e   :  { %v6400_v49 = vpop.f32.mrb[39].mxu1  ;;  %v6536_v23 = vpop.f32.mrb[87].mxu0 }
 0x95f   :  { %v4713_v19 = vadd.f32 %v9254_v6, %v6398_v35  ;;  %v6401_v45 = vadd.f32 %v6400_v49, %v6399_v58  ;;  %v9399_v9 = vadd.f32 %v6536_v23, %v6535_v47  ;;  %v4804_v56 = vpack.c.bf16 %v4787_v48, %v4786_v34 }
 0x961   :  { %v4756_v17 = vadd.f32 %v9276_v55, %v4713_v19  ;;  %v4716_v37 = vadd.f32 %v9260_v10, %v6401_v45  ;;  %6702 = vmatprep.mubr.bf16.mxu0 %v4804_v56 }
 0x963   :  { %v4757_v42 = vadd.f32 %v9276_v55, %v4716_v37  ;;  %v4788_v44 = vmax.f32 %v4756_v17, 0.0 }
 0x965   :  { %v4789_v25 = vmax.f32 %v4757_v42, 0.0 }
 0x967   :  { %v4805_v3 = vpack.c.bf16 %v4789_v25, %v4788_v44 }
 0x969   :  { %6703 = vmatmul.mubr.bf16.gmra.mrb[20].mxu0 %v4805_v3 }
 0x9cc   :  { %v6676_v59 = vpop.f32.mrb[248].mxu0 }
 0x9cd   :  { %v6738_v6 = vadd.f32 %v6676_v59, %v9284_v11  ;;  %v5418_v1 = vpop.f32.mrb[249].mxu0 }
 0x9ce   :  { %v6739_v62 = vadd.f32 %v9274_v40, %v5418_v1  ;;  %v6677_v31 = vpop.f32.mrb[250].mxu0 }
 0x9cf   :  { %v5586_v21 = vadd.f32 %v6738_v6, %v9404_v12  ;;  %v6740_v10 = vadd.f32 %v6677_v31, %v9287_v51  ;;  %v5421_v16 = vpop.f32.mrb[251].mxu0  ;;  %v9433_v6 = vand.u32 127, %v419_v4 }
 0x9d0   :  { %v5584_v55 = vadd.f32 %v6739_v62, %v9404_v12  ;;  %v6741_v46 = vadd.f32 %v9279_v0, %v5421_v16 }
 0x9d1   :  { %v6236_v2 = vmul.f32 -1.442695, %v5586_v21  ;;  %v5587_v32 = vadd.f32 %v6740_v10, %v9404_v12  ;;  %vm5618_vm0 = vcmp.eq.s32.totalorder %v9433_v6, 0  ;;  %v5621_v62 = vmax.f32 %v5586_v21, 0.0 }
 0x9d2   :  { %v6234_v13 = vmul.f32 -1.442695, %v5584_v55  ;;  %v5585_v39 = vadd.f32 %v6741_v46, %v9404_v12  ;;  %v5619_v10 = vmax.f32 %v5584_v55, 0.0 }
 0x9d3   :  { %7303 = vpow2.f32 %v6236_v2  ;;  %v6237_v11 = vmul.f32 -1.442695, %v5587_v32  ;;  %v5622_v4 = vmax.f32 %v5587_v32, 0.0 }
 0x9d4   :  { %7305 = vpow2.f32 %v6234_v13  ;;  %v6235_v40 = vmul.f32 -1.442695, %v5585_v39 }
 0x9d5   :  { %7307 = vpow2.f32 %v6237_v11  ;;  %v5620_v11 = vmax.f32 %v5585_v39, 0.0 }
 0x9d6   :  { %7309 = vpow2.f32 %v6235_v40 }
 0x9dc   :  { %v6680_v34 = vpop.f32.mrb[252].mxu0 }
 0x9dd   :  { %v7304_v48 = vpop.eup %7303  ;;  %v6742_v51 = vadd.f32 %v6680_v34, %v9300_v26  ;;  %v5434_v35 = vpop.f32.mrb[253].mxu0 }
 0x9de   :  { %v7306_v58 = vpop.eup %7305  ;;  %v5749_v47 = vadd.f32 1.0, %v7304_v48  ;;  %v6743_v0 = vadd.f32 %v9292_v7, %v5434_v35  ;;  %v6681_v49 = vpop.f32.mrb[254].mxu0 }
 0x9df   :  { %v7308_v23 = vpop.eup %7307  ;;  %v5747_v19 = vadd.f32 1.0, %v7306_v58  ;;  %v9417_v45 = vadd.f32 %v6742_v51, %v9404_v12  ;;  %v6744_v56 = vadd.f32 %v6681_v49, %v9303_v52  ;;  %v5437_v17 = vpop.f32.mrb[255].mxu0 }
 0x9e0   :  { %v7310_v37 = vpop.eup %7309  ;;  %7311 = vrcp.f32 %v5749_v47  ;;  %v5750_v42 = vadd.f32 1.0, %v7308_v23  ;;  %v9421_v44 = vadd.f32 %v6743_v0, %v9404_v12  ;;  %v6745_v26 = vadd.f32 %v9295_v60, %v5437_v17 }
 0x9e1   :  { %7313 = vrcp.f32 %v5747_v19  ;;  %v5748_v25 = vadd.f32 1.0, %v7310_v37  ;;  %v6240_v7 = vmul.f32 -1.442695, %v9417_v45  ;;  %v9427_v59 = vadd.f32 %v6744_v56, %v9404_v12 }
 0x9e2   :  { %7315 = vrcp.f32 %v5750_v42  ;;  %v6238_v3 = vmul.f32 -1.442695, %v9421_v44  ;;  %v9430_v52 = vadd.f32 %v6745_v26, %v9404_v12 }
 0x9e3   :  { %7317 = vrcp.f32 %v5748_v25  ;;  %v6241_v60 = vmul.f32 -1.442695, %v9427_v59 }
 0x9e4   :  { %7319 = vpow2.f32 %v6240_v7  ;;  %v6239_v1 = vmul.f32 -1.442695, %v9430_v52 }
 0x9e5   :  { %7321 = vpow2.f32 %v6238_v3 }
 0x9e6   :  { %7323 = vpow2.f32 %v6241_v60  ;;  %v5625_v60 = vmax.f32 %v9417_v45, 0.0 }
 0x9e7   :  { %7325 = vpow2.f32 %v6239_v1 }
 0x9ea   :  { %v7312_v31 = vpop.eup %7311 }
 0x9eb   :  { %v7314_v16 = vpop.eup %7313  ;;  %v5845_v46 = vsel %vm5618_vm0, %v5621_v62, %v7312_v31  ;;  %v5623_v62 = vmax.f32 %v9421_v44, 0.0 }
 0x9ec   :  { %v7316_v2 = vpop.eup %7315  ;;  %5878 = vst.msk [vmem:[#allocation38 + $0x10] sm:$0xff] %vm5875_vm1, %v5845_v46  ;;  %v5843_v13 = vsel %vm5618_vm0, %v5619_v10, %v7314_v16  ;;  %v6684_v40 = vpop.f32.mrb[0].mxu0  ;;  %v5626_v16 = vmax.f32 %v9427_v59, 0.0 }
 0x9ed   :  { %v7318_v34 = vpop.eup %7317  ;;  %5876 = vst.msk [vmem:[#allocation38] sm:$0xff] %vm5875_vm1, %v5843_v13  ;;  %v5846_v21 = vsel %vm5618_vm0, %v5622_v4, %v7316_v2  ;;  %v6746_v55 = vadd.f32 %v6684_v40, %v9316_v41  ;;  %v5450_v48 = vpop.f32.mrb[1].mxu0  ;;  %v5624_v13 = vmax.f32 %v9430_v52, 0.0 }
 0x9ee   :  { %v7320_v51 = vpop.eup %7319  ;;  %5879 = vst.msk [vmem:[#allocation38 + $0x18] sm:$0xff] %vm5875_vm1, %v5846_v21  ;;  %v5844_v32 = vsel %vm5618_vm0, %v5620_v11, %v7318_v34  ;;  %v6747_v35 = vadd.f32 %v9308_v29, %v5450_v48  ;;  %v6685_v58 = vpop.f32.mrb[2].mxu0 }
 0x9ef   :  { %v7322_v39 = vpop.eup %7321  ;;  %5877 = vst.msk [vmem:[#allocation38 + $0x8] sm:$0xff] %vm5875_vm1, %v5844_v32  ;;  %v5753_v47 = vadd.f32 1.0, %v7320_v51  ;;  %v9453_v0 = vadd.f32 %v6746_v55, %v9404_v12  ;;  %v6748_v49 = vadd.f32 %v6685_v58, %v9319_v14  ;;  %v5453_v41 = vpop.f32.mrb[3].mxu0 }
 0x9f0   :  { %v7324_v23 = vpop.eup %7323  ;;  %v5751_v19 = vadd.f32 1.0, %v7322_v39  ;;  %v9457_v56 = vadd.f32 %v6747_v35, %v9404_v12  ;;  %v6749_v17 = vadd.f32 %v9311_v36, %v5453_v41 }
 0x9f1   :  { %v7326_v37 = vpop.eup %7325  ;;  %7327 = vrcp.f32 %v5753_v47  ;;  %v5754_v29 = vadd.f32 1.0, %v7324_v23  ;;  %v6244_v42 = vmul.f32 -1.442695, %v9453_v0  ;;  %v9463_v14 = vadd.f32 %v6748_v49, %v9404_v12 }
 0x9f2   :  { %7329 = vrcp.f32 %v5751_v19  ;;  %v5752_v26 = vadd.f32 1.0, %v7326_v37  ;;  %v6242_v25 = vmul.f32 -1.442695, %v9457_v56  ;;  %v9466_v7 = vadd.f32 %v6749_v17, %v9404_v12 }
 0x9f3   :  { %7331 = vrcp.f32 %v5754_v29  ;;  %v6245_v36 = vmul.f32 -1.442695, %v9463_v14  ;;  %v5629_v29 = vmax.f32 %v9453_v0, 0.0 }
 0x9f4   :  { %7333 = vrcp.f32 %v5752_v26  ;;  %v6243_v3 = vmul.f32 -1.442695, %v9466_v7  ;;  %v5627_v26 = vmax.f32 %v9457_v56, 0.0  ;;  %v5628_v0 = vmax.f32 %v9466_v7, 0.0 }
 0x9f5   :  { %7335 = vpow2.f32 %v6244_v42 }
 0x9f6   :  { %7337 = vpow2.f32 %v6242_v25 }
 0x9f7   :  { %7339 = vpow2.f32 %v6245_v36 }
 0x9f8   :  { %7341 = vpow2.f32 %v6243_v3 }
 0x9fb   :  { %v7328_v1 = vpop.eup %7327 }
 0x9fc   :  { %v7330_v31 = vpop.eup %7329  ;;  %v5849_v10 = vsel %vm5618_vm0, %v5625_v60, %v7328_v1  ;;  %v6688_v46 = vpop.f32.mrb[4].mxu0  ;;  %v5630_v60 = vmax.f32 %v9463_v14, 0.0 }
 0x9fd   :  { %v7332_v4 = vpop.eup %7331  ;;  %5882 = vst.msk [vmem:[#allocation38 + $0x30] sm:$0xff] %vm5875_vm1, %v5849_v10  ;;  %v5847_v2 = vsel %vm5618_vm0, %v5623_v62, %v7330_v31  ;;  %v6750_v45 = vadd.f32 %v6688_v46, %v9332_v54  ;;  %v5466_v11 = vpop.f32.mrb[5].mxu0 }
 0x9fe   :  { %v7334_v40 = vpop.eup %7333  ;;  %5880 = vst.msk [vmem:[#allocation38 + $0x20] sm:$0xff] %vm5875_vm1, %v5847_v2  ;;  %v5850_v44 = vsel %vm5618_vm0, %v5626_v16, %v7332_v4  ;;  %v6751_v59 = vadd.f32 %v9324_v18, %v5466_v11  ;;  %v6689_v34 = vpop.f32.mrb[6].mxu0 }
 0x9ff   :  { %v7336_v21 = vpop.eup %7335  ;;  %5883 = vst.msk [vmem:[#allocation38 + $0x38] sm:$0xff] %vm5875_vm1, %v5850_v44  ;;  %v5848_v55 = vsel %vm5618_vm0, %v5624_v13, %v7334_v40  ;;  %v9488_v52 = vadd.f32 %v6750_v45, %v9404_v12  ;;  %v6752_v54 = vadd.f32 %v6689_v34, %v9335_v50  ;;  %v5469_v48 = vpop.f32.mrb[7].mxu0 }
 0xa00   :  { %v7338_v51 = vpop.eup %7337  ;;  %5881 = vst.msk [vmem:[#allocation38 + $0x28] sm:$0xff] %vm5875_vm1, %v5848_v55  ;;  %v5757_v32 = vadd.f32 1.0, %v7336_v21  ;;  %v9493_v35 = vadd.f32 %v6751_v59, %v9404_v12  ;;  %v6753_v18 = vadd.f32 %v9327_v24, %v5469_v48 }
 0xa01   :  { %v7340_v58 = vpop.eup %7339  ;;  %v5755_v39 = vadd.f32 1.0, %v7338_v51  ;;  %v9497_v47 = vadd.f32 %v6752_v54, %v9404_v12  ;;  %v6248_v50 = vmul.f32 -1.442695, %v9488_v52 }
 0xa02   :  { %v7342_v49 = vpop.eup %7341  ;;  %7343 = vrcp.f32 %v5757_v32  ;;  %v5758_v41 = vadd.f32 1.0, %v7340_v58  ;;  %v6246_v19 = vmul.f32 -1.442695, %v9493_v35  ;;  %v9503_v37 = vadd.f32 %v6753_v18, %v9404_v12 }
 0xa03   :  { %7345 = vrcp.f32 %v5755_v39  ;;  %v5756_v23 = vadd.f32 1.0, %v7342_v49  ;;  %v6249_v17 = vmul.f32 -1.442695, %v9497_v47  ;;  %v5633_v18 = vmax.f32 %v9488_v52, 0.0 }
 0xa04   :  { %7347 = vrcp.f32 %v5758_v41  ;;  %v6247_v24 = vmul.f32 -1.442695, %v9503_v37  ;;  %v5631_v49 = vmax.f32 %v9493_v35, 0.0  ;;  %v5632_v35 = vmax.f32 %v9503_v37, 0.0 }
 0xa05   :  { %7349 = vrcp.f32 %v5756_v23 }
 0xa06   :  { %7351 = vpow2.f32 %v6248_v50 }
 0xa07   :  { %7353 = vpow2.f32 %v6246_v19 }
 0xa08   :  { %7355 = vpow2.f32 %v6249_v17  ;;  %v5634_v17 = vmax.f32 %v9497_v47, 0.0 }
 0xa09   :  { %7357 = vpow2.f32 %v6247_v24 }
 0xa0c   :  { %v7344_v42 = vpop.eup %7343  ;;  %v6692_v25 = vpop.f32.mrb[8].mxu0 }
 0xa0d   :  { %v7346_v36 = vpop.eup %7345  ;;  %v5853_v3 = vsel %vm5618_vm0, %v5629_v29, %v7344_v42  ;;  %v6754_v1 = vadd.f32 %v6692_v25, %v9348_v8  ;;  %v5482_v62 = vpop.f32.mrb[9].mxu0 }
 0xa0e   :  { %v7348_v31 = vpop.eup %7347  ;;  %5886 = vst.msk [vmem:[#allocation38 + $0x50] sm:$0xff] %vm5875_vm1, %v5853_v3  ;;  %v5851_v10 = vsel %vm5618_vm0, %v5627_v26, %v7346_v36  ;;  %v6755_v56 = vadd.f32 %v9340_v61, %v5482_v62  ;;  %v6693_v16 = vpop.f32.mrb[10].mxu0 }
 0xa0f   :  { %v7350_v46 = vpop.eup %7349  ;;  %5884 = vst.msk [vmem:[#allocation38 + $0x40] sm:$0xff] %vm5875_vm1, %v5851_v10  ;;  %v5854_v14 = vsel %vm5618_vm0, %v5630_v60, %v7348_v31  ;;  %v9521_v8 = vadd.f32 %v6754_v1, %v9404_v12  ;;  %v6756_v4 = vadd.f32 %v6693_v16, %v9351_v53  ;;  %v5485_v2 = vpop.f32.mrb[11].mxu0 }
 0xa10   :  { %v7352_v13 = vpop.eup %7351  ;;  %5887 = vst.msk [vmem:[#allocation38 + $0x58] sm:$0xff] %vm5875_vm1, %v5854_v14  ;;  %v5852_v7 = vsel %vm5618_vm0, %v5628_v0, %v7350_v46  ;;  %v9528_v61 = vadd.f32 %v6755_v56, %v9404_v12  ;;  %v6757_v45 = vadd.f32 %v9343_v28, %v5485_v2 }
 0xa11   :  { %v7354_v11 = vpop.eup %7353  ;;  %5885 = vst.msk [vmem:[#allocation38 + $0x48] sm:$0xff] %vm5875_vm1, %v5852_v7  ;;  %v5761_v40 = vadd.f32 1.0, %v7352_v13  ;;  %v9533_v44 = vadd.f32 %v6756_v4, %v9404_v12  ;;  %v6252_v54 = vmul.f32 -1.442695, %v9521_v8 }
 0xa12   :  { %v7356_v53 = vpop.eup %7355  ;;  %v5759_v59 = vadd.f32 1.0, %v7354_v11  ;;  %v9536_v34 = vadd.f32 %v6757_v45, %v9404_v12  ;;  %v6250_v28 = vmul.f32 -1.442695, %v9528_v61  ;;  %v5637_v45 = vmax.f32 %v9521_v8, 0.0 }
 0xa13   :  { %v7358_v21 = vpop.eup %7357  ;;  %7359 = vrcp.f32 %v5761_v40  ;;  %v5762_v55 = vadd.f32 1.0, %v7356_v53  ;;  %v6253_v51 = vmul.f32 -1.442695, %v9533_v44 }
 0xa14   :  { %7361 = vrcp.f32 %v5759_v59  ;;  %v5760_v48 = vadd.f32 1.0, %v7358_v21  ;;  %v6251_v32 = vmul.f32 -1.442695, %v9536_v34  ;;  %v5635_v59 = vmax.f32 %v9528_v61, 0.0 }
 0xa15   :  { %7363 = vrcp.f32 %v5762_v55  ;;  %v5638_v21 = vmax.f32 %v9533_v44, 0.0 }
 0xa16   :  { %7365 = vrcp.f32 %v5760_v48 }
 0xa17   :  { %7367 = vpow2.f32 %v6252_v54 }
 0xa18   :  { %7369 = vpow2.f32 %v6250_v28 }
 0xa19   :  { %7371 = vpow2.f32 %v6253_v51 }
 0xa1a   :  { %7373 = vpow2.f32 %v6251_v32  ;;  %v5636_v32 = vmax.f32 %v9536_v34, 0.0 }
 0xa1c   :  { %v6696_v58 = vpop.f32.mrb[12].mxu0 }
 0xa1d   :  { %v7360_v39 = vpop.eup %7359  ;;  %v6758_v41 = vadd.f32 %v6696_v58, %v9364_v15  ;;  %v5498_v50 = vpop.f32.mrb[13].mxu0 }
 0xa1e   :  { %v7362_v23 = vpop.eup %7361  ;;  %v5857_v19 = vsel %vm5618_vm0, %v5633_v18, %v7360_v39  ;;  %v6759_v24 = vadd.f32 %v9356_v22, %v5498_v50  ;;  %v6697_v29 = vpop.f32.mrb[14].mxu0 }
 0xa1f   :  { %v7364_v42 = vpop.eup %7363  ;;  %5890 = vst.msk [vmem:[#allocation38 + $0x70] sm:$0xff] %vm5875_vm1, %v5857_v19  ;;  %v5855_v52 = vsel %vm5618_vm0, %v5631_v49, %v7362_v23  ;;  %v9554_v15 = vadd.f32 %v6758_v41, %v9404_v12  ;;  %v6760_v26 = vadd.f32 %v6697_v29, %v9367_v5  ;;  %v5501_v25 = vpop.f32.mrb[15].mxu0 }
 0xa20   :  { %v7366_v36 = vpop.eup %7365  ;;  %5888 = vst.msk [vmem:[#allocation38 + $0x60] sm:$0xff] %vm5875_vm1, %v5855_v52  ;;  %v5858_v22 = vsel %vm5618_vm0, %v5634_v17, %v7364_v42  ;;  %v9561_v47 = vadd.f32 %v6759_v24, %v9404_v12  ;;  %v6761_v3 = vadd.f32 %v9359_v33, %v5501_v25 }
 0xa21   :  { %v7368_v60 = vpop.eup %7367  ;;  %5891 = vst.msk [vmem:[#allocation38 + $0x78] sm:$0xff] %vm5875_vm1, %v5858_v22  ;;  %v5856_v37 = vsel %vm5618_vm0, %v5632_v35, %v7366_v36  ;;  %v6256_v5 = vmul.f32 -1.442695, %v9554_v15  ;;  %v9569_v1 = vadd.f32 %v6760_v26, %v9404_v12  ;;  %v5641_v26 = vmax.f32 %v9554_v15, 0.0 }
 0xa22   :  { %v7370_v62 = vpop.eup %7369  ;;  %5889 = vst.msk [vmem:[#allocation38 + $0x68] sm:$0xff] %vm5875_vm1, %v5856_v37  ;;  %v5765_v31 = vadd.f32 1.0, %v7368_v60  ;;  %v9573_v10 = vadd.f32 %v6761_v3, %v9404_v12  ;;  %v6254_v46 = vmul.f32 -1.442695, %v9561_v47 }
 0xa23   :  { %v7372_v0 = vpop.eup %7371  ;;  %v5763_v33 = vadd.f32 1.0, %v7370_v62  ;;  %7375 = vpow2.f32 %v6256_v5  ;;  %v6257_v4 = vmul.f32 -1.442695, %v9569_v1  ;;  %v5639_v62 = vmax.f32 %v9561_v47, 0.0 }
 0xa24   :  { %v7374_v56 = vpop.eup %7373  ;;  %7377 = vrcp.f32 %v5765_v31  ;;  %v5766_v16 = vadd.f32 1.0, %v7372_v0  ;;  %v6255_v2 = vmul.f32 -1.442695, %v9573_v10  ;;  %v5642_v31 = vmax.f32 %v9569_v1, 0.0 }
 0xa25   :  { %7379 = vrcp.f32 %v5763_v33  ;;  %v5764_v14 = vadd.f32 1.0, %v7374_v56 }
 0xa26   :  { %7381 = vrcp.f32 %v5766_v16  ;;  %v5640_v16 = vmax.f32 %v9573_v10, 0.0 }
 0xa27   :  { %7383 = vrcp.f32 %v5764_v14 }
 0xa28   :  { %7385 = vpow2.f32 %v6254_v46 }
 0xa29   :  { %7387 = vpow2.f32 %v6257_v4 }
 0xa2a   :  { %7389 = vpow2.f32 %v6255_v2 }
 0xa2c   :  { %v6700_v13 = vpop.f32.mrb[16].mxu0 }
 0xa2d   :  { %v7376_v7 = vpop.eup %7375  ;;  %v6762_v11 = vadd.f32 %v6700_v13, %v9380_v30  ;;  %v5514_v40 = vpop.f32.mrb[17].mxu0 }
 0xa2e   :  { %v7378_v53 = vpop.eup %7377  ;;  %v5769_v55 = vadd.f32 1.0, %v7376_v7  ;;  %v6763_v54 = vadd.f32 %v9372_v27, %v5514_v40  ;;  %v6701_v48 = vpop.f32.mrb[18].mxu0 }
 0xa2f   :  { %v7380_v28 = vpop.eup %7379  ;;  %v5861_v51 = vsel %vm5618_vm0, %v5637_v45, %v7378_v53  ;;  %v9587_v8 = vadd.f32 %v6762_v11, %v9404_v12  ;;  %v6764_v30 = vadd.f32 %v6701_v48, %v9383_v43  ;;  %v5517_v18 = vpop.f32.mrb[19].mxu0 }
 0xa30   :  { %v7382_v58 = vpop.eup %7381  ;;  %5894 = vst.msk [vmem:[#allocation38 + $0x90] sm:$0xff] %vm5875_vm1, %v5861_v51  ;;  %v5859_v61 = vsel %vm5618_vm0, %v5635_v59, %v7380_v28  ;;  %7391 = vrcp.f32 %v5769_v55  ;;  %v9594_v27 = vadd.f32 %v6763_v54, %v9404_v12  ;;  %v6765_v44 = vadd.f32 %v9375_v57, %v5517_v18 }
 0xa31   :  { %v7384_v39 = vpop.eup %7383  ;;  %5892 = vst.msk [vmem:[#allocation38 + $0x80] sm:$0xff] %vm5875_vm1, %v5859_v61  ;;  %v5862_v34 = vsel %vm5618_vm0, %v5638_v21, %v7382_v58  ;;  %v6260_v43 = vmul.f32 -1.442695, %v9587_v8  ;;  %v9602_v49 = vadd.f32 %v6764_v30, %v9404_v12  ;;  %v5645_v48 = vmax.f32 %v9587_v8, 0.0 }
 0xa32   :  { %v7386_v41 = vpop.eup %7385  ;;  %5895 = vst.msk [vmem:[#allocation38 + $0x98] sm:$0xff] %vm5875_vm1, %v5862_v34  ;;  %v5860_v50 = vsel %vm5618_vm0, %v5636_v32, %v7384_v39  ;;  %v6258_v23 = vmul.f32 -1.442695, %v9594_v27  ;;  %v9609_v57 = vadd.f32 %v6765_v44, %v9404_v12  ;;  %v5643_v51 = vmax.f32 %v9594_v27, 0.0 }
 0xa33   :  { %v7388_v19 = vpop.eup %7387  ;;  %5893 = vst.msk [vmem:[#allocation38 + $0x88] sm:$0xff] %vm5875_vm1, %v5860_v50  ;;  %v5767_v17 = vadd.f32 1.0, %v7386_v41  ;;  %7393 = vpow2.f32 %v6260_v43  ;;  %v6261_v42 = vmul.f32 -1.442695, %v9602_v49  ;;  %v5646_v61 = vmax.f32 %v9602_v49, 0.0 }
 0xa34   :  { %v7390_v24 = vpop.eup %7389  ;;  %v5770_v29 = vadd.f32 1.0, %v7388_v19  ;;  %7395 = vpow2.f32 %v6258_v23  ;;  %v6259_v35 = vmul.f32 -1.442695, %v9609_v57  ;;  %v5644_v39 = vmax.f32 %v9609_v57, 0.0 }
 0xa35   :  { %7397 = vrcp.f32 %v5767_v17  ;;  %v5768_v52 = vadd.f32 1.0, %v7390_v24 }
 0xa36   :  { %7399 = vrcp.f32 %v5770_v29 }
 0xa37   :  { %7401 = vrcp.f32 %v5768_v52 }
 0xa38   :  { %7403 = vpow2.f32 %v6261_v42 }
 0xa39   :  { %7405 = vpow2.f32 %v6259_v35 }
 0xa3a   :  { %v7392_v25 = vpop.eup %7391 }
 0xa3b   :  { %v5865_v36 = vsel %vm5618_vm0, %v5641_v26, %v7392_v25 }
 0xa3c   :  { %5898 = vst.msk [vmem:[#allocation38 + $0xb0] sm:$0xff] %vm5875_vm1, %v5865_v36  ;;  %v6704_v22 = vpop.f32.mrb[20].mxu0 }
 0xa3d   :  { %v7394_v3 = vpop.eup %7393  ;;  %v6766_v60 = vadd.f32 %v6704_v22, %v9396_v38  ;;  %v5530_v37 = vpop.f32.mrb[21].mxu0 }
 0xa3e   :  { %v7396_v5 = vpop.eup %7395  ;;  %v5773_v0 = vadd.f32 1.0, %v7394_v3  ;;  %v6767_v15 = vadd.f32 %v9388_v63, %v5530_v37  ;;  %v6705_v33 = vpop.f32.mrb[22].mxu0 }
 0xa3f   :  { %v7398_v56 = vpop.eup %7397  ;;  %v5771_v46 = vadd.f32 1.0, %v7396_v5  ;;  %v9624_v14 = vadd.f32 %v6766_v60, %v9404_v12  ;;  %v6768_v4 = vadd.f32 %v6705_v33, %v9399_v9  ;;  %v5533_v38 = vpop.f32.mrb[23].mxu0 }
 0xa40   :  { %v7400_v2 = vpop.eup %7399  ;;  %v5863_v47 = vsel %vm5618_vm0, %v5639_v62, %v7398_v56  ;;  %7407 = vrcp.f32 %v5773_v0  ;;  %v5612_v1 = vadd.f32 %v6767_v15, %v9404_v12  ;;  %v6769_v63 = vadd.f32 %v9391_v20, %v5533_v38 }
 0xa41   :  { %v7402_v13 = vpop.eup %7401  ;;  %5896 = vst.msk [vmem:[#allocation38 + $0xa0] sm:$0xff] %vm5875_vm1, %v5863_v47  ;;  %v5866_v10 = vsel %vm5618_vm0, %v5642_v31, %v7400_v2  ;;  %7409 = vrcp.f32 %v5771_v46  ;;  %v6264_v7 = vmul.f32 -1.442695, %v9624_v14  ;;  %v5615_v40 = vadd.f32 %v6768_v4, %v9404_v12 }
 0xa42   :  { %v7404_v9 = vpop.eup %7403  ;;  %5899 = vst.msk [vmem:[#allocation38 + $0xb8] sm:$0xff] %vm5875_vm1, %v5866_v10  ;;  %v5864_v45 = vsel %vm5618_vm0, %v5640_v16, %v7402_v13  ;;  %v6262_v11 = vmul.f32 -1.442695, %v5612_v1  ;;  %v5613_v59 = vadd.f32 %v6769_v63, %v9404_v12  ;;  %v5649_v57 = vmax.f32 %v9624_v14, 0.0 }
 0xa43   :  { %v7406_v53 = vpop.eup %7405  ;;  %5897 = vst.msk [vmem:[#allocation38 + $0xa8] sm:$0xff] %vm5875_vm1, %v5864_v45  ;;  %v5774_v20 = vadd.f32 1.0, %v7404_v9  ;;  %7411 = vpow2.f32 %v6264_v7  ;;  %v6265_v55 = vmul.f32 -1.442695, %v5615_v40  ;;  %v5647_v24 = vmax.f32 %v5612_v1, 0.0 }
 0xa44   :  { %v5772_v21 = vadd.f32 1.0, %v7406_v53  ;;  %7413 = vpow2.f32 %v6262_v11  ;;  %v6263_v54 = vmul.f32 -1.442695, %v5613_v59  ;;  %v5650_v35 = vmax.f32 %v5615_v40, 0.0 }
 0xa45   :  { %7415 = vrcp.f32 %v5774_v20  ;;  %v5648_v25 = vmax.f32 %v5613_v59, 0.0 }
 0xa46   :  { %7417 = vrcp.f32 %v5772_v21 }
 0xa47   :  { %7419 = vpow2.f32 %v6265_v55 }
 0xa48   :  { %7421 = vpow2.f32 %v6263_v54 }
 0xa4a   :  { %v7408_v28 = vpop.eup %7407 }
 0xa4b   :  { %v7410_v32 = vpop.eup %7409  ;;  %v5869_v30 = vsel %vm5618_vm0, %v5645_v48, %v7408_v28 }
 0xa4c   :  { %5902 = vst.msk [vmem:[#allocation38 + $0xd0] sm:$0xff] %vm5875_vm1, %v5869_v30  ;;  %v5867_v12 = vsel %vm5618_vm0, %v5643_v51, %v7410_v32 }
 0xa4d   :  { %v7412_v18 = vpop.eup %7411  ;;  %5900 = vst.msk [vmem:[#allocation38 + $0xc0] sm:$0xff] %vm5875_vm1, %v5867_v12 }
 0xa4e   :  { %v7414_v58 = vpop.eup %7413  ;;  %v5777_v44 = vadd.f32 1.0, %v7412_v18 }
 0xa4f   :  { %v7416_v8 = vpop.eup %7415  ;;  %v5775_v27 = vadd.f32 1.0, %v7414_v58 }
 0xa50   :  { %v7418_v34 = vpop.eup %7417  ;;  %v5870_v43 = vsel %vm5618_vm0, %v5646_v61, %v7416_v8  ;;  %7423 = vrcp.f32 %v5777_v44 }
 0xa51   :  { %v7420_v41 = vpop.eup %7419  ;;  %5903 = vst.msk [vmem:[#allocation38 + $0xd8] sm:$0xff] %vm5875_vm1, %v5870_v43  ;;  %v5868_v50 = vsel %vm5618_vm0, %v5644_v39, %v7418_v34  ;;  %7425 = vrcp.f32 %v5775_v27 }
 0xa52   :  { %v7422_v23 = vpop.eup %7421  ;;  %5901 = vst.msk [vmem:[#allocation38 + $0xc8] sm:$0xff] %vm5875_vm1, %v5868_v50  ;;  %v5778_v49 = vadd.f32 1.0, %v7420_v41 }
 0xa53   :  { %v5776_v19 = vadd.f32 1.0, %v7422_v23 }
 0xa54   :  { %7427 = vrcp.f32 %v5778_v49 }
 0xa55   :  { %7429 = vrcp.f32 %v5776_v19 }
 0xa5a   :  { %v7424_v17 = vpop.eup %7423 }
 0xa5b   :  { %v7426_v29 = vpop.eup %7425  ;;  %v5873_v42 = vsel %vm5618_vm0, %v5649_v57, %v7424_v17 }
 0xa5c   :  { %5906 = vst.msk [vmem:[#allocation38 + $0xf0] sm:$0xff] %vm5875_vm1, %v5873_v42  ;;  %v5871_v52 = vsel %vm5618_vm0, %v5647_v24, %v7426_v29 }
 0xa5d   :  { %5904 = vst.msk [vmem:[#allocation38 + $0xe0] sm:$0xff] %vm5875_vm1, %v5871_v52 }
 0xa5e   :  { %v7428_v26 = vpop.eup %7427 }
 0xa5f   :  { %v7430_v36 = vpop.eup %7429  ;;  %v5874_v22 = vsel %vm5618_vm0, %v5650_v35, %v7428_v26 }
 0xa60   :  { %5907 = vst.msk [vmem:[#allocation38 + $0xf8] sm:$0xff] %vm5875_vm1, %v5874_v22  ;;  %v5872_v3 = vsel %vm5618_vm0, %v5648_v25, %v7430_v36 }
 0xa61   :  { %5905 = vst.msk [vmem:[#allocation38 + $0xe8] sm:$0xff] %vm5875_vm1, %v5872_v3 }
 0xa62   :  { %7980 = shalt.err (!%p7977_p6)
}
 0xa63   :  { %s9741_s26 = sld [smem:[#allocation62_spill]] }
 0xa69   :  { %s7981_s0 = scalar_lea.hbm %s9741_s26, 4096 }
 0xa6a   :  { %p7982_p7 = scmp.ne.s32.totalorder %s9741_s26, %s7981_s0  ;;  %p7985_p8 = scmp.lt.u32.totalorder %s7981_s0, %s9741_s26 }
 0xa6c   :  { %p7987_p9 = pnand %p7985_p8, %p7982_p7 }
 0xa6e   :  { %7990 = shalt.err (!%p7987_p9)
}
 0xa6f   :  { %5919 = dma.vmem_to_hbm [thread:$0]  %s5914_s27, 4096, %s9741_s26, [#allocation4], %s8018_s28, %s8018_s28, %s8019_s29  }
 0xa70   :  { %8015 = dma.done.wait [#allocation4], 4096  }
 0xa71   :  { %8016 = vsyncadd [#allocation4], 4294963200 }
 0xa72   :  { %5923 = vsyncpa [#allocation3], 1 }
 0xa73   :  { %5924 = vsyncpa [#allocation6], 1 }
 0xa74   :  { %5925 = vsyncpa [#allocation9], 1 }
 0xa75   :  { %5926 = vsyncpa [#allocation12], 1 }
 0xa76   :  { %5927 = vsyncpa [#allocation15], 1 }
 0xa77   :  { %5928 = vsyncpa [#allocation18], 1 }
 0xa78   :  { %5929 = vsyncpa [#allocation21], 1 }
 0xa79   :  { %5930 = vsyncpa [#allocation24], 1 }
 0xa7a   :  { %5931 = vsyncpa [#allocation27], 1 }
 0xa7b   :  { %5932 = vsyncpa [#allocation30], 1 }
 0xa7c   :  { %5933 = vsyncpa [#allocation33], 1 }
 0xa7d   :  { %5934 = vsyncpa [#allocation36], 1 }
 0xa7e   :  { %5935 = vsyncpa [#allocation4], 1 }

</bundles_post_ra>
